<compile_context>
chip_gen: v7x
topology: tpu7x:2x2x1
jax: 0.10.0
libtpu: 0.0.40
codegen_flags: <defaults>
</compile_context>

<pallas_src>
import functools

import jax
import jax.numpy as jnp
from jax.experimental import pallas as pl
from jax.experimental.pallas import tpu as pltpu


# ----------------------------------------------------------------------------
# Pallas kernels
# ----------------------------------------------------------------------------
def _conv3x3_bias_act_kernel(x_ref, w_ref, b_ref, o_ref, acc_ref, *, H, W, Cin,
                             apply_relu):
    """Fused 3x3 conv (in-kernel im2col) + bias + optional ReLU.

    x_ref  : (1, H+2, W+2, Cin)  padded NHWC input tile (bf16)
    w_ref  : (9, Cin, Cout)      weights, tap index k = ky*3 + kx (bf16)
    b_ref  : (1, Cout)           bias (f32)
    o_ref  : (1, H*W, Cout)      output tile (bf16)
    acc_ref: (H*W, Cout)         f32 VMEM scratch accumulator
    """
    acc_ref[...] = jnp.zeros_like(acc_ref)
    for k in range(9):                       # unrolled ky/kx taps
        ky, kx = divmod(k, 3)
        win = x_ref[0, ky:ky + H, kx:kx + W, :].reshape(H * W, Cin)
        acc_ref[...] += jnp.dot(win, w_ref[k],
                                preferred_element_type=jnp.float32)
    r = acc_ref[...] + b_ref[...]
    if apply_relu:
        r = jnp.maximum(r, 0.0)
    o_ref[0] = r.astype(o_ref.dtype)


def _relu_kernel(x_ref, o_ref):
    # Only used when an activation is requested at a conv index (pre-ReLU),
    # so the ReLU could not be fused into the conv kernel.
    o_ref[...] = jnp.maximum(x_ref[...], 0)


def _maxpool2x2_kernel(x_ref, o_ref, *, C):
    # x_ref: (1, Ho, 2, Wo, 2*C) ; o_ref: (1, Ho, Wo, C)
    x = x_ref[0]
    m = jnp.maximum(x[..., :C], x[..., C:])   # horizontal 2-tap (lane halves)
    o_ref[0] = jnp.max(m, axis=1)             # vertical 2-tap (middle axis)


def _l1_pairs_kernel(*refs):
    """refs = (f_0,...,f_{L-1}, o_0,...,o_{L-1}).

    f_i: (2N, M_i) activation, rows [:N] are x-features, rows [N:] y-features.
    o_i: (1, 1) f32 = mean(|f_i[:N] - f_i[N:]|)   (torch l1_loss, mean red.)
    """
    n = len(refs) // 2
    for f_ref, o_ref in zip(refs[:n], refs[n:]):
        f = f_ref[...].astype(jnp.float32)
        half = f.shape[0] // 2
        d = jnp.abs(f[:half] - f[half:])
        o_ref[...] = jnp.sum(d, keepdims=True) * (1.0 / float(d.size))


# ----------------------------------------------------------------------------
# Wrappers (only free reshapes / cheap padding outside the kernels)
# ----------------------------------------------------------------------------
def conv2d_3x3_bias_act(x, w9, b, *, apply_relu):
    """x: (N,H,W,Cin) bf16 NHWC. w9: (9,Cin,Cout) bf16. b: (1,Cout) f32."""
    N, H, W, Cin = x.shape
    Cout = w9.shape[-1]
    xp = jnp.pad(x, ((0, 0), (1, 1), (1, 1), (0, 0)))
    kernel = functools.partial(_conv3x3_bias_act_kernel, H=H, W=W, Cin=Cin,
                               apply_relu=apply_relu)
    out = pl.pallas_call(
        kernel,
        out_shape=jax.ShapeDtypeStruct((N, H * W, Cout), jnp.bfloat16),
        grid=(N,),
        in_specs=[
            pl.BlockSpec((1, H + 2, W + 2, Cin), lambda n: (n, 0, 0, 0)),
            pl.BlockSpec((9, Cin, Cout), lambda n: (0, 0, 0)),
            pl.BlockSpec((1, Cout), lambda n: (0, 0)),
        ],
        out_specs=pl.BlockSpec((1, H * W, Cout), lambda n: (n, 0, 0)),
        scratch_shapes=[pltpu.VMEM((H * W, Cout), jnp.float32)],
        compiler_params=pltpu.CompilerParams(dimension_semantics=("parallel",)),
    )(xp, w9, b)
    return out.reshape(N, H, W, Cout)


def relu(x):
    N, H, W, C = x.shape
    x2 = x.reshape(N, H * W * C)              # lane-dense view (free reshape)
    out = pl.pallas_call(
        _relu_kernel,
        out_shape=jax.ShapeDtypeStruct(x2.shape, x2.dtype),
        grid=(N,),
        in_specs=[pl.BlockSpec((1, H * W * C), lambda n: (n, 0))],
        out_specs=pl.BlockSpec((1, H * W * C), lambda n: (n, 0)),
        compiler_params=pltpu.CompilerParams(dimension_semantics=("parallel",)),
    )(x2)
    return out.reshape(N, H, W, C)


def maxpool2x2(x):
    N, H, W, C = x.shape
    Ho, Wo = H // 2, W // 2
    x = x[:, :2 * Ho, :2 * Wo, :]             # floor-pool like torch MaxPool2d(2)
    x5 = x.reshape(N, Ho, 2, Wo, 2 * C)       # free reshape (no HBM copy)
    kernel = functools.partial(_maxpool2x2_kernel, C=C)
    return pl.pallas_call(
        kernel,
        out_shape=jax.ShapeDtypeStruct((N, Ho, Wo, C), x.dtype),
        grid=(N,),
        in_specs=[pl.BlockSpec((1, Ho, 2, Wo, 2 * C),
                               lambda n: (n, 0, 0, 0, 0))],
        out_specs=pl.BlockSpec((1, Ho, Wo, C), lambda n: (n, 0, 0, 0)),
        compiler_params=pltpu.CompilerParams(dimension_semantics=("parallel",)),
    )(x5)


def l1_losses(feats, indices):
    """feats[idx]: (2N, H, W, C) batched x/y activation -> {idx: f32 scalar}."""
    flat = [feats[idx].reshape(feats[idx].shape[0], -1) for idx in indices]
    L = len(flat)
    outs = pl.pallas_call(
        _l1_pairs_kernel,
        out_shape=tuple(jax.ShapeDtypeStruct((1, 1), jnp.float32)
                        for _ in range(L)),
        in_specs=[pl.BlockSpec(memory_space=pltpu.MemorySpace.VMEM)
                  for _ in range(L)],
        out_specs=tuple(pl.BlockSpec(memory_space=pltpu.MemorySpace.VMEM)
                        for _ in range(L)),
    )(*flat)
    return {idx: outs[i][0, 0] for i, idx in enumerate(indices)}


# ----------------------------------------------------------------------------
# VGG19 feature extractor + loss (mirrors torchvision vgg19.features indexing)
# ----------------------------------------------------------------------------
# Real VGG19 channel widths for the prefix; indices match torchvision.
VGG19_CFG = [
    ("conv", 3, 64),     # 0
    ("relu",),           # 1
    ("conv", 64, 64),    # 2
    ("relu",),           # 3
    ("pool",),           # 4
    ("conv", 64, 128),   # 5
    ("relu",),           # 6
    ("conv", 128, 128),  # 7
    ("relu",),           # 8
]


class VGG19LossPallas:
    def __init__(self, layer_activation_indices_weights, batch_norm=False, seed=42):
        assert not batch_norm, "batch_norm variant not implemented"
        self.law = dict(layer_activation_indices_weights)
        self.indices = sorted(self.law.keys())
        self.max_idx = max(self.indices)
        assert self.max_idx < len(VGG19_CFG)

        # Deterministic He-style init (torch weight layout), stored pre-cast /
        # pre-transposed for the fused kernel: w9 = (9, Cin, Cout) bf16.
        self.params = {}
        key = jax.random.PRNGKey(seed)
        for idx, spec in enumerate(VGG19_CFG):
            if spec[0] == "conv":
                cin, cout = spec[1], spec[2]
                key, kw, kb = jax.random.split(key, 3)
                w = jax.random.normal(kw, (cout, cin, 3, 3), jnp.float32) * jnp.sqrt(
                    2.0 / (9.0 * cin))
                b = jax.random.normal(kb, (cout,), jnp.float32) * 0.01
                w9 = jnp.transpose(w, (2, 3, 1, 0)).reshape(9, cin, cout)
                self.params[idx] = (w9.astype(jnp.bfloat16), b.reshape(1, cout))

    def _features(self, x_nchw):
        # NCHW (PyTorch convention) -> NHWC, bf16 activations between layers.
        x = jnp.transpose(x_nchw, (0, 2, 3, 1)).astype(jnp.bfloat16)
        feats = {}
        idx = 0
        while idx <= self.max_idx:
            kind = VGG19_CFG[idx][0]
            if kind == "conv":
                w9, b = self.params[idx]
                next_is_relu = (idx + 1 < len(VGG19_CFG)
                                and VGG19_CFG[idx + 1][0] == "relu")
                # Fuse the following ReLU unless the pre-ReLU conv activation
                # itself is requested.
                fuse = next_is_relu and idx not in self.law
                x = conv2d_3x3_bias_act(x, w9, b, apply_relu=fuse)
                if idx in self.law:
                    feats[idx] = x
                if fuse:
                    idx += 1                  # the ReLU layer was consumed
                    if idx in self.law:
                        feats[idx] = x
            elif kind == "relu":
                x = relu(x)
                if idx in self.law:
                    feats[idx] = x
            else:  # pool
                x = maxpool2x2(x)
                if idx in self.law:
                    feats[idx] = x
            idx += 1
        return feats

    def __call__(self, x, y):
        # Batch x and y so the feature pass runs once (grid extent 2N).
        xy = jnp.concatenate([x, y], axis=0)
        feats = self._features(xy)
        per_layer = l1_losses(feats, self.indices)
        out = {}
        loss = jnp.float32(0.0)
        for idx, weight in self.law.items():
            d = per_layer[idx]
            out[idx] = d
            loss = loss + d * weight
        return loss, out


# ----------------------------------------------------------------------------
if __name__ == "__main__":
    key = jax.random.PRNGKey(0)
    kx, ky = jax.random.split(key)
    # NCHW inputs, as the PyTorch module expects.
    x = jax.random.normal(kx, (2, 3, 16, 16), jnp.float32)
    y = jax.random.normal(ky, (2, 3, 16, 16), jnp.float32)

    layer_weights = {1: 1.0, 3: 0.75, 6: 0.5, 8: 0.25}
    loss_mod = VGG19LossPallas(layer_weights, batch_norm=False)

    loss, per_layer = loss_mod(x, y)
    jax.block_until_ready(loss)
    for v in per_layer.values():
        jax.block_until_ready(v)

    print("KERNEL_OK")
</pallas_src>

<mosaic_0001>
module attributes {stable_mosaic.version = 11 : i64} {
  func.func @_conv3x3_bias_act_kernel(%arg0: i32, %arg1: memref<1x18x18x3xbf16, #tpu.memory_space<vmem>>, %arg2: memref<9x3x64xbf16, #tpu.memory_space<vmem>>, %arg3: memref<1x64xf32, #tpu.memory_space<vmem>>, %arg4: memref<1x256x64xbf16, #tpu.memory_space<vmem>>, %arg5: memref<256x64xf32, #tpu.memory_space<vmem>>) attributes {dimension_semantics = [#tpu.dimension_semantics<parallel>], iteration_bounds = array<i64: 4>, scalar_prefetch = 0 : i64, scratch_operands = 1 : i64, tpu.core_type = #tpu.core_type<tc>, window_params = [{transform_indices = @transform_0, window_bounds = array<i64: 1, 18, 18, 3>}, {pipeline_mode = #tpu.pipeline_mode<synchronous>, transform_indices = @transform_1, window_bounds = array<i64: 9, 3, 64>}, {pipeline_mode = #tpu.pipeline_mode<synchronous>, transform_indices = @transform_2, window_bounds = array<i64: 1, 64>}, {transform_indices = @transform_3, window_bounds = array<i64: 1, 256, 64>}]} {
    %cst = arith.constant 0.000000e+00 : f32
    %0 = vector.broadcast %cst : f32 to vector<256x64xf32>
    %c0 = arith.constant 0 : index
    %c0_0 = arith.constant 0 : index
    %1 = vector.load %arg5[%c0, %c0_0] : memref<256x64xf32, #tpu.memory_space<vmem>>, vector<256x64xf32>
    tpu.vector_store %arg5[%c0, %c0_0], %0 {strides = array<i32>} : memref<256x64xf32, #tpu.memory_space<vmem>>, vector<256x64xf32>,
    %c0_1 = arith.constant 0 : index
    %c0_2 = arith.constant 0 : index
    %c0_3 = arith.constant 0 : index
    %c0_4 = arith.constant 0 : index
    %2 = vector.load %arg1[%c0_1, %c0_2, %c0_3, %c0_4] : memref<1x18x18x3xbf16, #tpu.memory_space<vmem>>, vector<1x16x16x3xbf16>
    %3 = vector.shape_cast %2 : vector<1x16x16x3xbf16> to vector<16x16x3xbf16>
    %4 = vector.shape_cast %3 : vector<16x16x3xbf16> to vector<256x3xbf16>
    %c0_5 = arith.constant 0 : index
    %c0_6 = arith.constant 0 : index
    %5 = vector.load %arg5[%c0_5, %c0_6] : memref<256x64xf32, #tpu.memory_space<vmem>>, vector<256x64xf32>
    %c0_7 = arith.constant 0 : index
    %c0_8 = arith.constant 0 : index
    %c0_9 = arith.constant 0 : index
    %6 = vector.load %arg2[%c0_7, %c0_8, %c0_9] : memref<9x3x64xbf16, #tpu.memory_space<vmem>>, vector<1x3x64xbf16>
    %7 = vector.shape_cast %6 : vector<1x3x64xbf16> to vector<3x64xbf16>
    %cst_10 = arith.constant dense<0.000000e+00> : vector<256x64xf32>
    %8 = tpu.matmul %4, %7, %cst_10 {dimension_numbers = #tpu.dot_dimension_numbers<[1], [0], [0], [1], [0, 0, 1, 1], [], []>} : vector<256x3xbf16>, vector<3x64xbf16>, vector<256x64xf32> -> vector<256x64xf32>
    %9 = arith.addf %5, %8 : vector<256x64xf32>
    %c0_11 = arith.constant 0 : index
    %c0_12 = arith.constant 0 : index
    %10 = vector.load %arg5[%c0_11, %c0_12] : memref<256x64xf32, #tpu.memory_space<vmem>>, vector<256x64xf32>
    tpu.vector_store %arg5[%c0_11, %c0_12], %9 {strides = array<i32>} : memref<256x64xf32, #tpu.memory_space<vmem>>, vector<256x64xf32>,
    %c0_13 = arith.constant 0 : index
    %c0_14 = arith.constant 0 : index
    %c1 = arith.constant 1 : index
    %c0_15 = arith.constant 0 : index
    %11 = vector.load %arg1[%c0_13, %c0_14, %c1, %c0_15] : memref<1x18x18x3xbf16, #tpu.memory_space<vmem>>, vector<1x16x16x3xbf16>
    %12 = vector.shape_cast %11 : vector<1x16x16x3xbf16> to vector<16x16x3xbf16>
    %13 = vector.shape_cast %12 : vector<16x16x3xbf16> to vector<256x3xbf16>
    %c0_16 = arith.constant 0 : index
    %c0_17 = arith.constant 0 : index
    %14 = vector.load %arg5[%c0_16, %c0_17] : memref<256x64xf32, #tpu.memory_space<vmem>>, vector<256x64xf32>
    %c1_18 = arith.constant 1 : index
    %c0_19 = arith.constant 0 : index
    %c0_20 = arith.constant 0 : index
    %15 = vector.load %arg2[%c1_18, %c0_19, %c0_20] : memref<9x3x64xbf16, #tpu.memory_space<vmem>>, vector<1x3x64xbf16>
    %16 = vector.shape_cast %15 : vector<1x3x64xbf16> to vector<3x64xbf16>
    %cst_21 = arith.constant dense<0.000000e+00> : vector<256x64xf32>
    %17 = tpu.matmul %13, %16, %cst_21 {dimension_numbers = #tpu.dot_dimension_numbers<[1], [0], [0], [1], [0, 0, 1, 1], [], []>} : vector<256x3xbf16>, vector<3x64xbf16>, vector<256x64xf32> -> vector<256x64xf32>
    %18 = arith.addf %14, %17 : vector<256x64xf32>
    %c0_22 = arith.constant 0 : index
    %c0_23 = arith.constant 0 : index
    %19 = vector.load %arg5[%c0_22, %c0_23] : memref<256x64xf32, #tpu.memory_space<vmem>>, vector<256x64xf32>
    tpu.vector_store %arg5[%c0_22, %c0_23], %18 {strides = array<i32>} : memref<256x64xf32, #tpu.memory_space<vmem>>, vector<256x64xf32>,
    %c0_24 = arith.constant 0 : index
    %c0_25 = arith.constant 0 : index
    %c2 = arith.constant 2 : index
    %c0_26 = arith.constant 0 : index
    %20 = vector.load %arg1[%c0_24, %c0_25, %c2, %c0_26] : memref<1x18x18x3xbf16, #tpu.memory_space<vmem>>, vector<1x16x16x3xbf16>
    %21 = vector.shape_cast %20 : vector<1x16x16x3xbf16> to vector<16x16x3xbf16>
    %22 = vector.shape_cast %21 : vector<16x16x3xbf16> to vector<256x3xbf16>
    %c0_27 = arith.constant 0 : index
    %c0_28 = arith.constant 0 : index
    %23 = vector.load %arg5[%c0_27, %c0_28] : memref<256x64xf32, #tpu.memory_space<vmem>>, vector<256x64xf32>
    %c2_29 = arith.constant 2 : index
    %c0_30 = arith.constant 0 : index
    %c0_31 = arith.constant 0 : index
    %24 = vector.load %arg2[%c2_29, %c0_30, %c0_31] : memref<9x3x64xbf16, #tpu.memory_space<vmem>>, vector<1x3x64xbf16>
    %25 = vector.shape_cast %24 : vector<1x3x64xbf16> to vector<3x64xbf16>
    %cst_32 = arith.constant dense<0.000000e+00> : vector<256x64xf32>
    %26 = tpu.matmul %22, %25, %cst_32 {dimension_numbers = #tpu.dot_dimension_numbers<[1], [0], [0], [1], [0, 0, 1, 1], [], []>} : vector<256x3xbf16>, vector<3x64xbf16>, vector<256x64xf32> -> vector<256x64xf32>
    %27 = arith.addf %23, %26 : vector<256x64xf32>
    %c0_33 = arith.constant 0 : index
    %c0_34 = arith.constant 0 : index
    %28 = vector.load %arg5[%c0_33, %c0_34] : memref<256x64xf32, #tpu.memory_space<vmem>>, vector<256x64xf32>
    tpu.vector_store %arg5[%c0_33, %c0_34], %27 {strides = array<i32>} : memref<256x64xf32, #tpu.memory_space<vmem>>, vector<256x64xf32>,
    %c0_35 = arith.constant 0 : index
    %c1_36 = arith.constant 1 : index
    %c0_37 = arith.constant 0 : index
    %c0_38 = arith.constant 0 : index
    %29 = vector.load %arg1[%c0_35, %c1_36, %c0_37, %c0_38] : memref<1x18x18x3xbf16, #tpu.memory_space<vmem>>, vector<1x16x16x3xbf16>
    %30 = vector.shape_cast %29 : vector<1x16x16x3xbf16> to vector<16x16x3xbf16>
    %31 = vector.shape_cast %30 : vector<16x16x3xbf16> to vector<256x3xbf16>
    %c0_39 = arith.constant 0 : index
    %c0_40 = arith.constant 0 : index
    %32 = vector.load %arg5[%c0_39, %c0_40] : memref<256x64xf32, #tpu.memory_space<vmem>>, vector<256x64xf32>
    %c3 = arith.constant 3 : index
    %c0_41 = arith.constant 0 : index
    %c0_42 = arith.constant 0 : index
    %33 = vector.load %arg2[%c3, %c0_41, %c0_42] : memref<9x3x64xbf16, #tpu.memory_space<vmem>>, vector<1x3x64xbf16>
    %34 = vector.shape_cast %33 : vector<1x3x64xbf16> to vector<3x64xbf16>
    %cst_43 = arith.constant dense<0.000000e+00> : vector<256x64xf32>
    %35 = tpu.matmul %31, %34, %cst_43 {dimension_numbers = #tpu.dot_dimension_numbers<[1], [0], [0], [1], [0, 0, 1, 1], [], []>} : vector<256x3xbf16>, vector<3x64xbf16>, vector<256x64xf32> -> vector<256x64xf32>
    %36 = arith.addf %32, %35 : vector<256x64xf32>
    %c0_44 = arith.constant 0 : index
    %c0_45 = arith.constant 0 : index
    %37 = vector.load %arg5[%c0_44, %c0_45] : memref<256x64xf32, #tpu.memory_space<vmem>>, vector<256x64xf32>
    tpu.vector_store %arg5[%c0_44, %c0_45], %36 {strides = array<i32>} : memref<256x64xf32, #tpu.memory_space<vmem>>, vector<256x64xf32>,
    %c0_46 = arith.constant 0 : index
    %c1_47 = arith.constant 1 : index
    %c1_48 = arith.constant 1 : index
    %c0_49 = arith.constant 0 : index
    %38 = vector.load %arg1[%c0_46, %c1_47, %c1_48, %c0_49] : memref<1x18x18x3xbf16, #tpu.memory_space<vmem>>, vector<1x16x16x3xbf16>
    %39 = vector.shape_cast %38 : vector<1x16x16x3xbf16> to vector<16x16x3xbf16>
    %40 = vector.shape_cast %39 : vector<16x16x3xbf16> to vector<256x3xbf16>
    %c0_50 = arith.constant 0 : index
    %c0_51 = arith.constant 0 : index
    %41 = vector.load %arg5[%c0_50, %c0_51] : memref<256x64xf32, #tpu.memory_space<vmem>>, vector<256x64xf32>
    %c4 = arith.constant 4 : index
    %c0_52 = arith.constant 0 : index
    %c0_53 = arith.constant 0 : index
    %42 = vector.load %arg2[%c4, %c0_52, %c0_53] : memref<9x3x64xbf16, #tpu.memory_space<vmem>>, vector<1x3x64xbf16>
    %43 = vector.shape_cast %42 : vector<1x3x64xbf16> to vector<3x64xbf16>
    %cst_54 = arith.constant dense<0.000000e+00> : vector<256x64xf32>
    %44 = tpu.matmul %40, %43, %cst_54 {dimension_numbers = #tpu.dot_dimension_numbers<[1], [0], [0], [1], [0, 0, 1, 1], [], []>} : vector<256x3xbf16>, vector<3x64xbf16>, vector<256x64xf32> -> vector<256x64xf32>
    %45 = arith.addf %41, %44 : vector<256x64xf32>
    %c0_55 = arith.constant 0 : index
    %c0_56 = arith.constant 0 : index
    %46 = vector.load %arg5[%c0_55, %c0_56] : memref<256x64xf32, #tpu.memory_space<vmem>>, vector<256x64xf32>
    tpu.vector_store %arg5[%c0_55, %c0_56], %45 {strides = array<i32>} : memref<256x64xf32, #tpu.memory_space<vmem>>, vector<256x64xf32>,
    %c0_57 = arith.constant 0 : index
    %c1_58 = arith.constant 1 : index
    %c2_59 = arith.constant 2 : index
    %c0_60 = arith.constant 0 : index
    %47 = vector.load %arg1[%c0_57, %c1_58, %c2_59, %c0_60] : memref<1x18x18x3xbf16, #tpu.memory_space<vmem>>, vector<1x16x16x3xbf16>
    %48 = vector.shape_cast %47 : vector<1x16x16x3xbf16> to vector<16x16x3xbf16>
    %49 = vector.shape_cast %48 : vector<16x16x3xbf16> to vector<256x3xbf16>
    %c0_61 = arith.constant 0 : index
    %c0_62 = arith.constant 0 : index
    %50 = vector.load %arg5[%c0_61, %c0_62] : memref<256x64xf32, #tpu.memory_space<vmem>>, vector<256x64xf32>
    %c5 = arith.constant 5 : index
    %c0_63 = arith.constant 0 : index
    %c0_64 = arith.constant 0 : index
    %51 = vector.load %arg2[%c5, %c0_63, %c0_64] : memref<9x3x64xbf16, #tpu.memory_space<vmem>>, vector<1x3x64xbf16>
    %52 = vector.shape_cast %51 : vector<1x3x64xbf16> to vector<3x64xbf16>
    %cst_65 = arith.constant dense<0.000000e+00> : vector<256x64xf32>
    %53 = tpu.matmul %49, %52, %cst_65 {dimension_numbers = #tpu.dot_dimension_numbers<[1], [0], [0], [1], [0, 0, 1, 1], [], []>} : vector<256x3xbf16>, vector<3x64xbf16>, vector<256x64xf32> -> vector<256x64xf32>
    %54 = arith.addf %50, %53 : vector<256x64xf32>
    %c0_66 = arith.constant 0 : index
    %c0_67 = arith.constant 0 : index
    %55 = vector.load %arg5[%c0_66, %c0_67] : memref<256x64xf32, #tpu.memory_space<vmem>>, vector<256x64xf32>
    tpu.vector_store %arg5[%c0_66, %c0_67], %54 {strides = array<i32>} : memref<256x64xf32, #tpu.memory_space<vmem>>, vector<256x64xf32>,
    %c0_68 = arith.constant 0 : index
    %c2_69 = arith.constant 2 : index
    %c0_70 = arith.constant 0 : index
    %c0_71 = arith.constant 0 : index
    %56 = vector.load %arg1[%c0_68, %c2_69, %c0_70, %c0_71] : memref<1x18x18x3xbf16, #tpu.memory_space<vmem>>, vector<1x16x16x3xbf16>
    %57 = vector.shape_cast %56 : vector<1x16x16x3xbf16> to vector<16x16x3xbf16>
    %58 = vector.shape_cast %57 : vector<16x16x3xbf16> to vector<256x3xbf16>
    %c0_72 = arith.constant 0 : index
    %c0_73 = arith.constant 0 : index
    %59 = vector.load %arg5[%c0_72, %c0_73] : memref<256x64xf32, #tpu.memory_space<vmem>>, vector<256x64xf32>
    %c6 = arith.constant 6 : index
    %c0_74 = arith.constant 0 : index
    %c0_75 = arith.constant 0 : index
    %60 = vector.load %arg2[%c6, %c0_74, %c0_75] : memref<9x3x64xbf16, #tpu.memory_space<vmem>>, vector<1x3x64xbf16>
    %61 = vector.shape_cast %60 : vector<1x3x64xbf16> to vector<3x64xbf16>
    %cst_76 = arith.constant dense<0.000000e+00> : vector<256x64xf32>
    %62 = tpu.matmul %58, %61, %cst_76 {dimension_numbers = #tpu.dot_dimension_numbers<[1], [0], [0], [1], [0, 0, 1, 1], [], []>} : vector<256x3xbf16>, vector<3x64xbf16>, vector<256x64xf32> -> vector<256x64xf32>
    %63 = arith.addf %59, %62 : vector<256x64xf32>
    %c0_77 = arith.constant 0 : index
    %c0_78 = arith.constant 0 : index
    %64 = vector.load %arg5[%c0_77, %c0_78] : memref<256x64xf32, #tpu.memory_space<vmem>>, vector<256x64xf32>
    tpu.vector_store %arg5[%c0_77, %c0_78], %63 {strides = array<i32>} : memref<256x64xf32, #tpu.memory_space<vmem>>, vector<256x64xf32>,
    %c0_79 = arith.constant 0 : index
    %c2_80 = arith.constant 2 : index
    %c1_81 = arith.constant 1 : index
    %c0_82 = arith.constant 0 : index
    %65 = vector.load %arg1[%c0_79, %c2_80, %c1_81, %c0_82] : memref<1x18x18x3xbf16, #tpu.memory_space<vmem>>, vector<1x16x16x3xbf16>
    %66 = vector.shape_cast %65 : vector<1x16x16x3xbf16> to vector<16x16x3xbf16>
    %67 = vector.shape_cast %66 : vector<16x16x3xbf16> to vector<256x3xbf16>
    %c0_83 = arith.constant 0 : index
    %c0_84 = arith.constant 0 : index
    %68 = vector.load %arg5[%c0_83, %c0_84] : memref<256x64xf32, #tpu.memory_space<vmem>>, vector<256x64xf32>
    %c7 = arith.constant 7 : index
    %c0_85 = arith.constant 0 : index
    %c0_86 = arith.constant 0 : index
    %69 = vector.load %arg2[%c7, %c0_85, %c0_86] : memref<9x3x64xbf16, #tpu.memory_space<vmem>>, vector<1x3x64xbf16>
    %70 = vector.shape_cast %69 : vector<1x3x64xbf16> to vector<3x64xbf16>
    %cst_87 = arith.constant dense<0.000000e+00> : vector<256x64xf32>
    %71 = tpu.matmul %67, %70, %cst_87 {dimension_numbers = #tpu.dot_dimension_numbers<[1], [0], [0], [1], [0, 0, 1, 1], [], []>} : vector<256x3xbf16>, vector<3x64xbf16>, vector<256x64xf32> -> vector<256x64xf32>
    %72 = arith.addf %68, %71 : vector<256x64xf32>
    %c0_88 = arith.constant 0 : index
    %c0_89 = arith.constant 0 : index
    %73 = vector.load %arg5[%c0_88, %c0_89] : memref<256x64xf32, #tpu.memory_space<vmem>>, vector<256x64xf32>
    tpu.vector_store %arg5[%c0_88, %c0_89], %72 {strides = array<i32>} : memref<256x64xf32, #tpu.memory_space<vmem>>, vector<256x64xf32>,
    %c0_90 = arith.constant 0 : index
    %c2_91 = arith.constant 2 : index
    %c2_92 = arith.constant 2 : index
    %c0_93 = arith.constant 0 : index
    %74 = vector.load %arg1[%c0_90, %c2_91, %c2_92, %c0_93] : memref<1x18x18x3xbf16, #tpu.memory_space<vmem>>, vector<1x16x16x3xbf16>
    %75 = vector.shape_cast %74 : vector<1x16x16x3xbf16> to vector<16x16x3xbf16>
    %76 = vector.shape_cast %75 : vector<16x16x3xbf16> to vector<256x3xbf16>
    %c0_94 = arith.constant 0 : index
    %c0_95 = arith.constant 0 : index
    %77 = vector.load %arg5[%c0_94, %c0_95] : memref<256x64xf32, #tpu.memory_space<vmem>>, vector<256x64xf32>
    %c8 = arith.constant 8 : index
    %c0_96 = arith.constant 0 : index
    %c0_97 = arith.constant 0 : index
    %78 = vector.load %arg2[%c8, %c0_96, %c0_97] : memref<9x3x64xbf16, #tpu.memory_space<vmem>>, vector<1x3x64xbf16>
    %79 = vector.shape_cast %78 : vector<1x3x64xbf16> to vector<3x64xbf16>
    %cst_98 = arith.constant dense<0.000000e+00> : vector<256x64xf32>
    %80 = tpu.matmul %76, %79, %cst_98 {dimension_numbers = #tpu.dot_dimension_numbers<[1], [0], [0], [1], [0, 0, 1, 1], [], []>} : vector<256x3xbf16>, vector<3x64xbf16>, vector<256x64xf32> -> vector<256x64xf32>
    %81 = arith.addf %77, %80 : vector<256x64xf32>
    %c0_99 = arith.constant 0 : index
    %c0_100 = arith.constant 0 : index
    %82 = vector.load %arg5[%c0_99, %c0_100] : memref<256x64xf32, #tpu.memory_space<vmem>>, vector<256x64xf32>
    tpu.vector_store %arg5[%c0_99, %c0_100], %81 {strides = array<i32>} : memref<256x64xf32, #tpu.memory_space<vmem>>, vector<256x64xf32>,
    %c0_101 = arith.constant 0 : index
    %c0_102 = arith.constant 0 : index
    %83 = vector.load %arg5[%c0_101, %c0_102] : memref<256x64xf32, #tpu.memory_space<vmem>>, vector<256x64xf32>
    %c0_103 = arith.constant 0 : index
    %c0_104 = arith.constant 0 : index
    %84 = vector.load %arg3[%c0_103, %c0_104] : memref<1x64xf32, #tpu.memory_space<vmem>>, vector<1x64xf32>
    %85 = vector.broadcast %84 : vector<1x64xf32> to vector<256x64xf32>
    %86 = arith.addf %83, %85 : vector<256x64xf32>
    %cst_105 = arith.constant 0.000000e+00 : f32
    %87 = vector.broadcast %cst_105 : f32 to vector<256x64xf32>
    %88 = arith.maximumf %86, %87 : vector<256x64xf32>
    %89 = arith.truncf %88 : vector<256x64xf32> to vector<256x64xbf16>
    %c0_106 = arith.constant 0 : index
    %c0_107 = arith.constant 0 : index
    %c0_108 = arith.constant 0 : index
    %90 = vector.load %arg4[%c0_106, %c0_107, %c0_108] : memref<1x256x64xbf16, #tpu.memory_space<vmem>>, vector<1x256x64xbf16>
    %91 = vector.shape_cast %90 : vector<1x256x64xbf16> to vector<256x64xbf16>
    %92 = vector.shape_cast %89 : vector<256x64xbf16> to vector<1x256x64xbf16>
    tpu.vector_store %arg4[%c0_106, %c0_107, %c0_108], %92 {strides = array<i32>} : memref<1x256x64xbf16, #tpu.memory_space<vmem>>, vector<1x256x64xbf16>,
    return
  }
  func.func @transform_0(%arg0: i32) -> (i32, i32, i32, i32) {
    %c0_i32 = arith.constant 0 : i32
    %c0_i32_0 = arith.constant 0 : i32
    %c0_i32_1 = arith.constant 0 : i32
    %c0_i32_2 = arith.constant 0 : i32
    return %arg0, %c0_i32, %c0_i32_0, %c0_i32_1 : i32, i32, i32, i32
  }
  func.func @transform_1(%arg0: i32) -> (i32, i32, i32) {
    %c0_i32 = arith.constant 0 : i32
    %c0_i32_0 = arith.constant 0 : i32
    %c0_i32_1 = arith.constant 0 : i32
    %c0_i32_2 = arith.constant 0 : i32
    return %c0_i32, %c0_i32_0, %c0_i32_1 : i32, i32, i32
  }
  func.func @transform_2(%arg0: i32) -> (i32, i32) {
    %c0_i32 = arith.constant 0 : i32
    %c0_i32_0 = arith.constant 0 : i32
    %c0_i32_1 = arith.constant 0 : i32
    return %c0_i32, %c0_i32_0 : i32, i32
  }
  func.func @transform_3(%arg0: i32) -> (i32, i32, i32) {
    %c0_i32 = arith.constant 0 : i32
    %c0_i32_0 = arith.constant 0 : i32
    %c0_i32_1 = arith.constant 0 : i32
    return %arg0, %c0_i32, %c0_i32_0 : i32, i32, i32
  }
}

</mosaic_0001>

<bundles_post_ra>
// kernel: tpu_custom_call.1
= control target key start
LH: loop header
LB: loop body
LE: loop exit
PB: predicated region body
PF: predicated region fallthrough
CT: control target
= control target key end

     0   :  { %s7096_s12 = smov 0   ;;  %s8840_s0 = inlined_call_operand.vmem [shape: bf16[4,18,18,3], index: 0, kind: input, shape index: {}]   ;;  %s8841_s1 = inlined_call_operand.vmem [shape: bf16[9,3,64], index: 1, kind: input, shape index: {}]   ;;  %s8842_s2 = inlined_call_operand.vmem [shape: f32[1,64], index: 2, kind: input, shape index: {}]   ;;  %s8843_s3 = inlined_call_operand.vmem [shape: bf16[4,256,64], index: 3, kind: output, shape index: {}]  }
   0x1 LB: > { %s5870_s13 = sadd.s32 4294967295, %s7072_s12   ;;  %p5874_p0 = scmp.ge.s32.totalorder %s7072_s12, 1  ;;  %s7072_s12 = sphi %s7096_s12, %s13_s12  }
   0x2   : > { %p137_p1 = scmp.lt.s32.totalorder %s7072_s12, 5 }
   0x4   : > { %p138_p2 = pnand %p5874_p0, %p137_p1 }
   0x5   : > { %v269_v0 = vld [vmem:[%s8841_s1] sm:$0x3] (!%p138_p2)  ;;  %vm399_vm0 = vcmask (!%p138_p2), 1040384   ;;  %vm400_vm1 = vcmask (!%p138_p2), 1041408   ;;  %p161_p3 = scmp.lt.s32.totalorder (!%p138_p2), %s5870_s13, 3  ;;  %v7074_v1 = vmov (!%p138_p2), 65535  }
   0x6   : > { %141 = sbr.rel (%p138_p2) target bundleno = 587 (0x24b), region = 32  ;;  %v401_v2 = vsel (!%p138_p2), %vm399_vm0, 4294967295, %v7074_v1  ;;  %v5910_v3 = vld [vmem:[%s8841_s1 + $0x2] sm:$0x3] (!%p138_p2)  ;;  %v5959_v4 = vld [vmem:[%s8841_s1 + $0x4] sm:$0x3] (!%p138_p2) }
   0x7   : > { %v7113_v5 = vsel (!%p138_p2), %vm400_vm1, %v401_v2, 0  ;;  %v6024_v9 = vld [vmem:[%s8841_s1 + $0x6] sm:$0x3] (!%p138_p2)  ;;  %vm350_vm2 = vcmask (!%p138_p2), 23552   ;;  %v6105_v10 = vld [vmem:[%s8841_s1 + $0x8] sm:$0x3] (!%p138_p2) }
   0x8   : > { %v404_v6 = vand.u32 (!%p138_p2), %v7113_v5, %v269_v0  ;;  %v1197_v7 = vand.u32 (!%p138_p2), %v5910_v3, %v7113_v5  ;;  %v1766_v8 = vand.u32 (!%p138_p2), %v5959_v4, %v7113_v5  ;;  %v7135_v13 = vand.u32 (!%p138_p2), %v6024_v9, %v7113_v5  ;;  %v6202_v23 = vld [vmem:[%s8841_s1 + $0xa] sm:$0x3] (!%p138_p2) }
   0x9   : > { %v7142_v16 = vand.u32 (!%p138_p2), %v6105_v10, %v7113_v5  ;;  %vm679_vm3 = vsmask.f32 (!%p138_p2), 3328  ;;  %vm680_vm4 = vsmask.f32 (!%p138_p2), 7440  ;;  %vm1520_vm5 = vcmask (!%p138_p2), 1042432  }
   0xa   : > { %7005 = vmatprep.subr.bf16.mxu1 (!%p138_p2), %v404_v6  ;;  %6699 = vmatprep.subr.bf16.mxu0 (!%p138_p2), %v404_v6  ;;  %vm1521_vm6 = vcmask (!%p138_p2), 1046532   ;;  %v7174_v40 = vand.u32 (!%p138_p2), %v6202_v23, %v7113_v5  ;;  %vm7191_vm8 = vmor (!%p138_p2), %vm679_vm3, %vm680_vm4  ;;  %vm172_vm9 = vcmask (!%p138_p2), 523264   ;;  %vm5782_vm10 = vcmask (!%p138_p2), 519168  }
   0xb   : > { %7006 = vmatpush3.bf16.msra.mxu1 (!%p138_p2), %v404_v6  ;;  %6700 = vmatpush3.bf16.msra.mxu0 (!%p138_p2), %v404_v6  ;;  %vm7184_vm7 = vmor (!%p138_p2), %vm1520_vm5, %vm1521_vm6 }
   0xc   : > { %6733 = vmatprep.subr.bf16.mxu1 (!%p138_p2), %v1197_v7  ;;  %6767 = vmatprep.subr.bf16.mxu0 (!%p138_p2), %v1766_v8 }
   0xd   : > { %s8849_s13 = smov (!%p161_p3, %s5870_s13), 3 }
   0xe   : > { %s7007_s20 = smul.u32 216, %s8849_s13  ;;  %s6513_s11 = sshll.u32 %s8849_s13, 7 }
   0xf   : > { %s8697_s15 = scalar_lea.vmem %s8843_s3, %s6513_s11 }
  0x10   : > { %s7127_s25 = scalar_lea.vmem %s8840_s0, %s7007_s20 }
  0x11   : > { %v7018_v11 = vld [vmem:[%s7127_s25 + $0x60] sm:$0xff]   ;;  %v7019_v12 = vld [vmem:[%s7127_s25 + $0x6c] sm:$0xff]   ;;  %v7022_v17 = vld [vmem:[%s7127_s25 + $0x78] sm:$0xff]  }
  0x12   : > { %6717 = vmatprep.mubr.msk.bf16.mxu1 %vm350_vm2, %v7018_v11  ;;  %v7020_v14 = vld [vmem:[%s7127_s25] sm:$0xff]   ;;  %v7021_v15 = vld [vmem:[%s7127_s25 + $0xc] sm:$0xff]   ;;  %v7024_v18 = vld [vmem:[%s7127_s25 + $0x18] sm:$0xff]  }
  0x13   : > { %6718 = vmatmul.mubr.msk.bf16.vlgmr.msra.gmra.mrb[0].mxu1 %vm350_vm2, %v7019_v12  ;;  %6701 = vmatprep.mubr.msk.bf16.mxu0 %vm350_vm2, %v7020_v14  ;;  %v7023_v19 = vld [vmem:[%s7127_s25 + $0x84] sm:$0xff]   ;;  %v7026_v20 = vld [vmem:[%s7127_s25 + $0x90] sm:$0xff]   ;;  %v7027_v24 = vld [vmem:[%s7127_s25 + $0x9c] sm:$0xff]  }
  0x14   : > { %6734 = vmatpush3.bf16.msra.mxu1 %v1197_v7  ;;  %6702 = vmatmul.mubr.msk.bf16.vlgmr.msra.gmra.mrb[0].mxu0 %vm350_vm2, %v7021_v15  ;;  %v7025_v21 = vld [vmem:[%s7127_s25 + $0x24] sm:$0xff]   ;;  %v7028_v22 = vld [vmem:[%s7127_s25 + $0x30] sm:$0xff]   ;;  %v7029_v25 = vld [vmem:[%s7127_s25 + $0x3c] sm:$0xff]  }
  0x15   : > { %6801 = vmatprep.subr.bf16.mxu1 %v7135_v13  ;;  %6721 = vmatprep.mubr.msk.bf16.mxu1 %vm350_vm2, %v7022_v17  ;;  %v7030_v26 = vld [vmem:[%s7127_s25 + $0xa8] sm:$0xff]   ;;  %v631_v28 = vld [vmem:[%s7127_s25] sm:$0xf]  ;;  %v632_v29 = vld [vmem:[%s7127_s25 + $0x4] sm:$0xf] }
  0x16   : > { %6768 = vmatpush3.bf16.msra.mxu0 %v1766_v8  ;;  %6705 = vmatprep.mubr.msk.bf16.mxu0 %vm350_vm2, %v7024_v18  ;;  %v7032_v27 = vld [vmem:[%s7127_s25 + $0x48] sm:$0xff]   ;;  %v683_v31 = vshrl.u32 %v631_v28, 16  ;;  %v686_v32 = vshll.u32 %v631_v28, 16  ;;  %v692_v33 = vshll.u32 %v632_v29, 16  ;;  %v696_v34 = vshrl.u32 %v632_v29, 16  ;;  %v7031_v63 = vld [vmem:[%s7127_s25 + $0xb4] sm:$0xff]  }
  0x17   : > { %6835 = vmatprep.subr.bf16.mxu0 %v7142_v16  ;;  %v633_v30 = vld [vmem:[%s7127_s25 + $0x8] sm:$0x1]  ;;  %v634_v35 = vld [vmem:[%s7127_s25 + $0xc] sm:$0xf]  ;;  %v635_v37 = vld [vmem:[%s7127_s25 + $0x10] sm:$0xf] }
  0x18   : > { %v702_v36 = vshll.u32 %v633_v30, 16  ;;  %v636_v38 = vld [vmem:[%s7127_s25 + $0x14] sm:$0x1]  ;;  %v707_v39 = vshrl.u32 %v634_v35, 16  ;;  %v685_v41 = vrot.slane %v683_v31, 4  ;;  %v688_v42 = vrot.slane %v686_v32, 5 }
  0x19   : > { %v694_v43 = vrot.slane %v692_v33, 5  ;;  %v698_v44 = vrot.slane %v696_v34, 4  ;;  %v1424_v45 = vld [vmem:[%s7127_s25] sm:$0xe]  ;;  %v710_v48 = vshll.u32 %v634_v35, 16  ;;  %v716_v49 = vshll.u32 %v635_v37, 16 }
  0x1a   : > { %v704_v46 = vrot.slane %v702_v36, 5  ;;  %v709_v47 = vrot.slane %v707_v39, 4  ;;  %v1425_v50 = vld [vmem:[%s7127_s25 + $0x4] sm:$0xf]  ;;  %v689_v51 = vor.u32 %v688_v42, %v685_v41  ;;  %v720_v53 = vshrl.u32 %v635_v37, 16  ;;  %v7033_v10 = vld [vmem:[%s7127_s25 + $0x54] sm:$0xff]  }
  0x1b   : > { %6722 = vmatmul.mubr.msk.bf16.gmra.mrb[4].mxu1 %vm350_vm2, %v7023_v19  ;;  %v699_v52 = vor.u32 %v698_v44, %v694_v43  ;;  %v726_v54 = vshll.u32 %v636_v38, 16  ;;  %v1426_v55 = vld [vmem:[%s7127_s25 + $0x8] sm:$0x1]  ;;  %v712_v58 = vrot.slane %v710_v48, 5  ;;  %v718_v59 = vrot.slane %v716_v49, 5 }
  0x1c   : > { %6725 = vmatprep.mubr.msk.bf16.mxu1 %vm350_vm2, %v7026_v20  ;;  %6706 = vmatmul.mubr.msk.bf16.gmra.mrb[4].mxu0 %vm350_vm2, %v7025_v21  ;;  %v5943_v60 = vrot.slane %v1424_v45, 9  ;;  %v1525_v61 = vrot.slane %v1425_v50, 5  ;;  %v637_v62 = vld [vmem:[%s7127_s25 + $0x18] sm:$0xf]  ;;  %v690_v0 = vrot.slane %v689_v51, 4  ;;  %v722_v2 = vrot.slane %v720_v53, 4 }
  0x1d   : > { %6709 = vmatprep.mubr.msk.bf16.mxu0 %vm350_vm2, %v7028_v22  ;;  %v700_v1 = vrot.slane %v699_v52, 4  ;;  %v728_v3 = vrot.slane %v726_v54, 5  ;;  %v713_v4 = vor.u32 %v712_v58, %v709_v47  ;;  %v1528_v8 = vrot.slane %v1426_v55, 5  ;;  %v638_v9 = vld [vmem:[%s7127_s25 + $0x1c] sm:$0xf] }
  0x1e   : > { %v1526_v6 = vsel %vm7184_vm7, %v5943_v60, %v1525_v61  ;;  %v1527_v7 = vrot.slane %v1525_v61, 4  ;;  %v695_v11 = vsel %vm7191_vm8, %v690_v0, %v694_v43  ;;  %v723_v14 = vor.u32 %v722_v2, %v718_v59  ;;  %v639_v15 = vld [vmem:[%s7127_s25 + $0x20] sm:$0x1]  ;;  %v1427_v22 = vld [vmem:[%s7127_s25 + $0xc] sm:$0xe] }
  0x1f   : > { %v705_v12 = vsel %vm7191_vm8, %v700_v1, %v704_v46  ;;  %v731_v17 = vshrl.u32 %v637_v62, 16  ;;  %v714_v19 = vrot.slane %v713_v4, 4  ;;  %v734_v21 = vshll.u32 %v637_v62, 16  ;;  %v1428_v23 = vld [vmem:[%s7127_s25 + $0x10] sm:$0xf] }
  0x20   : > { %v5911_v18 = vcombine.low %v695_v11, %v705_v12  ;;  %v1529_v20 = vsel %vm7184_vm7, %v1527_v7, %v1528_v8  ;;  %v1429_v28 = vld [vmem:[%s7127_s25 + $0x14] sm:$0x1]  ;;  %v744_v31 = vshrl.u32 %v638_v9, 16  ;;  %v750_v32 = vshll.u32 %v639_v15, 16  ;;  %v640_v33 = vld [vmem:[%s7127_s25 + $0x24] sm:$0xf] }
  0x21   : > { %v719_v29 = vsel %vm7191_vm8, %v714_v19, %v718_v59  ;;  %v736_v30 = vrot.slane %v734_v21, 5  ;;  %v5944_v36 = vrot.slane %v1427_v22, 9  ;;  %v1532_v37 = vrot.slane %v1428_v23, 5  ;;  %v641_v38 = vld [vmem:[%s7127_s25 + $0x28] sm:$0xf] }
  0x22   : > { %v746_v42 = vrot.slane %v744_v31, 4  ;;  %v752_v43 = vrot.slane %v750_v32, 5  ;;  %v642_v44 = vld [vmem:[%s7127_s25 + $0x2c] sm:$0x1]  ;;  %v1535_v47 = vrot.slane %v1429_v28, 5  ;;  %v755_v48 = vshrl.u32 %v640_v33, 16 }
  0x23   : > { %6726 = vmatmul.mubr.msk.bf16.gmra.mrb[8].mxu1 %vm350_vm2, %v7027_v24  ;;  %v724_v24 = vrot.slane %v723_v14, 4  ;;  %v1533_v45 = vsel %vm7184_vm7, %v5944_v36, %v1532_v37  ;;  %v1534_v46 = vrot.slane %v1532_v37, 4  ;;  %v1430_v49 = vld [vmem:[%s7127_s25 + $0x18] sm:$0xe]  ;;  %v758_v52 = vshll.u32 %v640_v33, 16 }
  0x24   : > { %6729 = vmatprep.mubr.msk.bf16.mxu1 %vm350_vm2, %v7030_v26  ;;  %6710 = vmatmul.mubr.msk.bf16.gmra.mrb[8].mxu0 %vm350_vm2, %v7029_v25  ;;  %v5960_v25 = vcombine.low %v1526_v6, %v1529_v20  ;;  %v733_v26 = vrot.slane %v731_v17, 4  ;;  %v764_v53 = vshll.u32 %v641_v38, 16  ;;  %v1431_v54 = vld [vmem:[%s7127_s25 + $0x1c] sm:$0xf]  ;;  %v757_v58 = vrot.slane %v755_v48, 4 }
  0x25   : > { %6713 = vmatprep.mubr.msk.bf16.mxu0 %vm350_vm2, %v7032_v27  ;;  %v740_v27 = vshll.u32 %v638_v9, 16  ;;  %v729_v34 = vsel %vm7191_vm8, %v724_v24, %v728_v3  ;;  %v1536_v55 = vsel %vm7184_vm7, %v1534_v46, %v1535_v47  ;;  %v768_v59 = vshrl.u32 %v641_v38, 16  ;;  %v1432_v61 = vld [vmem:[%s7127_s25 + $0x20] sm:$0x1]  ;;  %v643_v2 = vld [vmem:[%s7127_s25 + $0x30] sm:$0xf] }
  0x26   : > { %v5912_v39 = vcombine.low %v719_v29, %v729_v34  ;;  %v737_v41 = vor.u32 %v736_v30, %v733_v26  ;;  %v774_v60 = vshll.u32 %v642_v44, 16  ;;  %v5961_v0 = vcombine.low %v1533_v45, %v1536_v55  ;;  %v644_v8 = vld [vmem:[%s7127_s25 + $0x34] sm:$0xf]  ;;  %v645_v17 = vld [vmem:[%s7127_s25 + $0x38] sm:$0x1] }
  0x27   : > { %v742_v35 = vrot.slane %v740_v27, 5  ;;  %v760_v1 = vrot.slane %v758_v52, 5  ;;  %v766_v3 = vrot.slane %v764_v53, 5  ;;  %v770_v4 = vrot.slane %v768_v59, 4  ;;  %v1433_v23 = vld [vmem:[%s7127_s25 + $0x24] sm:$0xe] }
  0x28   : > { %v738_v50 = vrot.slane %v737_v41, 4  ;;  %v776_v6 = vrot.slane %v774_v60, 5  ;;  %v5945_v7 = vrot.slane %v1430_v49, 9  ;;  %v1539_v11 = vrot.slane %v1431_v54, 5  ;;  %v1434_v28 = vld [vmem:[%s7127_s25 + $0x28] sm:$0xf] }
  0x29   : > { %v747_v51 = vor.u32 %v746_v42, %v742_v35  ;;  %v1542_v12 = vrot.slane %v1432_v61, 5  ;;  %v771_v15 = vor.u32 %v770_v4, %v766_v3  ;;  %v782_v19 = vshll.u32 %v643_v2, 16  ;;  %v1435_v32 = vld [vmem:[%s7127_s25 + $0x2c] sm:$0x1]  ;;  %v646_v33 = vld [vmem:[%s7127_s25 + $0x3c] sm:$0xf] }
  0x2a   : > { %v743_v62 = vsel %vm7191_vm8, %v738_v50, %v742_v35  ;;  %v1541_v21 = vrot.slane %v1539_v11, 4  ;;  %v788_v22 = vshll.u32 %v644_v8, 16  ;;  %v792_v27 = vshrl.u32 %v644_v8, 16  ;;  %v647_v38 = vld [vmem:[%s7127_s25 + $0x40] sm:$0xf] }
  0x2b   : > { %6730 = vmatmul.mubr.msk.bf16.gmra.mrb[12].mxu1 %vm350_vm2, %v7031_v63  ;;  %v748_v63 = vrot.slane %v747_v51, 4  ;;  %v772_v24 = vrot.slane %v771_v15, 4  ;;  %v784_v26 = vrot.slane %v782_v19, 5  ;;  %v798_v31 = vshll.u32 %v645_v17, 16  ;;  %v648_v44 = vld [vmem:[%s7127_s25 + $0x44] sm:$0x1] }
  0x2c   : > { %6735 = vmatprep.mubr.msk.bf16.mxu1 %vm350_vm2, %v5911_v18  ;;  %6714 = vmatmul.mubr.msk.bf16.gmra.mrb[12].mxu0 %vm350_vm2, %v7033_v10  ;;  %v761_v10 = vor.u32 %v760_v1, %v757_v58  ;;  %v779_v18 = vshrl.u32 %v643_v2, 16  ;;  %v790_v30 = vrot.slane %v788_v22, 5  ;;  %v794_v37 = vrot.slane %v792_v27, 4  ;;  %v1436_v49 = vld [vmem:[%s7127_s25 + $0x30] sm:$0xe] }
  0x2d   : > { %6769 = vmatprep.mubr.msk.bf16.mxu0 %vm350_vm2, %v5960_v25  ;;  %v753_v9 = vsel %vm7191_vm8, %v748_v63, %v752_v43  ;;  %v777_v34 = vsel %vm7191_vm8, %v772_v24, %v776_v6  ;;  %v800_v41 = vrot.slane %v798_v31, 5  ;;  %v5946_v42 = vrot.slane %v1433_v23, 9  ;;  %v1437_v54 = vld [vmem:[%s7127_s25 + $0x34] sm:$0xf]  ;;  %v1438_v61 = vld [vmem:[%s7127_s25 + $0x38] sm:$0x1] }
  0x2e   : > { %v5913_v14 = vcombine.low %v743_v62, %v753_v9  ;;  %v762_v20 = vrot.slane %v761_v10, 4  ;;  %v781_v25 = vrot.slane %v779_v18, 4  ;;  %v1546_v43 = vrot.slane %v1434_v28, 5  ;;  %v649_v2 = vld [vmem:[%s7127_s25 + $0x48] sm:$0xf] }
  0x2f   : > { %v795_v46 = vor.u32 %v794_v37, %v790_v30  ;;  %v1549_v47 = vrot.slane %v1435_v32, 5  ;;  %v803_v48 = vshrl.u32 %v646_v33, 16  ;;  %v806_v52 = vshll.u32 %v646_v33, 16  ;;  %v650_v8 = vld [vmem:[%s7127_s25 + $0x4c] sm:$0xf] }
  0x30   : > { %v767_v29 = vsel %vm7191_vm8, %v762_v20, %v766_v3  ;;  %v785_v36 = vor.u32 %v784_v26, %v781_v25  ;;  %v1547_v50 = vsel %vm7184_vm7, %v5946_v42, %v1546_v43  ;;  %v1548_v51 = vrot.slane %v1546_v43, 4  ;;  %v651_v17 = vld [vmem:[%s7127_s25 + $0x50] sm:$0x1]  ;;  %v1439_v23 = vld [vmem:[%s7127_s25 + $0x3c] sm:$0xe] }
  0x31   : > { %v812_v53 = vshll.u32 %v647_v38, 16  ;;  %v796_v58 = vrot.slane %v795_v46, 4  ;;  %v805_v59 = vrot.slane %v803_v48, 4  ;;  %v816_v60 = vshrl.u32 %v647_v38, 16  ;;  %v1440_v28 = vld [vmem:[%s7127_s25 + $0x40] sm:$0xf] }
  0x32   : > { %v786_v45 = vrot.slane %v785_v36, 4  ;;  %v1550_v62 = vsel %vm7184_vm7, %v1548_v51, %v1549_v47  ;;  %v808_v63 = vrot.slane %v806_v52, 5  ;;  %v822_v1 = vshll.u32 %v648_v44, 16  ;;  %v1441_v32 = vld [vmem:[%s7127_s25 + $0x44] sm:$0x1] }
  0x33   : > { %6736 = vmatmul.mubr.msk.bf16.vlgmr.msra.gmra.mrb[16].mxu1 %vm350_vm2, %v5912_v39  ;;  %v5914_v39 = vcombine.low %v767_v29, %v777_v34  ;;  %v801_v3 = vsel %vm7191_vm8, %v796_v58, %v800_v41  ;;  %v5963_v4 = vcombine.low %v1547_v50, %v1550_v62  ;;  %v818_v6 = vrot.slane %v816_v60, 4  ;;  %v652_v33 = vld [vmem:[%s7127_s25 + $0x54] sm:$0xf]  ;;  %v653_v38 = vld [vmem:[%s7127_s25 + $0x58] sm:$0xf] }
  0x34   : > { %6802 = vmatpush3.bf16.msra.mxu1 %v7135_v13  ;;  %6770 = vmatmul.mubr.msk.bf16.vlgmr.msra.gmra.mrb[16].mxu0 %vm350_vm2, %v5961_v0  ;;  %v1540_v13 = vsel %vm7184_vm7, %v5945_v7, %v1539_v11  ;;  %v791_v55 = vsel %vm7191_vm8, %v786_v45, %v790_v30  ;;  %v814_v0 = vrot.slane %v812_v53, 5  ;;  %v5947_v7 = vrot.slane %v1436_v49, 9  ;;  %v654_v44 = vld [vmem:[%s7127_s25 + $0x5c] sm:$0x1]  ;;  %v1442_v49 = vld [vmem:[%s7127_s25 + $0x48] sm:$0xe] }
  0x35   : > { %6869 = vmatprep.subr.bf16.mxu1 %v7174_v40  ;;  %6836 = vmatpush3.bf16.msra.mxu0 %v7142_v16  ;;  %v1543_v16 = vsel %vm7184_vm7, %v1541_v21, %v1542_v12  ;;  %v5915_v9 = vcombine.low %v791_v55, %v801_v3  ;;  %v809_v10 = vor.u32 %v808_v63, %v805_v59  ;;  %v824_v11 = vrot.slane %v822_v1, 5 }
  0x36   : > { %6739 = vmatprep.mubr.msk.bf16.mxu1 %vm350_vm2, %v5913_v14  ;;  %v5962_v35 = vcombine.low %v1540_v13, %v1543_v16  ;;  %v1553_v12 = vrot.slane %v1437_v54, 5  ;;  %v819_v14 = vor.u32 %v818_v6, %v814_v0  ;;  %v1556_v15 = vrot.slane %v1438_v61, 5  ;;  %v1443_v54 = vld [vmem:[%s7127_s25 + $0x4c] sm:$0xf]  ;;  %v1444_v61 = vld [vmem:[%s7127_s25 + $0x50] sm:$0x1] }
  0x37   : > { %v827_v18 = vshrl.u32 %v649_v2, 16  ;;  %v830_v19 = vshll.u32 %v649_v2, 16  ;;  %v810_v20 = vrot.slane %v809_v10, 4  ;;  %v836_v22 = vshll.u32 %v650_v8, 16  ;;  %v655_v2 = vld [vmem:[%s7127_s25 + $0x60] sm:$0xf] }
  0x38   : > { %6773 = vmatprep.mubr.msk.bf16.mxu0 %vm350_vm2, %v5962_v35  ;;  %v1554_v13 = vsel %vm7184_vm7, %v5947_v7, %v1553_v12  ;;  %v1555_v21 = vrot.slane %v1553_v12, 4  ;;  %v820_v24 = vrot.slane %v819_v14, 4  ;;  %v840_v27 = vshrl.u32 %v650_v8, 16  ;;  %v656_v8 = vld [vmem:[%s7127_s25 + $0x64] sm:$0xf] }
  0x39   : > { %v829_v25 = vrot.slane %v827_v18, 4  ;;  %v832_v26 = vrot.slane %v830_v19, 5  ;;  %v815_v29 = vsel %vm7191_vm8, %v810_v20, %v814_v0  ;;  %v838_v30 = vrot.slane %v836_v22, 5 }
  0x3a   : > { %v1557_v16 = vsel %vm7184_vm7, %v1555_v21, %v1556_v15  ;;  %v846_v31 = vshll.u32 %v651_v17, 16  ;;  %v825_v34 = vsel %vm7191_vm8, %v820_v24, %v824_v11  ;;  %v842_v37 = vrot.slane %v840_v27, 4  ;;  %v657_v17 = vld [vmem:[%s7127_s25 + $0x68] sm:$0x1] }
  0x3b   : > { %6740 = vmatmul.mubr.msk.bf16.gmra.mrb[20].mxu1 %vm350_vm2, %v5914_v39  ;;  %v5964_v35 = vcombine.low %v1554_v13, %v1557_v16  ;;  %v833_v36 = vor.u32 %v832_v26, %v829_v25  ;;  %v5916_v39 = vcombine.low %v815_v29, %v825_v34  ;;  %v5948_v42 = vrot.slane %v1439_v23, 9  ;;  %v1445_v23 = vld [vmem:[%s7127_s25 + $0x54] sm:$0xe] }
  0x3c   : > { %6774 = vmatmul.mubr.msk.bf16.gmra.mrb[20].mxu0 %vm350_vm2, %v5963_v4  ;;  %6743 = vmatprep.mubr.msk.bf16.mxu1 %vm350_vm2, %v5915_v9  ;;  %v848_v41 = vrot.slane %v846_v31, 5  ;;  %v1560_v43 = vrot.slane %v1440_v28, 5  ;;  %v843_v46 = vor.u32 %v842_v37, %v838_v30  ;;  %v1563_v47 = vrot.slane %v1441_v32, 5  ;;  %v1446_v28 = vld [vmem:[%s7127_s25 + $0x58] sm:$0xf] }
  0x3d   : > { %6777 = vmatprep.mubr.msk.bf16.mxu0 %vm350_vm2, %v5964_v35  ;;  %v834_v45 = vrot.slane %v833_v36, 4  ;;  %v851_v48 = vshrl.u32 %v652_v33, 16  ;;  %v854_v52 = vshll.u32 %v652_v33, 16  ;;  %v860_v53 = vshll.u32 %v653_v38, 16  ;;  %v1447_v32 = vld [vmem:[%s7127_s25 + $0x5c] sm:$0x1] }
  0x3e   : > { %v1561_v50 = vsel %vm7184_vm7, %v5948_v42, %v1560_v43  ;;  %v1562_v51 = vrot.slane %v1560_v43, 4  ;;  %v844_v58 = vrot.slane %v843_v46, 4  ;;  %v864_v60 = vshrl.u32 %v653_v38, 16  ;;  %v658_v33 = vld [vmem:[%s7127_s25 + $0x6c] sm:$0xf] }
  0x3f   : > { %v839_v55 = vsel %vm7191_vm8, %v834_v45, %v838_v30  ;;  %v853_v59 = vrot.slane %v851_v48, 4  ;;  %v856_v63 = vrot.slane %v854_v52, 5  ;;  %v862_v0 = vrot.slane %v860_v53, 5  ;;  %v659_v38 = vld [vmem:[%s7127_s25 + $0x70] sm:$0xf] }
  0x40   : > { %v1564_v62 = vsel %vm7184_vm7, %v1562_v51, %v1563_v47  ;;  %v870_v1 = vshll.u32 %v654_v44, 16  ;;  %v849_v3 = vsel %vm7191_vm8, %v844_v58, %v848_v41  ;;  %v866_v6 = vrot.slane %v864_v60, 4  ;;  %v660_v44 = vld [vmem:[%s7127_s25 + $0x74] sm:$0x1] }
  0x41   : > { %v5965_v4 = vcombine.low %v1561_v50, %v1564_v62  ;;  %v5949_v7 = vrot.slane %v1442_v49, 9  ;;  %v5917_v9 = vcombine.low %v839_v55, %v849_v3  ;;  %v857_v10 = vor.u32 %v856_v63, %v853_v59  ;;  %v1448_v49 = vld [vmem:[%s7127_s25 + $0x60] sm:$0xe] }
  0x42   : > { %v872_v11 = vrot.slane %v870_v1, 5  ;;  %v1567_v12 = vrot.slane %v1443_v54, 5  ;;  %v867_v14 = vor.u32 %v866_v6, %v862_v0  ;;  %v1570_v15 = vrot.slane %v1444_v61, 5  ;;  %v1449_v54 = vld [vmem:[%s7127_s25 + $0x64] sm:$0xf] }
  0x43   : > { %6744 = vmatmul.mubr.msk.bf16.gmra.mrb[24].mxu1 %vm350_vm2, %v5916_v39  ;;  %v875_v18 = vshrl.u32 %v655_v2, 16  ;;  %v878_v19 = vshll.u32 %v655_v2, 16  ;;  %v858_v20 = vrot.slane %v857_v10, 4  ;;  %v884_v22 = vshll.u32 %v656_v8, 16  ;;  %v1450_v61 = vld [vmem:[%s7127_s25 + $0x68] sm:$0x1] }
  0x44   : > { %6778 = vmatmul.mubr.msk.bf16.gmra.mrb[24].mxu0 %vm350_vm2, %v5965_v4  ;;  %6747 = vmatprep.mubr.msk.bf16.mxu1 %vm350_vm2, %v5917_v9  ;;  %v1568_v13 = vsel %vm7184_vm7, %v5949_v7, %v1567_v12  ;;  %v1569_v21 = vrot.slane %v1567_v12, 4  ;;  %v868_v24 = vrot.slane %v867_v14, 4  ;;  %v888_v27 = vshrl.u32 %v656_v8, 16  ;;  %v661_v2 = vld [vmem:[%s7127_s25 + $0x78] sm:$0xf] }
  0x45   : > { %v877_v25 = vrot.slane %v875_v18, 4  ;;  %v880_v26 = vrot.slane %v878_v19, 5  ;;  %v863_v29 = vsel %vm7191_vm8, %v858_v20, %v862_v0  ;;  %v886_v30 = vrot.slane %v884_v22, 5  ;;  %v662_v8 = vld [vmem:[%s7127_s25 + $0x7c] sm:$0xf] }
  0x46   : > { %v1571_v16 = vsel %vm7184_vm7, %v1569_v21, %v1570_v15  ;;  %v894_v31 = vshll.u32 %v657_v17, 16  ;;  %v873_v34 = vsel %vm7191_vm8, %v868_v24, %v872_v11  ;;  %v890_v37 = vrot.slane %v888_v27, 4  ;;  %v663_v17 = vld [vmem:[%s7127_s25 + $0x80] sm:$0x1] }
  0x47   : > { %v5966_v35 = vcombine.low %v1568_v13, %v1571_v16  ;;  %v881_v36 = vor.u32 %v880_v26, %v877_v25  ;;  %v5918_v39 = vcombine.low %v863_v29, %v873_v34  ;;  %v5950_v42 = vrot.slane %v1445_v23, 9  ;;  %v1451_v23 = vld [vmem:[%s7127_s25 + $0x6c] sm:$0xe] }
  0x48   : > { %v896_v41 = vrot.slane %v894_v31, 5  ;;  %v1574_v43 = vrot.slane %v1446_v28, 5  ;;  %v891_v46 = vor.u32 %v890_v37, %v886_v30  ;;  %v1577_v47 = vrot.slane %v1447_v32, 5  ;;  %v1452_v28 = vld [vmem:[%s7127_s25 + $0x70] sm:$0xf] }
  0x49   : > { %6781 = vmatprep.mubr.msk.bf16.mxu0 %vm350_vm2, %v5966_v35  ;;  %v882_v45 = vrot.slane %v881_v36, 4  ;;  %v899_v48 = vshrl.u32 %v658_v33, 16  ;;  %v902_v52 = vshll.u32 %v658_v33, 16  ;;  %v908_v53 = vshll.u32 %v659_v38, 16  ;;  %v1453_v32 = vld [vmem:[%s7127_s25 + $0x74] sm:$0x1] }
  0x4a   : > { %v1575_v50 = vsel %vm7184_vm7, %v5950_v42, %v1574_v43  ;;  %v1576_v51 = vrot.slane %v1574_v43, 4  ;;  %v892_v58 = vrot.slane %v891_v46, 4  ;;  %v912_v60 = vshrl.u32 %v659_v38, 16  ;;  %v664_v33 = vld [vmem:[%s7127_s25 + $0x84] sm:$0xf] }
  0x4b   : > { %6748 = vmatmul.mubr.msk.bf16.gmra.mrb[28].mxu1 %vm350_vm2, %v5918_v39  ;;  %v887_v55 = vsel %vm7191_vm8, %v882_v45, %v886_v30  ;;  %v901_v59 = vrot.slane %v899_v48, 4  ;;  %v904_v63 = vrot.slane %v902_v52, 5  ;;  %v910_v0 = vrot.slane %v908_v53, 5  ;;  %v665_v38 = vld [vmem:[%s7127_s25 + $0x88] sm:$0xf] }
  0x4c   : > { %v1578_v62 = vsel %vm7184_vm7, %v1576_v51, %v1577_v47  ;;  %v918_v1 = vshll.u32 %v660_v44, 16  ;;  %v897_v3 = vsel %vm7191_vm8, %v892_v58, %v896_v41  ;;  %v914_v6 = vrot.slane %v912_v60, 4  ;;  %v666_v44 = vld [vmem:[%s7127_s25 + $0x8c] sm:$0x1] }
  0x4d   : > { %v5967_v4 = vcombine.low %v1575_v50, %v1578_v62  ;;  %v5951_v7 = vrot.slane %v1448_v49, 9  ;;  %v5919_v9 = vcombine.low %v887_v55, %v897_v3  ;;  %v905_v10 = vor.u32 %v904_v63, %v901_v59  ;;  %v1454_v49 = vld [vmem:[%s7127_s25 + $0x78] sm:$0xe] }
  0x4e   : > { %v920_v11 = vrot.slane %v918_v1, 5  ;;  %v1581_v12 = vrot.slane %v1449_v54, 5  ;;  %v915_v14 = vor.u32 %v914_v6, %v910_v0  ;;  %v1584_v15 = vrot.slane %v1450_v61, 5  ;;  %v1455_v54 = vld [vmem:[%s7127_s25 + $0x7c] sm:$0xf] }
  0x4f   : > { %6782 = vmatmul.mubr.msk.bf16.gmra.mrb[28].mxu0 %vm350_vm2, %v5967_v4  ;;  %v923_v18 = vshrl.u32 %v661_v2, 16  ;;  %v926_v19 = vshll.u32 %v661_v2, 16  ;;  %6751 = vmatprep.mubr.msk.bf16.mxu1 %vm350_vm2, %v5919_v9  ;;  %v906_v20 = vrot.slane %v905_v10, 4  ;;  %v932_v22 = vshll.u32 %v662_v8, 16  ;;  %v1456_v61 = vld [vmem:[%s7127_s25 + $0x80] sm:$0x1] }
  0x50   : > { %v1582_v13 = vsel %vm7184_vm7, %v5951_v7, %v1581_v12  ;;  %v1583_v21 = vrot.slane %v1581_v12, 4  ;;  %v916_v24 = vrot.slane %v915_v14, 4  ;;  %v936_v27 = vshrl.u32 %v662_v8, 16  ;;  %v667_v2 = vld [vmem:[%s7127_s25 + $0x90] sm:$0xf] }
  0x51   : > { %v925_v25 = vrot.slane %v923_v18, 4  ;;  %v928_v26 = vrot.slane %v926_v19, 5  ;;  %v911_v29 = vsel %vm7191_vm8, %v906_v20, %v910_v0  ;;  %v934_v30 = vrot.slane %v932_v22, 5  ;;  %v668_v8 = vld [vmem:[%s7127_s25 + $0x94] sm:$0xf] }
  0x52   : > { %v1585_v16 = vsel %vm7184_vm7, %v1583_v21, %v1584_v15  ;;  %v942_v31 = vshll.u32 %v663_v17, 16  ;;  %v921_v34 = vsel %vm7191_vm8, %v916_v24, %v920_v11  ;;  %v938_v37 = vrot.slane %v936_v27, 4  ;;  %v669_v14 = vld [vmem:[%s7127_s25 + $0x98] sm:$0x1]  ;;  %v1457_v20 = vld [vmem:[%s7127_s25 + $0x84] sm:$0xe] }
  0x53   : > { %v5968_v35 = vcombine.low %v1582_v13, %v1585_v16  ;;  %v929_v36 = vor.u32 %v928_v26, %v925_v25  ;;  %v5920_v39 = vcombine.low %v911_v29, %v921_v34  ;;  %v5952_v42 = vrot.slane %v1451_v23, 9  ;;  %v1458_v13 = vld [vmem:[%s7127_s25 + $0x88] sm:$0xf]  ;;  %v1459_v25 = vld [vmem:[%s7127_s25 + $0x8c] sm:$0x1] }
  0x54   : > { %v944_v41 = vrot.slane %v942_v31, 5  ;;  %v1588_v43 = vrot.slane %v1452_v28, 5  ;;  %v939_v46 = vor.u32 %v938_v37, %v934_v30  ;;  %v1591_v47 = vrot.slane %v1453_v32, 5 }
  0x55   : > { %6785 = vmatprep.mubr.msk.bf16.mxu0 %vm350_vm2, %v5968_v35  ;;  %v930_v45 = vrot.slane %v929_v36, 4  ;;  %v947_v48 = vshrl.u32 %v664_v33, 16  ;;  %6752 = vmatmul.mubr.msk.bf16.gmra.mrb[32].mxu1 %vm350_vm2, %v5920_v39  ;;  %v950_v52 = vshll.u32 %v664_v33, 16  ;;  %v956_v53 = vshll.u32 %v665_v38, 16  ;;  %v670_v33 = vld [vmem:[%s7127_s25 + $0x9c] sm:$0xf] }
  0x56   : > { %v1589_v50 = vsel %vm7184_vm7, %v5952_v42, %v1588_v43  ;;  %v1590_v51 = vrot.slane %v1588_v43, 4  ;;  %v940_v58 = vrot.slane %v939_v46, 4  ;;  %v960_v60 = vshrl.u32 %v665_v38, 16  ;;  %v671_v38 = vld [vmem:[%s7127_s25 + $0xa0] sm:$0xf] }
  0x57   : > { %v935_v55 = vsel %vm7191_vm8, %v930_v45, %v934_v30  ;;  %v949_v59 = vrot.slane %v947_v48, 4  ;;  %v952_v63 = vrot.slane %v950_v52, 5  ;;  %v958_v0 = vrot.slane %v956_v53, 5  ;;  %v672_v39 = vld [vmem:[%s7127_s25 + $0xa4] sm:$0x1] }
  0x58   : > { %v1592_v62 = vsel %vm7184_vm7, %v1590_v51, %v1591_v47  ;;  %v966_v1 = vshll.u32 %v666_v44, 16  ;;  %v945_v3 = vsel %vm7191_vm8, %v940_v58, %v944_v41  ;;  %v962_v6 = vrot.slane %v960_v60, 4  ;;  %v1460_v45 = vld [vmem:[%s7127_s25 + $0x90] sm:$0xe] }
  0x59   : > { %v5969_v4 = vcombine.low %v1589_v50, %v1592_v62  ;;  %v5953_v7 = vrot.slane %v1454_v49, 9  ;;  %v5921_v9 = vcombine.low %v935_v55, %v945_v3  ;;  %v953_v10 = vor.u32 %v952_v63, %v949_v59  ;;  %v1461_v50 = vld [vmem:[%s7127_s25 + $0x94] sm:$0xf]  ;;  %v1462_v55 = vld [vmem:[%s7127_s25 + $0x98] sm:$0x1] }
  0x5a   : > { %v968_v11 = vrot.slane %v966_v1, 5  ;;  %v1595_v12 = vrot.slane %v1455_v54, 5  ;;  %v963_v15 = vor.u32 %v962_v6, %v958_v0  ;;  %v1598_v17 = vrot.slane %v1456_v61, 5  ;;  %v673_v62 = vld [vmem:[%s7127_s25 + $0xa8] sm:$0xf] }
  0x5b   : > { %6786 = vmatmul.mubr.msk.bf16.gmra.mrb[32].mxu0 %vm350_vm2, %v5969_v4  ;;  %v971_v18 = vshrl.u32 %v667_v2, 16  ;;  %v974_v19 = vshll.u32 %v667_v2, 16  ;;  %6755 = vmatprep.mubr.msk.bf16.mxu1 %vm350_vm2, %v5921_v9  ;;  %v954_v21 = vrot.slane %v953_v10, 4  ;;  %v980_v24 = vshll.u32 %v668_v8, 16  ;;  %v674_v3 = vld [vmem:[%s7127_s25 + $0xac] sm:$0xf] }
  0x5c   : > { %v1596_v22 = vsel %vm7184_vm7, %v5953_v7, %v1595_v12  ;;  %v1597_v23 = vrot.slane %v1595_v12, 4  ;;  %v964_v26 = vrot.slane %v963_v15, 4  ;;  %v984_v29 = vshrl.u32 %v668_v8, 16 }
  0x5d   : > { %v973_v27 = vrot.slane %v971_v18, 4  ;;  %v976_v28 = vrot.slane %v974_v19, 5  ;;  %v959_v16 = vsel %vm7191_vm8, %v954_v21, %v958_v0  ;;  %v982_v31 = vrot.slane %v980_v24, 5 }
  0x5e   : > { %v1599_v30 = vsel %vm7184_vm7, %v1597_v23, %v1598_v17  ;;  %v990_v32 = vshll.u32 %v669_v14, 16  ;;  %v969_v34 = vsel %vm7191_vm8, %v964_v26, %v968_v11  ;;  %v986_v37 = vrot.slane %v984_v29, 4  ;;  %v675_v14 = vld [vmem:[%s7127_s25 + $0xb0] sm:$0x1] }
  0x5f   : > { %v5970_v35 = vcombine.low %v1596_v22, %v1599_v30  ;;  %v977_v36 = vor.u32 %v976_v28, %v973_v27  ;;  %v5922_v41 = vcombine.low %v959_v16, %v969_v34  ;;  %v5954_v43 = vrot.slane %v1457_v20, 9  ;;  %v1463_v20 = vld [vmem:[%s7127_s25 + $0x9c] sm:$0xe] }
  0x60   : > { %v992_v42 = vrot.slane %v990_v32, 5  ;;  %v1602_v44 = vrot.slane %v1458_v13, 5  ;;  %v987_v47 = vor.u32 %v986_v37, %v982_v31  ;;  %v1605_v48 = vrot.slane %v1459_v25, 5  ;;  %v1464_v13 = vld [vmem:[%s7127_s25 + $0xa0] sm:$0xf] }
  0x61   : > { %6789 = vmatprep.mubr.msk.bf16.mxu0 %vm350_vm2, %v5970_v35  ;;  %v978_v46 = vrot.slane %v977_v36, 4  ;;  %v995_v49 = vshrl.u32 %v670_v33, 16  ;;  %6756 = vmatmul.mubr.msk.bf16.gmra.mrb[36].mxu1 %vm350_vm2, %v5922_v41  ;;  %v998_v53 = vshll.u32 %v670_v33, 16  ;;  %v1004_v54 = vshll.u32 %v671_v38, 16  ;;  %v1465_v25 = vld [vmem:[%s7127_s25 + $0xa4] sm:$0x1] }
  0x62   : > { %v1603_v51 = vsel %vm7184_vm7, %v5954_v43, %v1602_v44  ;;  %v1604_v52 = vrot.slane %v1602_v44, 4  ;;  %v988_v59 = vrot.slane %v987_v47, 4  ;;  %v1008_v61 = vshrl.u32 %v671_v38, 16  ;;  %v676_v33 = vld [vmem:[%s7127_s25 + $0xb4] sm:$0xf] }
  0x63   : > { %v983_v58 = vsel %vm7191_vm8, %v978_v46, %v982_v31  ;;  %v997_v60 = vrot.slane %v995_v49, 4  ;;  %v1000_v0 = vrot.slane %v998_v53, 5  ;;  %v1006_v1 = vrot.slane %v1004_v54, 5  ;;  %v677_v38 = vld [vmem:[%s7127_s25 + $0xb8] sm:$0xf] }
  0x64   : > { %v1606_v63 = vsel %vm7184_vm7, %v1604_v52, %v1605_v48  ;;  %v1014_v2 = vshll.u32 %v672_v39, 16  ;;  %v993_v4 = vsel %vm7191_vm8, %v988_v59, %v992_v42  ;;  %v1010_v7 = vrot.slane %v1008_v61, 4  ;;  %v678_v39 = vld [vmem:[%s7127_s25 + $0xbc] sm:$0x1] }
  0x65   : > { %v5971_v6 = vcombine.low %v1603_v51, %v1606_v63  ;;  %v5955_v8 = vrot.slane %v1460_v45, 9  ;;  %v5923_v9 = vcombine.low %v983_v58, %v993_v4  ;;  %v1001_v10 = vor.u32 %v1000_v0, %v997_v60  ;;  %v1466_v45 = vld [vmem:[%s7127_s25 + $0xa8] sm:$0xe]  ;;  %v1469_v58 = vld [vmem:[%s7127_s25 + $0xb4] sm:$0xe] }
  0x66   : > { %v1016_v11 = vrot.slane %v1014_v2, 5  ;;  %v1609_v12 = vrot.slane %v1461_v50, 5  ;;  %v1011_v15 = vor.u32 %v1010_v7, %v1006_v1  ;;  %v1612_v17 = vrot.slane %v1462_v55, 5  ;;  %v1467_v50 = vld [vmem:[%s7127_s25 + $0xac] sm:$0xf] }
  0x67   : > { %6790 = vmatmul.mubr.msk.bf16.gmra.mrb[36].mxu0 %vm350_vm2, %v5971_v6  ;;  %v1019_v18 = vshrl.u32 %v673_v62, 16  ;;  %v1022_v19 = vshll.u32 %v673_v62, 16  ;;  %6759 = vmatprep.mubr.msk.bf16.mxu1 %vm350_vm2, %v5923_v9  ;;  %v1002_v21 = vrot.slane %v1001_v10, 4  ;;  %v1028_v24 = vshll.u32 %v674_v3, 16  ;;  %v1468_v55 = vld [vmem:[%s7127_s25 + $0xb0] sm:$0x1] }
  0x68   : > { %v1610_v22 = vsel %vm7184_vm7, %v5955_v8, %v1609_v12  ;;  %v1611_v23 = vrot.slane %v1609_v12, 4  ;;  %v1012_v26 = vrot.slane %v1011_v15, 4  ;;  %v1032_v29 = vshrl.u32 %v674_v3, 16  ;;  %v1470_v63 = vld [vmem:[%s7127_s25 + $0xb8] sm:$0xf] }
  0x69   : > { %v1021_v27 = vrot.slane %v1019_v18, 4  ;;  %v1024_v28 = vrot.slane %v1022_v19, 5  ;;  %v1007_v16 = vsel %vm7191_vm8, %v1002_v21, %v1006_v1  ;;  %v1030_v31 = vrot.slane %v1028_v24, 5  ;;  %v1471_v4 = vld [vmem:[%s7127_s25 + $0xbc] sm:$0x1] }
  0x6a   : > { %v1613_v30 = vsel %vm7184_vm7, %v1611_v23, %v1612_v17  ;;  %v1038_v32 = vshll.u32 %v675_v14, 16  ;;  %v1017_v34 = vsel %vm7191_vm8, %v1012_v26, %v1016_v11  ;;  %v1034_v37 = vrot.slane %v1032_v29, 4  ;;  %v6057_v15 = vld [vmem:[%s7127_s25 + $0xc] sm:$0xf] }
  0x6b   : > { %v5972_v35 = vcombine.low %v1610_v22, %v1613_v30  ;;  %v1025_v36 = vor.u32 %v1024_v28, %v1021_v27  ;;  %v5924_v41 = vcombine.low %v1007_v16, %v1017_v34  ;;  %v5956_v43 = vrot.slane %v1463_v20, 9  ;;  %v6061_v34 = vld [vmem:[%s7127_s25 + $0x1c] sm:$0xf] }
  0x6c   : > { %v1040_v42 = vrot.slane %v1038_v32, 5  ;;  %v1616_v44 = vrot.slane %v1464_v13, 5  ;;  %v1035_v47 = vor.u32 %v1034_v37, %v1030_v31  ;;  %v1619_v48 = vrot.slane %v1465_v25, 5  ;;  %v6058_v13 = vld [vmem:[%s7127_s25 + $0x10] sm:$0xf] }
  0x6d   : > { %6793 = vmatprep.mubr.msk.bf16.mxu0 %vm350_vm2, %v5972_v35  ;;  %v1026_v46 = vrot.slane %v1025_v36, 4  ;;  %v1043_v49 = vshrl.u32 %v676_v33, 16  ;;  %6760 = vmatmul.mubr.msk.bf16.gmra.mrb[40].mxu1 %vm350_vm2, %v5924_v41  ;;  %v1046_v53 = vshll.u32 %v676_v33, 16  ;;  %v1052_v54 = vshll.u32 %v677_v38, 16  ;;  %v6059_v25 = vld [vmem:[%s7127_s25 + $0x14] sm:$0x1] }
  0x6e   : > { %v1617_v51 = vsel %vm7184_vm7, %v5956_v43, %v1616_v44  ;;  %v1618_v52 = vrot.slane %v1616_v44, 4  ;;  %v1036_v60 = vrot.slane %v1035_v47, 4  ;;  %v1056_v62 = vshrl.u32 %v677_v38, 16  ;;  %v6060_v33 = vld [vmem:[%s7127_s25 + $0x18] sm:$0xf]  ;;  %v7034_v38 = vld [vmem:[%s7127_s25 + $0xc] sm:$0xff]  }
  0x6f   : > { %v1031_v59 = vsel %vm7191_vm8, %v1026_v46, %v1030_v31  ;;  %v1045_v61 = vrot.slane %v1043_v49, 4  ;;  %v1048_v1 = vrot.slane %v1046_v53, 5  ;;  %v1054_v2 = vrot.slane %v1052_v54, 5  ;;  %v6062_v41 = vld [vmem:[%s7127_s25 + $0x20] sm:$0x1] }
  0x70   : > { %v1620_v0 = vsel %vm7184_vm7, %v1618_v52, %v1619_v48  ;;  %v1062_v3 = vshll.u32 %v678_v39, 16  ;;  %v1041_v6 = vsel %vm7191_vm8, %v1036_v60, %v1040_v42  ;;  %v1058_v8 = vrot.slane %v1056_v62, 4  ;;  %v6267_v46 = vld [vmem:[%s8841_s1 + $0xc] sm:$0x3] }
  0x71   : > { %v5973_v7 = vcombine.low %v1617_v51, %v1620_v0  ;;  %v5957_v9 = vrot.slane %v1466_v45, 9  ;;  %v5925_v10 = vcombine.low %v1031_v59, %v1041_v6  ;;  %v1049_v11 = vor.u32 %v1048_v1, %v1045_v61  ;;  %v6063_v51 = vld [vmem:[%s7127_s25 + $0x24] sm:$0xf] }
  0x72   : > { %v1064_v12 = vrot.slane %v1062_v3, 5  ;;  %v1623_v14 = vrot.slane %v1467_v50, 5  ;;  %v1059_v17 = vor.u32 %v1058_v8, %v1054_v2  ;;  %v1626_v18 = vrot.slane %v1468_v55, 5  ;;  %v7035_v3 = vld [vmem:[%s7127_s25 + $0x18] sm:$0xff]   ;;  %v7036_v6 = vld [vmem:[%s7127_s25 + $0x24] sm:$0xff]  }
  0x73   : > { %6794 = vmatmul.mubr.msk.bf16.gmra.mrb[40].mxu0 %vm350_vm2, %v5973_v7  ;;  %v5958_v19 = vrot.slane %v1469_v58, 9  ;;  %v1630_v20 = vrot.slane %v1470_v63, 5  ;;  %6763 = vmatprep.mubr.msk.bf16.mxu1 %vm350_vm2, %v5925_v10  ;;  %v1050_v21 = vrot.slane %v1049_v11, 4  ;;  %v1633_v24 = vrot.slane %v1471_v4, 5  ;;  %v6064_v58 = vld [vmem:[%s7127_s25 + $0x28] sm:$0xf] }
  0x74   : > { %v1624_v22 = vsel %vm7184_vm7, %v5957_v9, %v1623_v14  ;;  %v1625_v23 = vrot.slane %v1623_v14, 4  ;;  %v1060_v26 = vrot.slane %v1059_v17, 4  ;;  %v2465_v29 = vshrl.u32 %v6057_v15, 16  ;;  %v6065_v9 = vld [vmem:[%s7127_s25 + $0x2c] sm:$0x1] }
  0x75   : > { %v1631_v27 = vsel %vm7184_vm7, %v5958_v19, %v1630_v20  ;;  %v1632_v28 = vrot.slane %v1630_v20, 4  ;;  %v1055_v16 = vsel %vm7191_vm8, %v1050_v21, %v1054_v2  ;;  %v2468_v31 = vshll.u32 %v6057_v15, 16  ;;  %v6066_v17 = vld [vmem:[%s7127_s25 + $0x30] sm:$0xf] }
  0x76   : > { %v1627_v30 = vsel %vm7184_vm7, %v1625_v23, %v1626_v18  ;;  %v2474_v32 = vshll.u32 %v6058_v13, 16  ;;  %v1065_v35 = vsel %vm7191_vm8, %v1060_v26, %v1064_v12  ;;  %v2467_v39 = vrot.slane %v2465_v29, 4  ;;  %v6068_v29 = vld [vmem:[%s7127_s25 + $0x38] sm:$0x1] }
  0x77   : > { %v5974_v36 = vcombine.low %v1624_v22, %v1627_v30  ;;  %v1634_v37 = vsel %vm7184_vm7, %v1632_v28, %v1633_v24  ;;  %v5926_v42 = vcombine.low %v1055_v16, %v1065_v35  ;;  %v2470_v44 = vrot.slane %v2468_v31, 5  ;;  %v6069_v30 = vld [vmem:[%s7127_s25 + $0x3c] sm:$0xf] }
  0x78   : > { %v5975_v43 = vcombine.low %v1631_v27, %v1634_v37  ;;  %v2476_v45 = vrot.slane %v2474_v32, 5  ;;  %v2478_v47 = vshrl.u32 %v6058_v13, 16  ;;  %v2484_v48 = vshll.u32 %v6059_v25, 16  ;;  %v6067_v25 = vld [vmem:[%s7127_s25 + $0x34] sm:$0xf] }
  0x79   : > { %6797 = vmatprep.mubr.msk.bf16.mxu0 %vm350_vm2, %v5974_v36  ;;  %v2489_v49 = vshrl.u32 %v6060_v33, 16  ;;  %v2492_v50 = vshll.u32 %v6060_v33, 16  ;;  %6764 = vmatmul.mubr.msk.bf16.gmra.mrb[44].mxu1 %vm350_vm2, %v5926_v42  ;;  %v2471_v52 = vor.u32 %v2470_v44, %v2467_v39  ;;  %v2498_v53 = vshll.u32 %v6061_v34, 16  ;;  %v6070_v39 = vld [vmem:[%s7127_s25 + $0x40] sm:$0xf] }
  0x7a   : > { %v2502_v54 = vshrl.u32 %v6061_v34, 16  ;;  %v2508_v55 = vshll.u32 %v6062_v41, 16  ;;  %6803 = vmatprep.mubr.msk.bf16.mxu1 %vm350_vm2, %v7034_v38  ;;  %v2480_v59 = vrot.slane %v2478_v47, 4  ;;  %v2486_v60 = vrot.slane %v2484_v48, 5 }
  0x7b   : > { %6798 = vmatmul.mubr.msk.bf16.gmra.mrb[44].mxu0 %vm350_vm2, %v5975_v43  ;;  %v2491_v61 = vrot.slane %v2489_v49, 4  ;;  %v2494_v62 = vrot.slane %v2492_v50, 5  ;;  %v2472_v63 = vrot.slane %v2471_v52, 4  ;;  %v2500_v0 = vrot.slane %v2498_v53, 5  ;;  %v7037_v50 = vld [vmem:[%s7127_s25 + $0x30] sm:$0xff]  }
  0x7c   : > { %v2504_v1 = vrot.slane %v2502_v54, 4  ;;  %v2510_v2 = vrot.slane %v2508_v55, 5  ;;  %v2481_v4 = vor.u32 %v2480_v59, %v2476_v45  ;;  %v3968_v8 = vand.u32 %v6267_v46, %v7113_v5  ;;  %v6072_v46 = vld [vmem:[%s7127_s25 + $0x48] sm:$0xf] }
  0x7d   : > { %v2495_v7 = vor.u32 %v2494_v62, %v2491_v61  ;;  %v2513_v10 = vshrl.u32 %v6063_v51, 16  ;;  %v2477_v11 = vsel %vm7191_vm8, %v2472_v63, %v2476_v45  ;;  %v2516_v14 = vshll.u32 %v6063_v51, 16  ;;  %v6071_v45 = vld [vmem:[%s7127_s25 + $0x44] sm:$0x1] }
  0x7e   : > { %v2505_v12 = vor.u32 %v2504_v1, %v2500_v0  ;;  %v2522_v15 = vshll.u32 %v6064_v58, 16  ;;  %v2482_v18 = vrot.slane %v2481_v4, 4  ;;  %6903 = vmatprep.subr.bf16.mxu0 %v3968_v8  ;;  %v2526_v13 = vshrl.u32 %v6064_v58, 16  ;;  %v7038_v58 = vld [vmem:[%s7127_s25 + $0x3c] sm:$0xff]  }
  0x7f   : > { %v2496_v19 = vrot.slane %v2495_v7, 4  ;;  %v2515_v20 = vrot.slane %v2513_v10, 4  ;;  %v2518_v22 = vrot.slane %v2516_v14, 5  ;;  %v2532_v24 = vshll.u32 %v6065_v9, 16 }
  0x80   : > { %v2506_v21 = vrot.slane %v2505_v12, 4  ;;  %v2524_v23 = vrot.slane %v2522_v15, 5  ;;  %v2487_v26 = vsel %vm7191_vm8, %v2482_v18, %v2486_v60  ;;  %v2528_v28 = vrot.slane %v2526_v13, 4  ;;  %v7039_v13 = vld [vmem:[%s7127_s25 + $0x48] sm:$0xff]  }
  0x81   : > { %v2501_v27 = vsel %vm7191_vm8, %v2496_v19, %v2500_v0  ;;  %v2537_v16 = vshrl.u32 %v6066_v17, 16  ;;  %6804 = vmatmul.mubr.msk.bf16.vlgmr.msra.gmra.mrb[48].mxu1 %vm350_vm2, %v7035_v3  ;;  %v6106_v31 = vcombine.low %v2477_v11, %v2487_v26  ;;  %v2519_v33 = vor.u32 %v2518_v22, %v2515_v20  ;;  %v6074_v11 = vld [vmem:[%s7127_s25 + $0x50] sm:$0x1]  ;;  %v6075_v19 = vld [vmem:[%s7127_s25 + $0x54] sm:$0xf] }
  0x82   : > { %v2511_v32 = vsel %vm7191_vm8, %v2506_v21, %v2510_v2  ;;  %v2534_v34 = vrot.slane %v2532_v24, 5  ;;  %6870 = vmatpush3.bf16.msra.mxu1 %v7174_v40  ;;  %6807 = vmatprep.mubr.msk.bf16.mxu1 %vm350_vm2, %v7036_v6  ;;  %v2529_v36 = vor.u32 %v2528_v28, %v2524_v23  ;;  %v2540_v38 = vshll.u32 %v6066_v17, 16  ;;  %v6073_v2 = vld [vmem:[%s7127_s25 + $0x4c] sm:$0xf]  ;;  %v6076_v24 = vld [vmem:[%s7127_s25 + $0x58] sm:$0xf] }
  0x83   : > { %v6107_v35 = vcombine.low %v2501_v27, %v2511_v32  ;;  %v2539_v37 = vrot.slane %v2537_v16, 4  ;;  %6837 = vmatprep.mubr.msk.bf16.mxu0 %vm350_vm2, %v6106_v31  ;;  %v2520_v41 = vrot.slane %v2519_v33, 4  ;;  %v2546_v42 = vshll.u32 %v6067_v25, 16 }
  0x84   : > { %v2550_v43 = vshrl.u32 %v6067_v25, 16  ;;  %v2556_v44 = vshll.u32 %v6068_v29, 16  ;;  %v2530_v40 = vrot.slane %v2529_v36, 4  ;;  %v2542_v47 = vrot.slane %v2540_v38, 5  ;;  %v6077_v29 = vld [vmem:[%s7127_s25 + $0x5c] sm:$0x1] }
  0x85   : > { %6838 = vmatmul.mubr.msk.bf16.vlgmr.msra.gmra.mrb[48].mxu0 %vm350_vm2, %v6107_v35  ;;  %v2561_v48 = vshrl.u32 %v6069_v30, 16  ;;  %v2564_v49 = vshll.u32 %v6069_v30, 16  ;;  %v2525_v51 = vsel %vm7191_vm8, %v2520_v41, %v2524_v23  ;;  %v2548_v52 = vrot.slane %v2546_v42, 5  ;;  %v7040_v30 = vld [vmem:[%s7127_s25 + $0x54] sm:$0xff]  }
  0x86   : > { %6904 = vmatpush3.bf16.msra.mxu0 %v3968_v8  ;;  %v2552_v53 = vrot.slane %v2550_v43, 4  ;;  %v2558_v54 = vrot.slane %v2556_v44, 5  ;;  %v2535_v55 = vsel %vm7191_vm8, %v2530_v40, %v2534_v34  ;;  %v2543_v59 = vor.u32 %v2542_v47, %v2539_v37  ;;  %v6078_v34 = vld [vmem:[%s7127_s25 + $0x60] sm:$0xf] }
  0x87   : > { %v2563_v60 = vrot.slane %v2561_v48, 4  ;;  %v2566_v61 = vrot.slane %v2564_v49, 5  ;;  %v6108_v62 = vcombine.low %v2525_v51, %v2535_v55  ;;  %v2570_v0 = vshll.u32 %v6070_v39, 16 }
  0x88   : > { %v2553_v63 = vor.u32 %v2552_v53, %v2548_v52  ;;  %v2574_v1 = vshrl.u32 %v6070_v39, 16  ;;  %v2544_v3 = vrot.slane %v2543_v59, 4  ;;  %v2580_v6 = vshll.u32 %v6071_v45, 16  ;;  %v6079_v39 = vld [vmem:[%s7127_s25 + $0x64] sm:$0xf] }
  0x89   : > { %v2567_v4 = vor.u32 %v2566_v61, %v2563_v60  ;;  %v2585_v7 = vshrl.u32 %v6072_v46, 16  ;;  %6808 = vmatmul.mubr.msk.bf16.gmra.mrb[52].mxu1 %vm350_vm2, %v7037_v50  ;;  %6841 = vmatprep.mubr.msk.bf16.mxu0 %vm350_vm2, %v6108_v62  ;;  %v2572_v9 = vrot.slane %v2570_v0, 5  ;;  %v2588_v12 = vshll.u32 %v6072_v46, 16 }
  0x8a   : > { %v2554_v8 = vrot.slane %v2553_v63, 4  ;;  %v2576_v10 = vrot.slane %v2574_v1, 4  ;;  %6811 = vmatprep.mubr.msk.bf16.mxu1 %vm350_vm2, %v7038_v58  ;;  %v2549_v14 = vsel %vm7191_vm8, %v2544_v3, %v2548_v52  ;;  %v2582_v17 = vrot.slane %v2580_v6, 5  ;;  %v6081_v63 = vld [vmem:[%s7127_s25 + $0x6c] sm:$0xf] }
  0x8b   : > { %v2568_v15 = vrot.slane %v2567_v4, 4  ;;  %v2587_v18 = vrot.slane %v2585_v7, 4  ;;  %v2590_v22 = vrot.slane %v2588_v12, 5  ;;  %v2594_v23 = vshll.u32 %v6073_v2, 16  ;;  %v6082_v4 = vld [vmem:[%s7127_s25 + $0x70] sm:$0xf] }
  0x8c   : > { %v2559_v20 = vsel %vm7191_vm8, %v2554_v8, %v2558_v54  ;;  %v2577_v21 = vor.u32 %v2576_v10, %v2572_v9  ;;  %v2598_v27 = vshrl.u32 %v6073_v2, 16  ;;  %v2604_v28 = vshll.u32 %v6074_v11, 16  ;;  %v6080_v54 = vld [vmem:[%s7127_s25 + $0x68] sm:$0x1]  ;;  %v7041_v7 = vld [vmem:[%s7127_s25 + $0x60] sm:$0xff]   ;;  %v7042_v12 = vld [vmem:[%s7127_s25 + $0x6c] sm:$0xff]  }
  0x8d   : > { %v6109_v25 = vcombine.low %v2549_v14, %v2559_v20  ;;  %v2573_v26 = vsel %vm7191_vm8, %v2568_v15, %v2572_v9  ;;  %v2591_v31 = vor.u32 %v2590_v22, %v2587_v18  ;;  %v2596_v32 = vrot.slane %v2594_v23, 5  ;;  %v6083_v15 = vld [vmem:[%s7127_s25 + $0x74] sm:$0x1]  ;;  %v6084_v22 = vld [vmem:[%s7127_s25 + $0x78] sm:$0xf] }
  0x8e   : > { %v2578_v16 = vrot.slane %v2577_v21, 4  ;;  %v2609_v33 = vshrl.u32 %v6075_v19, 16  ;;  %v2600_v35 = vrot.slane %v2598_v27, 4  ;;  %v2606_v36 = vrot.slane %v2604_v28, 5  ;;  %v6085_v27 = vld [vmem:[%s7127_s25 + $0x7c] sm:$0xf] }
  0x8f   : > { %6842 = vmatmul.mubr.msk.bf16.gmra.mrb[52].mxu0 %vm350_vm2, %v6109_v25  ;;  %v2612_v37 = vshll.u32 %v6075_v19, 16  ;;  %v2618_v38 = vshll.u32 %v6076_v24, 16  ;;  %v2592_v42 = vrot.slane %v2591_v31, 4  ;;  %v2622_v44 = vshrl.u32 %v6076_v24, 16  ;;  %v6086_v31 = vld [vmem:[%s7127_s25 + $0x80] sm:$0x1] }
  0x90   : > { %v2583_v41 = vsel %vm7191_vm8, %v2578_v16, %v2582_v17  ;;  %v2611_v43 = vrot.slane %v2609_v33, 4  ;;  %v2601_v46 = vor.u32 %v2600_v35, %v2596_v32  ;;  %v2628_v50 = vshll.u32 %v6077_v29, 16 }
  0x91   : > { %v6110_v45 = vcombine.low %v2573_v26, %v2583_v41  ;;  %v2614_v40 = vrot.slane %v2612_v37, 5  ;;  %v2620_v47 = vrot.slane %v2618_v38, 5  ;;  %6812 = vmatmul.mubr.msk.bf16.gmra.mrb[56].mxu1 %vm350_vm2, %v7039_v13  ;;  %v2597_v48 = vsel %vm7191_vm8, %v2592_v42, %v2596_v32 }
  0x92   : > { %v2624_v49 = vrot.slane %v2622_v44, 4  ;;  %v2633_v51 = vshrl.u32 %v6078_v34, 16  ;;  %6815 = vmatprep.mubr.msk.bf16.mxu1 %vm350_vm2, %v7040_v30  ;;  %v2602_v52 = vrot.slane %v2601_v46, 4  ;;  %v2636_v55 = vshll.u32 %v6078_v34, 16  ;;  %v6088_v46 = vld [vmem:[%s7127_s25 + $0x88] sm:$0xf] }
  0x93   : > { %6845 = vmatprep.mubr.msk.bf16.mxu0 %vm350_vm2, %v6110_v45  ;;  %v2615_v53 = vor.u32 %v2614_v40, %v2611_v43  ;;  %v2642_v58 = vshll.u32 %v6079_v39, 16  ;;  %v2630_v60 = vrot.slane %v2628_v50, 5  ;;  %v2646_v62 = vshrl.u32 %v6079_v39, 16  ;;  %v7043_v40 = vld [vmem:[%s7127_s25 + $0x78] sm:$0xff]  }
  0x94   : > { %v2625_v59 = vor.u32 %v2624_v49, %v2620_v47  ;;  %v2635_v61 = vrot.slane %v2633_v51, 4  ;;  %v2607_v0 = vsel %vm7191_vm8, %v2602_v52, %v2606_v36  ;;  %v2638_v2 = vrot.slane %v2636_v55, 5  ;;  %v6087_v36 = vld [vmem:[%s7127_s25 + $0x84] sm:$0xf] }
  0x95   : > { %v2616_v1 = vrot.slane %v2615_v53, 4  ;;  %v2644_v3 = vrot.slane %v2642_v58, 5  ;;  %v6111_v6 = vcombine.low %v2597_v48, %v2607_v0  ;;  %v2648_v9 = vrot.slane %v2646_v62, 4  ;;  %v7044_v48 = vld [vmem:[%s7127_s25 + $0x84] sm:$0xff]  }
  0x96   : > { %v2626_v8 = vrot.slane %v2625_v59, 4  ;;  %v2652_v10 = vshll.u32 %v6080_v54, 16  ;;  %v2639_v14 = vor.u32 %v2638_v2, %v2635_v61  ;;  %v2657_v17 = vshrl.u32 %v6081_v63, 16  ;;  %v6089_v54 = vld [vmem:[%s7127_s25 + $0x8c] sm:$0x1] }
  0x97   : > { %v2621_v11 = vsel %vm7191_vm8, %v2616_v1, %v2620_v47  ;;  %v2660_v18 = vshll.u32 %v6081_v63, 16  ;;  %6846 = vmatmul.mubr.msk.bf16.gmra.mrb[56].mxu0 %vm350_vm2, %v6111_v6  ;;  %v2649_v20 = vor.u32 %v2648_v9, %v2644_v3  ;;  %v2666_v21 = vshll.u32 %v6082_v4, 16  ;;  %v6091_v9 = vld [vmem:[%s7127_s25 + $0x94] sm:$0xf] }
  0x98   : > { %v2631_v19 = vsel %vm7191_vm8, %v2626_v8, %v2630_v60  ;;  %v2654_v13 = vrot.slane %v2652_v10, 5  ;;  %v2640_v24 = vrot.slane %v2639_v14, 4  ;;  %v2659_v25 = vrot.slane %v2657_v17, 4 }
  0x99   : > { %v6112_v23 = vcombine.low %v2621_v11, %v2631_v19  ;;  %v2662_v26 = vrot.slane %v2660_v18, 5  ;;  %6816 = vmatmul.mubr.msk.bf16.gmra.mrb[60].mxu1 %vm350_vm2, %v7041_v7  ;;  %v2650_v28 = vrot.slane %v2649_v20, 4  ;;  %v2668_v29 = vrot.slane %v2666_v21, 5 }
  0x9a   : > { %v2670_v16 = vshrl.u32 %v6082_v4, 16  ;;  %v2676_v30 = vshll.u32 %v6083_v15, 16  ;;  %6819 = vmatprep.mubr.msk.bf16.mxu1 %vm350_vm2, %v7042_v12  ;;  %v2645_v32 = vsel %vm7191_vm8, %v2640_v24, %v2644_v3  ;;  %v2681_v34 = vshrl.u32 %v6084_v22, 16  ;;  %v6090_v3 = vld [vmem:[%s7127_s25 + $0x90] sm:$0xf] }
  0x9b   : > { %6849 = vmatprep.mubr.msk.bf16.mxu0 %vm350_vm2, %v6112_v23  ;;  %v2663_v33 = vor.u32 %v2662_v26, %v2659_v25  ;;  %v2684_v35 = vshll.u32 %v6084_v22, 16  ;;  %v2655_v37 = vsel %vm7191_vm8, %v2650_v28, %v2654_v13  ;;  %v2690_v41 = vshll.u32 %v6085_v27, 16  ;;  %v6092_v15 = vld [vmem:[%s7127_s25 + $0x98] sm:$0x1]  ;;  %v7045_v13 = vld [vmem:[%s7127_s25 + $0x90] sm:$0xff]  }
  0x9c   : > { %v2672_v38 = vrot.slane %v2670_v16, 4  ;;  %v2678_v39 = vrot.slane %v2676_v30, 5  ;;  %v6113_v42 = vcombine.low %v2645_v32, %v2655_v37  ;;  %v2683_v44 = vrot.slane %v2681_v34, 4  ;;  %v6093_v25 = vld [vmem:[%s7127_s25 + $0x9c] sm:$0xf] }
  0x9d   : > { %v2664_v43 = vrot.slane %v2663_v33, 4  ;;  %v2686_v45 = vrot.slane %v2684_v35, 5  ;;  %v2692_v49 = vrot.slane %v2690_v41, 5  ;;  %v2694_v50 = vshrl.u32 %v6085_v27, 16  ;;  %v7046_v27 = vld [vmem:[%s7127_s25 + $0x9c] sm:$0xff]  }
  0x9e   : > { %v2673_v47 = vor.u32 %v2672_v38, %v2668_v29  ;;  %v2700_v51 = vshll.u32 %v6086_v31, 16  ;;  %v2705_v55 = vshrl.u32 %v6087_v36, 16  ;;  %v2708_v58 = vshll.u32 %v6087_v36, 16  ;;  %v6094_v30 = vld [vmem:[%s7127_s25 + $0xa0] sm:$0xf] }
  0x9f   : > { %v2669_v52 = vsel %vm7191_vm8, %v2664_v43, %v2668_v29  ;;  %v2687_v53 = vor.u32 %v2686_v45, %v2683_v44  ;;  %6850 = vmatmul.mubr.msk.bf16.gmra.mrb[60].mxu0 %vm350_vm2, %v6113_v42  ;;  %v2696_v60 = vrot.slane %v2694_v50, 4  ;;  %v2714_v62 = vshll.u32 %v6088_v46, 16  ;;  %v6095_v35 = vld [vmem:[%s7127_s25 + $0xa4] sm:$0x1]  ;;  %v6096_v45 = vld [vmem:[%s7127_s25 + $0xa8] sm:$0xf] }
  0xa0   : > { %v2674_v59 = vrot.slane %v2673_v47, 4  ;;  %v2702_v61 = vrot.slane %v2700_v51, 5  ;;  %v2707_v0 = vrot.slane %v2705_v55, 4  ;;  %v2710_v1 = vrot.slane %v2708_v58, 5 }
  0xa1   : > { %v2688_v63 = vrot.slane %v2687_v53, 4  ;;  %v2718_v2 = vshrl.u32 %v6088_v46, 16  ;;  %6820 = vmatmul.mubr.msk.bf16.gmra.mrb[64].mxu1 %vm350_vm2, %v7043_v40  ;;  %v2697_v6 = vor.u32 %v2696_v60, %v2692_v49  ;;  %v2716_v7 = vrot.slane %v2714_v62, 5 }
  0xa2   : > { %v2679_v4 = vsel %vm7191_vm8, %v2674_v59, %v2678_v39  ;;  %v2724_v8 = vshll.u32 %v6089_v54, 16  ;;  %6823 = vmatprep.mubr.msk.bf16.mxu1 %vm350_vm2, %v7044_v48  ;;  %v2711_v12 = vor.u32 %v2710_v1, %v2707_v0  ;;  %v2729_v19 = vshrl.u32 %v6090_v3, 16  ;;  %v6099_v1 = vld [vmem:[%s7127_s25 + $0xb4] sm:$0xf] }
  0xa3   : > { %v6114_v10 = vcombine.low %v2669_v52, %v2679_v4  ;;  %v2693_v11 = vsel %vm7191_vm8, %v2688_v63, %v2692_v49  ;;  %v2720_v14 = vrot.slane %v2718_v2, 4  ;;  %v2698_v17 = vrot.slane %v2697_v6, 4  ;;  %v6097_v49 = vld [vmem:[%s7127_s25 + $0xac] sm:$0xf]  ;;  %v6098_v63 = vld [vmem:[%s7127_s25 + $0xb0] sm:$0x1] }
  0xa4   : > { %v2726_v18 = vrot.slane %v2724_v8, 5  ;;  %v2732_v20 = vshll.u32 %v6090_v3, 16  ;;  %v2712_v21 = vrot.slane %v2711_v12, 4  ;;  %v2738_v23 = vshll.u32 %v6091_v9, 16  ;;  %v7047_v3 = vld [vmem:[%s7127_s25 + $0xa8] sm:$0xff]   ;;  %v7048_v12 = vld [vmem:[%s7127_s25 + $0xb4] sm:$0xff]  }
  0xa5   : > { %6853 = vmatprep.mubr.msk.bf16.mxu0 %vm350_vm2, %v6114_v10  ;;  %v2721_v22 = vor.u32 %v2720_v14, %v2716_v7  ;;  %v2742_v24 = vshrl.u32 %v6091_v9, 16  ;;  %v2703_v26 = vsel %vm7191_vm8, %v2698_v17, %v2702_v61  ;;  %v2731_v28 = vrot.slane %v2729_v19, 4  ;;  %v6100_v8 = vld [vmem:[%s7127_s25 + $0xb8] sm:$0xf] }
  0xa6   : > { %v2734_v29 = vrot.slane %v2732_v20, 5  ;;  %v2748_v16 = vshll.u32 %v6092_v15, 16  ;;  %v6115_v31 = vcombine.low %v2693_v11, %v2703_v26  ;;  %v2717_v32 = vsel %vm7191_vm8, %v2712_v21, %v2716_v7  ;;  %v6101_v21 = vld [vmem:[%s7127_s25 + $0xbc] sm:$0x1] }
  0xa7   : > { %v2722_v33 = vrot.slane %v2721_v22, 4  ;;  %v2740_v34 = vrot.slane %v2738_v23, 5  ;;  %v2744_v37 = vrot.slane %v2742_v24, 4  ;;  %v2753_v39 = vshrl.u32 %v6093_v25, 16  ;;  %v6102_v24 = vld [vmem:[%s7127_s25 + $0xc0] sm:$0xf] }
  0xa8   : > { %v2735_v36 = vor.u32 %v2734_v29, %v2731_v28  ;;  %v2750_v38 = vrot.slane %v2748_v16, 5  ;;  %6854 = vmatmul.mubr.msk.bf16.gmra.mrb[64].mxu0 %vm350_vm2, %v6115_v31  ;;  %v2756_v42 = vshll.u32 %v6093_v25, 16  ;;  %v2762_v43 = vshll.u32 %v6094_v30, 16  ;;  %v6103_v29 = vld [vmem:[%s7127_s25 + $0xc4] sm:$0xf] }
  0xa9   : > { %v2727_v41 = vsel %vm7191_vm8, %v2722_v33, %v2726_v18  ;;  %v2766_v44 = vshrl.u32 %v6094_v30, 16  ;;  %6824 = vmatmul.mubr.msk.bf16.gmra.mrb[68].mxu1 %vm350_vm2, %v7045_v13  ;;  %v2745_v47 = vor.u32 %v2744_v37, %v2740_v34  ;;  %v2755_v48 = vrot.slane %v2753_v39, 4  ;;  %v6104_v33 = vld [vmem:[%s7127_s25 + $0xc8] sm:$0x1]  ;;  %v6139_v39 = vld [vmem:[%s7127_s25 + $0x10] sm:$0xf] }
  0xaa   : > { %v6116_v46 = vcombine.low %v2717_v32, %v2727_v41  ;;  %v2736_v40 = vrot.slane %v2735_v36, 4  ;;  %6827 = vmatprep.mubr.msk.bf16.mxu1 %vm350_vm2, %v7046_v27  ;;  %v2758_v50 = vrot.slane %v2756_v42, 5  ;;  %v2764_v51 = vrot.slane %v2762_v43, 5 }
  0xab   : > { %v2768_v52 = vrot.slane %v2766_v44, 4  ;;  %v2772_v53 = vshll.u32 %v6095_v35, 16  ;;  %v2746_v55 = vrot.slane %v2745_v47, 4  ;;  %v2777_v58 = vshrl.u32 %v6096_v45, 16 }
  0xac   : > { %6857 = vmatprep.mubr.msk.bf16.mxu0 %vm350_vm2, %v6116_v46  ;;  %v2741_v54 = vsel %vm7191_vm8, %v2736_v40, %v2740_v34  ;;  %v2780_v59 = vshll.u32 %v6096_v45, 16  ;;  %v2759_v60 = vor.u32 %v2758_v50, %v2755_v48  ;;  %v2786_v0 = vshll.u32 %v6097_v49, 16  ;;  %v6138_v34 = vld [vmem:[%s7127_s25 + $0xc] sm:$0xe]  ;;  %v6140_v45 = vld [vmem:[%s7127_s25 + $0x14] sm:$0x1] }
  0xad   : > { %v2769_v61 = vor.u32 %v2768_v52, %v2764_v51  ;;  %v2774_v62 = vrot.slane %v2772_v53, 5  ;;  %v2751_v2 = vsel %vm7191_vm8, %v2746_v55, %v2750_v38  ;;  %v2779_v4 = vrot.slane %v2777_v58, 4  ;;  %v7049_v40 = vld [vmem:[%s7127_s25 + $0xc0] sm:$0xff]   ;;  %v6348_v50 = vld [vmem:[%s8841_s1 + $0xe] sm:$0x3] }
  0xae   : > { %v2782_v6 = vrot.slane %v2780_v59, 5  ;;  %v2790_v7 = vshrl.u32 %v6097_v49, 16  ;;  %v6117_v9 = vcombine.low %v2741_v54, %v2751_v2  ;;  %v2760_v10 = vrot.slane %v2759_v60, 4  ;;  %v6141_v55 = vld [vmem:[%s7127_s25 + $0x18] sm:$0xe] }
  0xaf   : > { %v2770_v11 = vrot.slane %v2769_v61, 4  ;;  %v2788_v14 = vrot.slane %v2786_v0, 5  ;;  %v2796_v18 = vshll.u32 %v6098_v63, 16  ;;  %v2801_v19 = vshrl.u32 %v6099_v1, 16 }
  0xb0   : > { %v2783_v15 = vor.u32 %v2782_v6, %v2779_v4  ;;  %v2792_v17 = vrot.slane %v2790_v7, 4  ;;  %6858 = vmatmul.mubr.msk.bf16.gmra.mrb[68].mxu0 %vm350_vm2, %v6117_v9  ;;  %v2765_v20 = vsel %vm7191_vm8, %v2760_v10, %v2764_v51  ;;  %v2804_v22 = vshll.u32 %v6099_v1, 16  ;;  %v6144_v4 = vld [vmem:[%s7127_s25 + $0x24] sm:$0xe]  ;;  %v6145_v10 = vld [vmem:[%s7127_s25 + $0x28] sm:$0xf] }
  0xb1   : > { %v2775_v13 = vsel %vm7191_vm8, %v2770_v11, %v2774_v62  ;;  %v2810_v23 = vshll.u32 %v6100_v8, 16  ;;  %6828 = vmatmul.mubr.msk.bf16.gmra.mrb[72].mxu1 %vm350_vm2, %v7047_v3  ;;  %v2798_v28 = vrot.slane %v2796_v18, 5  ;;  %v2803_v16 = vrot.slane %v2801_v19, 4  ;;  %v6142_v62 = vld [vmem:[%s7127_s25 + $0x1c] sm:$0xf] }
  0xb2   : > { %v6118_v25 = vcombine.low %v2765_v20, %v2775_v13  ;;  %v2784_v26 = vrot.slane %v2783_v15, 4  ;;  %v2793_v27 = vor.u32 %v2792_v17, %v2788_v14  ;;  %6831 = vmatprep.mubr.msk.bf16.mxu1 %vm350_vm2, %v7048_v12  ;;  %v2806_v30 = vrot.slane %v2804_v22, 5  ;;  %v6143_v3 = vld [vmem:[%s7127_s25 + $0x20] sm:$0x1]  ;;  %v6146_v11 = vld [vmem:[%s7127_s25 + $0x2c] sm:$0x1] }
  0xb3   : > { %v2812_v31 = vrot.slane %v2810_v23, 5  ;;  %v2814_v32 = vshrl.u32 %v6100_v8, 16  ;;  %v2820_v37 = vshll.u32 %v6101_v21, 16  ;;  %v2825_v38 = vshrl.u32 %v6102_v24, 16  ;;  %v6147_v12 = vld [vmem:[%s7127_s25 + $0x30] sm:$0xe] }
  0xb4   : > { %6861 = vmatprep.mubr.msk.bf16.mxu0 %vm350_vm2, %v6118_v25  ;;  %v2789_v35 = vsel %vm7191_vm8, %v2784_v26, %v2788_v14  ;;  %v2794_v36 = vrot.slane %v2793_v27, 4  ;;  %v2807_v41 = vor.u32 %v2806_v30, %v2803_v16  ;;  %v2828_v43 = vshll.u32 %v6102_v24, 16  ;;  %v6148_v19 = vld [vmem:[%s7127_s25 + $0x34] sm:$0xf]  ;;  %v6149_v20 = vld [vmem:[%s7127_s25 + $0x38] sm:$0x1] }
  0xb5   : > { %v2816_v42 = vrot.slane %v2814_v32, 4  ;;  %v2834_v44 = vshll.u32 %v6103_v29, 16  ;;  %v2822_v47 = vrot.slane %v2820_v37, 5  ;;  %v2827_v48 = vrot.slane %v2825_v38, 4  ;;  %v6445_v13 = vld [vmem:[%s8841_s1 + $0x10] sm:$0x3] }
  0xb6   : > { %v2799_v46 = vsel %vm7191_vm8, %v2794_v36, %v2798_v28  ;;  %v2838_v49 = vshrl.u32 %v6103_v29, 16  ;;  %v2808_v52 = vrot.slane %v2807_v41, 4  ;;  %v2830_v54 = vrot.slane %v2828_v43, 5  ;;  %v6150_v25 = vld [vmem:[%s7127_s25 + $0x3c] sm:$0xe] }
  0xb7   : > { %v6119_v51 = vcombine.low %v2789_v35, %v2799_v46  ;;  %v2817_v53 = vor.u32 %v2816_v42, %v2812_v31  ;;  %v2836_v58 = vrot.slane %v2834_v44, 5  ;;  %v2844_v60 = vshll.u32 %v6104_v33, 16  ;;  %v7050_v33 = vld [vmem:[%s7127_s25 + $0x18] sm:$0xff]   ;;  %v6152_v35 = vld [vmem:[%s7127_s25 + $0x44] sm:$0x1] }
  0xb8   : > { %v2840_v59 = vrot.slane %v2838_v49, 4  ;;  %v6186_v61 = vrot.slane %v6138_v34, 9  ;;  %v2813_v63 = vsel %vm7191_vm8, %v2808_v52, %v2812_v31  ;;  %v2831_v1 = vor.u32 %v2830_v54, %v2827_v48  ;;  %v6151_v34 = vld [vmem:[%s7127_s25 + $0x40] sm:$0xf]  ;;  %v7643_v41 = vld [vmem:[%s7127_s25 + $0x4c] sm:$0xf] }
  0xb9   : > { %6862 = vmatmul.mubr.msk.bf16.gmra.mrb[72].mxu0 %vm350_vm2, %v6119_v51  ;;  %v2818_v0 = vrot.slane %v2817_v53, 4  ;;  %v3304_v2 = vrot.slane %v6139_v39, 5  ;;  %6832 = vmatmul.mubr.msk.bf16.gmra.mrb[76].mxu1 %vm350_vm2, %v7049_v40  ;;  %v2846_v7 = vrot.slane %v2844_v60, 5  ;;  %v3307_v8 = vrot.slane %v6140_v45, 5  ;;  %v6153_v46 = vld [vmem:[%s7127_s25 + $0x48] sm:$0xe] }
  0xba   : > { %v2841_v6 = vor.u32 %v2840_v59, %v2836_v58  ;;  %v4758_v9 = vand.u32 %v6348_v50, %v7113_v5  ;;  %v2832_v15 = vrot.slane %v2831_v1, 4  ;;  %v6187_v23 = vrot.slane %v6141_v55, 9  ;;  %v7651_v40 = vld [vmem:[%s7127_s25 + $0x50] sm:$0x1]  ;;  %v6156_v51 = vld [vmem:[%s7127_s25 + $0x54] sm:$0xe] }
  0xbb   : > { %v2823_v14 = vsel %vm7191_vm8, %v2818_v0, %v2822_v47  ;;  %v3305_v17 = vsel %vm7184_vm7, %v6186_v61, %v3304_v2  ;;  %v3306_v18 = vrot.slane %v3304_v2, 4  ;;  %v3311_v24 = vrot.slane %v6142_v62, 5  ;;  %v6157_v52 = vld [vmem:[%s7127_s25 + $0x58] sm:$0xf]  ;;  %v6159_v53 = vld [vmem:[%s7127_s25 + $0x60] sm:$0xe] }
  0xbc   : > { %v6120_v21 = vcombine.low %v2813_v63, %v2823_v14  ;;  %v2842_v22 = vrot.slane %v2841_v6, 4  ;;  %6937 = vmatprep.subr.bf16.mxu1 %v4758_v9  ;;  %v2837_v26 = vsel %vm7191_vm8, %v2832_v15, %v2836_v58  ;;  %v3314_v28 = vrot.slane %v6143_v3, 5  ;;  %v6158_v58 = vld [vmem:[%s7127_s25 + $0x5c] sm:$0x1]  ;;  %v6160_v59 = vld [vmem:[%s7127_s25 + $0x64] sm:$0xf] }
  0xbd   : > { %v3308_v27 = vsel %vm7184_vm7, %v3306_v18, %v3307_v8  ;;  %v6188_v29 = vrot.slane %v6144_v4, 9  ;;  %v3312_v31 = vsel %vm7184_vm7, %v6187_v23, %v3311_v24  ;;  %v3313_v32 = vrot.slane %v3311_v24, 4  ;;  %v6161_v62 = vld [vmem:[%s7127_s25 + $0x68] sm:$0x1]  ;;  %v6162_v63 = vld [vmem:[%s7127_s25 + $0x6c] sm:$0xe] }
  0xbe   : > { %6865 = vmatprep.mubr.msk.bf16.mxu0 %vm350_vm2, %v6120_v21  ;;  %v2847_v16 = vsel %vm7191_vm8, %v2842_v22, %v2846_v7  ;;  %v6203_v30 = vcombine.low %v3305_v17, %v3308_v27  ;;  %v3318_v37 = vrot.slane %v6145_v10, 5  ;;  %v3321_v38 = vrot.slane %v6146_v11, 5  ;;  %v6163_v4 = vld [vmem:[%s7127_s25 + $0x70] sm:$0xf]  ;;  %v6164_v6 = vld [vmem:[%s7127_s25 + $0x74] sm:$0x1] }
  0xbf   : > { %v6121_v36 = vcombine.low %v2837_v26, %v2847_v16  ;;  %v6189_v39 = vrot.slane %v6147_v12, 9  ;;  %v3315_v42 = vsel %vm7184_vm7, %v3313_v32, %v3314_v28  ;;  %v3325_v43 = vrot.slane %v6148_v19, 5  ;;  %v7051_v7 = vld [vmem:[%s7127_s25 + $0x24] sm:$0xff]   ;;  %v6166_v12 = vld [vmem:[%s7127_s25 + $0x7c] sm:$0xf]  ;;  %v7052_v14 = vld [vmem:[%s7127_s25 + $0x30] sm:$0xff]  }
  0xc0   : > { %6871 = vmatprep.mubr.msk.bf16.mxu1 %vm350_vm2, %v6203_v30  ;;  %v3328_v44 = vrot.slane %v6149_v20, 5  ;;  %v5324_v45 = vand.u32 %v6445_v13, %v7113_v5  ;;  %v6204_v47 = vcombine.low %v3312_v31, %v3315_v42  ;;  %v3319_v48 = vsel %vm7184_vm7, %v6188_v29, %v3318_v37  ;;  %v6165_v20 = vld [vmem:[%s7127_s25 + $0x78] sm:$0xe]  ;;  %v6167_v13 = vld [vmem:[%s7127_s25 + $0x80] sm:$0x1] }
  0xc1   : > { %6866 = vmatmul.mubr.msk.bf16.gmra.mrb[76].mxu0 %vm350_vm2, %v6121_v36  ;;  %v3320_v49 = vrot.slane %v3318_v37, 4  ;;  %v6190_v50 = vrot.slane %v6150_v25, 9  ;;  %v3327_v5 = vrot.slane %v3325_v43, 4  ;;  %v3332_v54 = vrot.slane %v6151_v34, 5  ;;  %v6168_v24 = vld [vmem:[%s7127_s25 + $0x84] sm:$0xe] }
  0xc2   : > { %6905 = vmatprep.mubr.msk.bf16.mxu0 %vm350_vm2, %v7050_v33  ;;  %6971 = vmatprep.subr.bf16.mxu0 %v5324_v45  ;;  %v3335_v55 = vrot.slane %v6152_v35, 5  ;;  %v3339_v61 = vrot.slane %v7643_v41, 5  ;;  %v3326_v1 = vsel %vm7184_vm7, %v6189_v39, %v3325_v43  ;;  %v6191_v10 = vrot.slane %v6153_v46, 9  ;;  %v6169_v29 = vld [vmem:[%s7127_s25 + $0x88] sm:$0xf]  ;;  %v7053_v42 = vld [vmem:[%s7127_s25 + $0x3c] sm:$0xff]  }
  0xc3   : > { %6872 = vmatmul.mubr.msk.bf16.vlgmr.msra.gmra.mrb[80].mxu1 %vm350_vm2, %v6204_v47  ;;  %v3322_v60 = vsel %vm7184_vm7, %v3320_v49, %v3321_v38  ;;  %v3329_v2 = vsel %vm7184_vm7, %v3327_v5, %v3328_v44  ;;  %v3334_v3 = vrot.slane %v3332_v54, 4  ;;  %v3333_v8 = vsel %vm7184_vm7, %v6190_v50, %v3332_v54  ;;  %v6170_v16 = vld [vmem:[%s7127_s25 + $0x8c] sm:$0x1]  ;;  %v6171_v30 = vld [vmem:[%s7127_s25 + $0x90] sm:$0xe] }
  0xc4   : > { %6938 = vmatpush3.bf16.msra.mxu1 %v4758_v9  ;;  %v6205_v0 = vcombine.low %v3319_v48, %v3322_v60  ;;  %v3341_v11 = vrot.slane %v3339_v61, 4  ;;  %v3342_v9 = vrot.slane %v7651_v40, 5  ;;  %v6192_v17 = vrot.slane %v6156_v51, 9  ;;  %v6172_v35 = vld [vmem:[%s7127_s25 + $0x94] sm:$0xf]  ;;  %v7054_v5 = vld [vmem:[%s7127_s25 + $0x48] sm:$0xff]  }
  0xc5   : > { %v3336_v15 = vsel %vm7184_vm7, %v3334_v3, %v3335_v55  ;;  %v3346_v18 = vrot.slane %v6157_v52, 5  ;;  %v6193_v19 = vrot.slane %v6159_v53, 9  ;;  %v6206_v21 = vcombine.low %v3326_v1, %v3329_v2  ;;  %v6173_v41 = vld [vmem:[%s7127_s25 + $0x98] sm:$0x1]  ;;  %v6175_v40 = vld [vmem:[%s7127_s25 + $0xa0] sm:$0xf] }
  0xc6   : > { %6875 = vmatprep.mubr.msk.bf16.mxu1 %vm350_vm2, %v6205_v0  ;;  %v3349_v22 = vrot.slane %v6158_v58, 5  ;;  %v3353_v23 = vrot.slane %v6160_v59, 5  ;;  %v6207_v25 = vcombine.low %v3333_v8, %v3336_v15  ;;  %v3356_v27 = vrot.slane %v6161_v62, 5  ;;  %v6174_v51 = vld [vmem:[%s7127_s25 + $0x9c] sm:$0xe] }
  0xc7   : > { %v3348_v26 = vrot.slane %v3346_v18, 4  ;;  %v6194_v28 = vrot.slane %v6162_v63, 9  ;;  %v3340_v31 = vsel %vm7184_vm7, %v6191_v10, %v3339_v61  ;;  %v3360_v33 = vrot.slane %v6163_v4, 5  ;;  %v6177_v52 = vld [vmem:[%s7127_s25 + $0xa8] sm:$0xe] }
  0xc8   : > { %v3355_v32 = vrot.slane %v3353_v23, 4  ;;  %v3363_v34 = vrot.slane %v6164_v6, 5  ;;  %v3343_v36 = vsel %vm7184_vm7, %v3341_v11, %v3342_v9  ;;  %v3347_v37 = vsel %vm7184_vm7, %v6192_v17, %v3346_v18  ;;  %v6178_v53 = vld [vmem:[%s7127_s25 + $0xac] sm:$0xf]  ;;  %v7734_v4 = vld [vmem:[%s7127_s25 + $0xa4] sm:$0x1] }
  0xc9   : > { %6906 = vmatmul.mubr.msk.bf16.vlgmr.msra.gmra.mrb[80].mxu0 %vm350_vm2, %v7051_v7  ;;  %v7700_v38 = vsel %vm7184_vm7, %v6193_v19, %v3353_v23  ;;  %v3367_v39 = vrot.slane %v6166_v12, 5  ;;  %v3350_v43 = vsel %vm7184_vm7, %v3348_v26, %v3349_v22  ;;  %v3362_v44 = vrot.slane %v3360_v33, 4  ;;  %v7737_v6 = vld [vmem:[%s7127_s25 + $0xb0] sm:$0x1]  ;;  %v7748_v9 = vld [vmem:[%s7127_s25 + $0xb4] sm:$0xe] }
  0xca   : > { %6972 = vmatpush3.bf16.msra.mxu0 %v5324_v45  ;;  %6909 = vmatprep.mubr.msk.bf16.mxu0 %vm350_vm2, %v7052_v14  ;;  %v6195_v45 = vrot.slane %v6165_v20, 9  ;;  %v3370_v46 = vrot.slane %v6167_v13, 5  ;;  %v7711_v47 = vsel %vm7184_vm7, %v3355_v32, %v3356_v27  ;;  %v7715_v48 = vsel %vm7184_vm7, %v6194_v28, %v3360_v33  ;;  %v7751_v12 = vld [vmem:[%s7127_s25 + $0xb8] sm:$0xf]  ;;  %v7759_v19 = vld [vmem:[%s7127_s25 + $0xbc] sm:$0x1] }
  0xcb   : > { %6876 = vmatmul.mubr.msk.bf16.gmra.mrb[84].mxu1 %vm350_vm2, %v6206_v21  ;;  %v3369_v49 = vrot.slane %v3367_v39, 4  ;;  %v6196_v50 = vrot.slane %v6168_v24, 9  ;;  %v7723_v54 = vsel %vm7184_vm7, %v3362_v44, %v3363_v34  ;;  %v3374_v55 = vrot.slane %v6169_v29, 5  ;;  %v7772_v23 = vld [vmem:[%s7127_s25 + $0xc0] sm:$0xe]  ;;  %v7055_v33 = vld [vmem:[%s7127_s25 + $0x54] sm:$0xff]  }
  0xcc   : > { %6879 = vmatprep.mubr.msk.bf16.mxu1 %vm350_vm2, %v6207_v25  ;;  %v3377_v58 = vrot.slane %v6170_v16, 5  ;;  %v6197_v59 = vrot.slane %v6171_v30, 9  ;;  %v6208_v60 = vcombine.low %v3340_v31, %v3343_v36  ;;  %v6209_v61 = vcombine.low %v3347_v37, %v3350_v43  ;;  %v7775_v24 = vld [vmem:[%s7127_s25 + $0xc4] sm:$0xf]  ;;  %v7784_v28 = vld [vmem:[%s7127_s25 + $0xc8] sm:$0x1] }
  0xcd   : > { %v3381_v62 = vrot.slane %v6172_v35, 5  ;;  %v3384_v63 = vrot.slane %v6173_v41, 5  ;;  %v6210_v0 = vcombine.low %v7700_v38, %v7711_v47  ;;  %v6211_v1 = vcombine.low %v7715_v48, %v7723_v54  ;;  %v7787_v29 = vld [vmem:[%s7127_s25 + $0x18] sm:$0xf]  ;;  %v7793_v32 = vld [vmem:[%s7127_s25 + $0x1c] sm:$0xf] }
  0xce   : > { %v7731_v2 = vsel %vm7184_vm7, %v6195_v45, %v3367_v39  ;;  %v3376_v3 = vrot.slane %v3374_v55, 4  ;;  %v7741_v7 = vsel %vm7184_vm7, %v3369_v49, %v3370_v46  ;;  %v7745_v8 = vsel %vm7184_vm7, %v6196_v50, %v3374_v55  ;;  %v7056_v41 = vld [vmem:[%s7127_s25 + $0x60] sm:$0xff]  }
  0xcf   : > { %v3383_v10 = vrot.slane %v3381_v62, 4  ;;  %v3388_v11 = vrot.slane %v6175_v40, 5  ;;  %v6198_v15 = vrot.slane %v6174_v51, 9  ;;  %v6199_v17 = vrot.slane %v6177_v52, 9  ;;  %v6302_v46 = vld [vmem:[%s7127_s25 + $0x20] sm:$0x1] }
  0xd0   : > { %v7756_v14 = vsel %vm7184_vm7, %v3376_v3, %v3377_v58  ;;  %v3395_v18 = vrot.slane %v6178_v53, 5  ;;  %v7764_v20 = vsel %vm7184_vm7, %v6197_v59, %v3381_v62  ;;  %v3391_v22 = vrot.slane %v7734_v4, 5  ;;  %v6303_v52 = vld [vmem:[%s7127_s25 + $0x24] sm:$0xf]  ;;  %v7862_v59 = vld [vmem:[%s7127_s25 + $0x28] sm:$0xf] }
  0xd1   : > { %6910 = vmatmul.mubr.msk.bf16.gmra.mrb[84].mxu0 %vm350_vm2, %v7053_v42  ;;  %v7768_v13 = vsel %vm7184_vm7, %v3383_v10, %v3384_v63  ;;  %v3390_v21 = vrot.slane %v3388_v11, 4  ;;  %v6212_v25 = vcombine.low %v7731_v2, %v7741_v7  ;;  %v6213_v26 = vcombine.low %v7745_v8, %v7756_v14 }
  0xd2   : > { %6913 = vmatprep.mubr.msk.bf16.mxu0 %vm350_vm2, %v7054_v5  ;;  %v3398_v27 = vrot.slane %v7737_v6, 5  ;;  %v3397_v16 = vrot.slane %v3395_v18, 4  ;;  %v6200_v30 = vrot.slane %v7748_v9, 9  ;;  %v3402_v31 = vrot.slane %v7751_v12, 5 }
  0xd3   : > { %6880 = vmatmul.mubr.msk.bf16.gmra.mrb[88].mxu1 %vm350_vm2, %v6208_v60  ;;  %v6214_v34 = vcombine.low %v7764_v20, %v7768_v13  ;;  %v7800_v35 = vsel %vm7184_vm7, %v6198_v15, %v3388_v11  ;;  %v7804_v36 = vsel %vm7184_vm7, %v6199_v17, %v3395_v18  ;;  %v7075_v37 = vmov 0.0   ;;  %v7057_v11 = vld [vmem:[%s7127_s25 + $0x6c] sm:$0xff]   ;;  %v7058_v18 = vld [vmem:[%s7127_s25 + $0x78] sm:$0xff]  }
  0xd4   : > { %6883 = vmatprep.mubr.msk.bf16.mxu1 %vm350_vm2, %v6209_v61  ;;  %191 = vst.msk [vmem:[#allocation2 + $0x90] sm:$0xff] %vm172_vm9, %v7075_v37  ;;  %173 = vst.msk [vmem:[#allocation2] sm:$0xff] %vm172_vm9, %v7075_v37  ;;  %v3405_v39 = vrot.slane %v7759_v19, 5  ;;  %v7842_v42 = vsel %vm7184_vm7, %v3390_v21, %v3391_v22  ;;  %v3404_v43 = vrot.slane %v3402_v31, 4  ;;  %v6201_v44 = vrot.slane %v7772_v23, 9 }
  0xd5   : > { %174 = vst.msk [vmem:[#allocation2 + $0x8] sm:$0xff] %vm172_vm9, %v7075_v37  ;;  %175 = vst.msk [vmem:[#allocation2 + $0x10] sm:$0xff] %vm172_vm9, %v7075_v37  ;;  %v3409_v45 = vrot.slane %v7775_v24, 5  ;;  %v3412_v40 = vrot.slane %v7784_v28, 5  ;;  %v4244_v49 = vshrl.u32 %v7787_v29, 16  ;;  %v4247_v50 = vshll.u32 %v7787_v29, 16 }
  0xd6   : > { %176 = vst.msk [vmem:[#allocation2 + $0x18] sm:$0xff] %vm172_vm9, %v7075_v37  ;;  %177 = vst.msk [vmem:[#allocation2 + $0x20] sm:$0xff] %vm172_vm9, %v7075_v37  ;;  %v4253_v51 = vshll.u32 %v7793_v32, 16  ;;  %v7854_v53 = vsel %vm7184_vm7, %v3397_v16, %v3398_v27  ;;  %v7858_v5 = vsel %vm7184_vm7, %v6200_v30, %v3402_v31  ;;  %v4257_v58 = vshrl.u32 %v7793_v32, 16  ;;  %v6305_v30 = vld [vmem:[%s7127_s25 + $0x2c] sm:$0x1] }
  0xd7   : > { %178 = vst.msk [vmem:[#allocation2 + $0x28] sm:$0xff] %vm172_vm9, %v7075_v37  ;;  %179 = vst.msk [vmem:[#allocation2 + $0x30] sm:$0xff] %vm172_vm9, %v7075_v37  ;;  %v3411_v55 = vrot.slane %v3409_v45, 4  ;;  %v7867_v60 = vsel %vm7184_vm7, %v3404_v43, %v3405_v39  ;;  %v4246_v61 = vrot.slane %v4244_v49, 4  ;;  %v4249_v62 = vrot.slane %v4247_v50, 5 }
  0xd8   : > { %180 = vst.msk [vmem:[#allocation2 + $0x38] sm:$0xff] %vm172_vm9, %v7075_v37  ;;  %181 = vst.msk [vmem:[#allocation2 + $0x40] sm:$0xff] %vm172_vm9, %v7075_v37  ;;  %v4255_v63 = vrot.slane %v4253_v51, 5  ;;  %v7872_v3 = vsel %vm7184_vm7, %v6201_v44, %v3409_v45  ;;  %v4259_v4 = vrot.slane %v4257_v58, 4  ;;  %v4263_v6 = vshll.u32 %v6302_v46, 16 }
  0xd9   : > { %182 = vst.msk [vmem:[#allocation2 + $0x48] sm:$0xff] %vm172_vm9, %v7075_v37  ;;  %183 = vst.msk [vmem:[#allocation2 + $0x50] sm:$0xff] %vm172_vm9, %v7075_v37  ;;  %6914 = vmatmul.mubr.msk.bf16.gmra.mrb[88].mxu0 %vm350_vm2, %v7055_v33  ;;  %v4268_v10 = vshrl.u32 %v6303_v52, 16  ;;  %v7881_v9 = vsel %vm7184_vm7, %v3411_v55, %v3412_v40  ;;  %v4250_v12 = vor.u32 %v4249_v62, %v4246_v61  ;;  %v4271_v15 = vshll.u32 %v6303_v52, 16  ;;  %v6381_v45 = vld [vmem:[%s7127_s25 + $0x18] sm:$0xe] }
  0xda   : > { %184 = vst.msk [vmem:[#allocation2 + $0x58] sm:$0xff] %vm172_vm9, %v7075_v37  ;;  %185 = vst.msk [vmem:[#allocation2 + $0x60] sm:$0xff] %vm172_vm9, %v7075_v37  ;;  %6917 = vmatprep.mubr.msk.bf16.mxu0 %vm350_vm2, %v7056_v41  ;;  %v4277_v17 = vshll.u32 %v7862_v59, 16  ;;  %v6215_v38 = vcombine.low %v7800_v35, %v7842_v42  ;;  %v4260_v22 = vor.u32 %v4259_v4, %v4255_v63  ;;  %v4265_v23 = vrot.slane %v4263_v6, 5  ;;  %v6382_v58 = vld [vmem:[%s7127_s25 + $0x1c] sm:$0xf] }
  0xdb   : > { %186 = vst.msk [vmem:[#allocation2 + $0x68] sm:$0xff] %vm172_vm9, %v7075_v37  ;;  %187 = vst.msk [vmem:[#allocation2 + $0x70] sm:$0xff] %vm172_vm9, %v7075_v37  ;;  %6884 = vmatmul.mubr.msk.bf16.gmra.mrb[92].mxu1 %vm350_vm2, %v6210_v0  ;;  %v255_v47 = vld [vmem:[#allocation2 + $0x90] sm:$0xff]  ;;  %v4270_v24 = vrot.slane %v4268_v10, 4  ;;  %v6216_v27 = vcombine.low %v7804_v36, %v7854_v53  ;;  %v237_v29 = vld [vmem:[#allocation2] sm:$0xff]  ;;  %v4251_v16 = vrot.slane %v4250_v12, 4  ;;  %v6218_v39 = vcombine.low %v7872_v3, %v7881_v9 }
  0xdc   : > { %188 = vst.msk [vmem:[#allocation2 + $0x78] sm:$0xff] %vm172_vm9, %v7075_v37  ;;  %189 = vst.msk [vmem:[#allocation2 + $0x80] sm:$0xff] %vm172_vm9, %v7075_v37  ;;  %6887 = vmatprep.mubr.msk.bf16.mxu1 %vm350_vm2, %v6211_v1  ;;  %v239_v1 = vld [vmem:[#allocation2 + $0x10] sm:$0xff]  ;;  %v4273_v31 = vrot.slane %v4271_v15, 5  ;;  %v4261_v44 = vrot.slane %v4260_v22, 4  ;;  %v238_v51 = vld [vmem:[#allocation2 + $0x8] sm:$0xff] }
  0xdd   : > { %190 = vst.msk [vmem:[#allocation2 + $0x88] sm:$0xff] %vm172_vm9, %v7075_v37  ;;  %192 = vst.msk [vmem:[#allocation2 + $0x98] sm:$0xff] %vm172_vm9, %v7075_v37  ;;  %v240_v43 = vld [vmem:[#allocation2 + $0x18] sm:$0xff]  ;;  %v4256_v52 = vsel %vm7191_vm8, %v4251_v16, %v4255_v63  ;;  %v7906_v10 = vrot.slane %v4277_v17, 5  ;;  %v6383_v12 = vld [vmem:[%s7127_s25 + $0x20] sm:$0x1] }
  0xde   : > { %193 = vst.msk [vmem:[#allocation2 + $0xa0] sm:$0xff] %vm172_vm9, %v7075_v37  ;;  %194 = vst.msk [vmem:[#allocation2 + $0xa8] sm:$0xff] %vm172_vm9, %v7075_v37  ;;  %v4274_v55 = vor.u32 %v4273_v31, %v4270_v24  ;;  %v4266_v6 = vsel %vm7191_vm8, %v4261_v44, %v4265_v23  ;;  %v6306_v15 = vld [vmem:[%s7127_s25 + $0x30] sm:$0xf]  ;;  %v4287_v22 = vshll.u32 %v6305_v30, 16  ;;  %v6429_v23 = vrot.slane %v6381_v45, 9 }
  0xdf   : > { %195 = vst.msk [vmem:[#allocation2 + $0xb0] sm:$0xff] %vm172_vm9, %v7075_v37  ;;  %196 = vst.msk [vmem:[#allocation2 + $0xb8] sm:$0xff] %vm172_vm9, %v7075_v37  ;;  %v5083_v24 = vrot.slane %v6382_v58, 5  ;;  %v6308_v31 = vld [vmem:[%s7127_s25 + $0x38] sm:$0x1] }
  0xe0   : > { %197 = vst.msk [vmem:[#allocation2 + $0xc0] sm:$0xff] %vm172_vm9, %v7075_v37  ;;  %198 = vst.msk [vmem:[#allocation2 + $0xc8] sm:$0xff] %vm172_vm9, %v7075_v37 }
  0xe1   : > { %199 = vst.msk [vmem:[#allocation2 + $0xd0] sm:$0xff] %vm172_vm9, %v7075_v37  ;;  %200 = vst.msk [vmem:[#allocation2 + $0xd8] sm:$0xff] %vm172_vm9, %v7075_v37  ;;  %6918 = vmatmul.mubr.msk.bf16.gmra.mrb[92].mxu0 %vm350_vm2, %v7057_v11  ;;  %v7938_v16 = vsel %vm7184_vm7, %v6429_v23, %v5083_v24  ;;  %v5085_v30 = vrot.slane %v5083_v24, 4  ;;  %v6386_v23 = vld [vmem:[%s7127_s25 + $0x2c] sm:$0x1] }
  0xe2   : > { %201 = vst.msk [vmem:[#allocation2 + $0xe0] sm:$0xff] %vm172_vm9, %v7075_v37  ;;  %202 = vst.msk [vmem:[#allocation2 + $0xe8] sm:$0xff] %vm172_vm9, %v7075_v37  ;;  %6921 = vmatprep.mubr.msk.bf16.mxu0 %vm350_vm2, %v7058_v18  ;;  %v6309_v24 = vld [vmem:[%s7127_s25 + $0x3c] sm:$0xf] }
  0xe3   : > { %203 = vst.msk [vmem:[#allocation2 + $0xf0] sm:$0xff] %vm172_vm9, %v7075_v37  ;;  %204 = vst.msk [vmem:[#allocation2 + $0xf8] sm:$0xff] %vm172_vm9, %v7075_v37  ;;  %v253_v19 = vld [vmem:[#allocation2 + $0x80] sm:$0xff]  ;;  %v6217_v37 = vcombine.low %v7858_v5, %v7867_v60  ;;  %6888 = vmatmul.mubr.msk.bf16.gmra.mrb[96].mxu1 %vm350_vm2, %v6212_v25  ;;  %v4289_v25 = vrot.slane %v4287_v22, 5 }
  0xe4   : > { %v256_v21 = vld [vmem:[#allocation2 + $0x98] sm:$0xff]  ;;  %v254_v54 = vld [vmem:[#allocation2 + $0x88] sm:$0xff]  ;;  %6891 = vmatprep.mubr.msk.bf16.mxu1 %vm350_vm2, %v6213_v26 }
  0xe5   : > { %v258_v14 = vld [vmem:[#allocation2 + $0xa8] sm:$0xff] }
  0xe6   : > { %v6719_v0 = vpop.f32.mrb[0].mxu1  ;;  %v259_v11 = vld [vmem:[#allocation2 + $0xb0] sm:$0xff]  ;;  %v260_v7 = vld [vmem:[#allocation2 + $0xb8] sm:$0xff] }
  0xe7   : > { %v585_v28 = vadd.f32 %v6719_v0, %v255_v47  ;;  %v504_v48 = vpop.f32.mrb[1].mxu1  ;;  %v6703_v41 = vpop.f32.mrb[0].mxu0  ;;  %v7913_v0 = vcombine.low %v4256_v52, %v4266_v6  ;;  %v244_v52 = vld [vmem:[#allocation2 + $0x38] sm:$0xff]  ;;  %v262_v42 = vld [vmem:[#allocation2 + $0xc8] sm:$0xff] }
  0xe8   : > { %v583_v32 = vadd.f32 %v504_v48, %v253_v19  ;;  %v6720_v33 = vpop.f32.mrb[2].mxu1  ;;  %v569_v49 = vadd.f32 %v6703_v41, %v239_v1  ;;  %v440_v50 = vpop.f32.mrb[1].mxu0  ;;  %v7915_v19 = vrot.slane %v4274_v55, 4  ;;  %v4292_v1 = vshrl.u32 %v6306_v15, 16  ;;  %v264_v20 = vld [vmem:[#allocation2 + $0xd8] sm:$0xff] }
  0xe9   : > { %617 = vst.msk [vmem:[#allocation2 + $0x90] sm:$0xff] %vm172_vm9, %v585_v28  ;;  %v586_v46 = vadd.f32 %v6720_v33, %v256_v21  ;;  %v507_v40 = vpop.f32.mrb[3].mxu1  ;;  %v567_v62 = vadd.f32 %v440_v50, %v237_v29  ;;  %v6704_v4 = vpop.f32.mrb[2].mxu0  ;;  %v4281_v21 = vshrl.u32 %v7862_v59, 16  ;;  %v6307_v28 = vld [vmem:[%s7127_s25 + $0x34] sm:$0xf] }
  0xea   : > { %615 = vst.msk [vmem:[#allocation2 + $0x80] sm:$0xff] %vm172_vm9, %v583_v32  ;;  %v584_v61 = vadd.f32 %v507_v40, %v254_v54  ;;  %601 = vst.msk [vmem:[#allocation2 + $0x10] sm:$0xff] %vm172_vm9, %v569_v49  ;;  %v570_v63 = vadd.f32 %v6704_v4, %v240_v43  ;;  %v443_v47 = vpop.f32.mrb[3].mxu0  ;;  %v257_v59 = vld [vmem:[#allocation2 + $0xa0] sm:$0xff]  ;;  %v4280_v18 = vsel %vm7191_vm8, %v7915_v19, %v7906_v10  ;;  %v5086_v54 = vrot.slane %v6383_v12, 5  ;;  %v243_v29 = vld [vmem:[#allocation2 + $0x30] sm:$0xff] }
  0xeb   : > { %618 = vst.msk [vmem:[#allocation2 + $0x98] sm:$0xff] %vm172_vm9, %v586_v46  ;;  %599 = vst.msk [vmem:[#allocation2] sm:$0xff] %vm172_vm9, %v567_v62  ;;  %v568_v17 = vadd.f32 %v443_v47, %v238_v51  ;;  %v4283_v48 = vrot.slane %v4281_v21, 4  ;;  %v4295_v32 = vshll.u32 %v6306_v15, 16  ;;  %v7059_v33 = vld [vmem:[%s7127_s25 + $0x84] sm:$0xff]   ;;  %v4294_v44 = vrot.slane %v4292_v1, 4  ;;  %6892 = vmatmul.mubr.msk.bf16.gmra.mrb[100].mxu1 %vm350_vm2, %v6214_v34 }
  0xec   : > { %616 = vst.msk [vmem:[#allocation2 + $0x88] sm:$0xff] %vm172_vm9, %v584_v61  ;;  %602 = vst.msk [vmem:[#allocation2 + $0x18] sm:$0xff] %vm172_vm9, %v570_v63  ;;  %v241_v43 = vld [vmem:[#allocation2 + $0x20] sm:$0xff]  ;;  %v4301_v45 = vshll.u32 %v6307_v28, 16  ;;  %v7060_v40 = vld [vmem:[%s7127_s25 + $0x90] sm:$0xff]   ;;  %v7949_v55 = vsel %vm7184_vm7, %v5085_v30, %v5086_v54  ;;  %v4305_v61 = vshrl.u32 %v6307_v28, 16  ;;  %6922 = vmatmul.mubr.msk.bf16.gmra.mrb[96].mxu0 %vm350_vm2, %v7059_v33  ;;  %6895 = vmatprep.mubr.msk.bf16.mxu1 %vm350_vm2, %v6215_v38 }
  0xed   : > { %600 = vst.msk [vmem:[#allocation2 + $0x8] sm:$0xff] %vm172_vm9, %v568_v17  ;;  %v4284_v26 = vor.u32 %v4283_v48, %v7906_v10  ;;  %v7944_v46 = vld [vmem:[%s7127_s25 + $0x24] sm:$0xe]  ;;  %v4297_v58 = vrot.slane %v4295_v32, 5  ;;  %v242_v15 = vld [vmem:[#allocation2 + $0x28] sm:$0xff]  ;;  %v6446_v63 = vcombine.low %v7938_v16, %v7949_v55  ;;  %v4311_v1 = vshll.u32 %v6308_v31, 16  ;;  %6925 = vmatprep.mubr.msk.bf16.mxu0 %vm350_vm2, %v7060_v40 }
  0xee   : > { %v6723_v2 = vpop.f32.mrb[4].mxu1  ;;  %v6385_v47 = vld [vmem:[%s7127_s25 + $0x28] sm:$0xf]  ;;  %v7956_v22 = vrot.slane %v4301_v45, 5  ;;  %v4307_v54 = vrot.slane %v4305_v61, 4  ;;  %v6430_v32 = vrot.slane %v7944_v46, 9 }
  0xef   : > { %v589_v41 = vadd.f32 %v6723_v2, %v259_v11  ;;  %v520_v8 = vpop.f32.mrb[5].mxu1  ;;  %v6707_v51 = vpop.f32.mrb[4].mxu0  ;;  %v4285_v6 = vrot.slane %v4284_v26, 4  ;;  %v4298_v17 = vor.u32 %v4297_v58, %v4294_v44  ;;  %v6310_v2 = vld [vmem:[%s7127_s25 + $0x40] sm:$0xf]  ;;  %v4313_v33 = vrot.slane %v4311_v1, 5 }
  0xf0   : > { %v587_v49 = vadd.f32 %v520_v8, %v257_v59  ;;  %v6724_v50 = vpop.f32.mrb[6].mxu1  ;;  %v573_v10 = vadd.f32 %v6707_v51, %v243_v29  ;;  %v456_v12 = vpop.f32.mrb[5].mxu0  ;;  %v263_v29 = vld [vmem:[#allocation2 + $0xd0] sm:$0xff]  ;;  %v261_v31 = vld [vmem:[#allocation2 + $0xc0] sm:$0xff]  ;;  %v5093_v8 = vrot.slane %v6386_v23, 5  ;;  %v4319_v44 = vshll.u32 %v6309_v24, 16 }
  0xf1   : > { %621 = vst.msk [vmem:[#allocation2 + $0xb0] sm:$0xff] %vm172_vm9, %v589_v41  ;;  %v590_v62 = vadd.f32 %v6724_v50, %v260_v7  ;;  %v523_v4 = vpop.f32.mrb[7].mxu1  ;;  %v571_v21 = vadd.f32 %v456_v12, %v241_v43  ;;  %v6708_v11 = vpop.f32.mrb[6].mxu0  ;;  %v4290_v28 = vsel %vm7191_vm8, %v4285_v6, %v4289_v25  ;;  %v4299_v25 = vrot.slane %v4298_v17, 4  ;;  %v6311_v34 = vld [vmem:[%s7127_s25 + $0x44] sm:$0x1] }
  0xf2   : > { %619 = vst.msk [vmem:[#allocation2 + $0xa0] sm:$0xff] %vm172_vm9, %v587_v49  ;;  %v588_v19 = vadd.f32 %v523_v4, %v258_v14  ;;  %605 = vst.msk [vmem:[#allocation2 + $0x30] sm:$0xff] %vm172_vm9, %v573_v10  ;;  %v574_v59 = vadd.f32 %v6708_v11, %v244_v52  ;;  %v459_v48 = vpop.f32.mrb[7].mxu0  ;;  %v7968_v7 = vcombine.low %v4280_v18, %v4290_v28  ;;  %v5090_v41 = vrot.slane %v6385_v47, 5  ;;  %v7061_v14 = vld [vmem:[%s7127_s25 + $0x9c] sm:$0xff]   ;;  %v7062_v46 = vld [vmem:[%s7127_s25 + $0xa8] sm:$0xff]  }
  0xf3   : > { %622 = vst.msk [vmem:[#allocation2 + $0xb8] sm:$0xff] %vm172_vm9, %v590_v62  ;;  %603 = vst.msk [vmem:[#allocation2 + $0x20] sm:$0xff] %vm172_vm9, %v571_v21  ;;  %v572_v30 = vadd.f32 %v459_v48, %v242_v15  ;;  %v4308_v18 = vor.u32 %v4307_v54, %v7956_v22  ;;  %v4304_v13 = vsel %vm7191_vm8, %v4299_v25, %v7956_v22  ;;  %v4316_v43 = vshrl.u32 %v6309_v24, 16  ;;  %v247_v51 = vld [vmem:[#allocation2 + $0x50] sm:$0xff]  ;;  %v245_v12 = vld [vmem:[#allocation2 + $0x40] sm:$0xff] }
  0xf4   : > { %620 = vst.msk [vmem:[#allocation2 + $0xa8] sm:$0xff] %vm172_vm9, %v588_v19  ;;  %606 = vst.msk [vmem:[#allocation2 + $0x38] sm:$0xff] %vm172_vm9, %v574_v59  ;;  %v4325_v45 = vshll.u32 %v6310_v2, 16  ;;  %v7991_v49 = vsel %vm7184_vm7, %v6430_v32, %v5090_v41  ;;  %v5092_v50 = vrot.slane %v5090_v41, 4  ;;  %v7994_v52 = vld [vmem:[%s7127_s25 + $0x30] sm:$0xe]  ;;  %6926 = vmatmul.mubr.msk.bf16.gmra.mrb[100].mxu0 %vm350_vm2, %v7061_v14  ;;  %6896 = vmatmul.mubr.msk.bf16.gmra.mrb[104].mxu1 %vm350_vm2, %v6216_v27 }
  0xf5   : > { %604 = vst.msk [vmem:[#allocation2 + $0x28] sm:$0xff] %vm172_vm9, %v572_v30  ;;  %v4309_v38 = vrot.slane %v4308_v18, 4  ;;  %v4318_v62 = vrot.slane %v4316_v43, 4  ;;  %v4321_v4 = vrot.slane %v4319_v44, 5  ;;  %v6388_v15 = vld [vmem:[%s7127_s25 + $0x34] sm:$0xf]  ;;  %6929 = vmatprep.mubr.msk.bf16.mxu0 %vm350_vm2, %v7062_v46  ;;  %6899 = vmatprep.mubr.msk.bf16.mxu1 %vm350_vm2, %v6217_v37 }
  0xf6   : > { %v6727_v26 = vpop.f32.mrb[8].mxu1  ;;  %v7996_v6 = vrot.slane %v4325_v45, 5  ;;  %v8004_v11 = vsel %vm7184_vm7, %v5092_v50, %v5093_v8  ;;  %v4329_v17 = vshrl.u32 %v6310_v2, 16  ;;  %v248_v23 = vld [vmem:[#allocation2 + $0x58] sm:$0xff]  ;;  %v246_v24 = vld [vmem:[#allocation2 + $0x48] sm:$0xff]  ;;  %v4335_v25 = vshll.u32 %v6311_v34, 16 }
  0xf7   : > { %v593_v40 = vadd.f32 %v6727_v26, %v263_v29  ;;  %v536_v35 = vpop.f32.mrb[9].mxu1  ;;  %v6711_v10 = vpop.f32.mrb[8].mxu0  ;;  %v4314_v21 = vsel %vm7191_vm8, %v4309_v38, %v4313_v33  ;;  %v6447_v48 = vcombine.low %v7991_v49, %v8004_v11  ;;  %v4322_v54 = vor.u32 %v4321_v4, %v4318_v62  ;;  %v6389_v29 = vld [vmem:[%s7127_s25 + $0x38] sm:$0x1]  ;;  %v6312_v30 = vld [vmem:[%s7127_s25 + $0x48] sm:$0xf] }
  0xf8   : > { %v591_v58 = vadd.f32 %v536_v35, %v261_v31  ;;  %v6728_v61 = vpop.f32.mrb[10].mxu1  ;;  %v472_v22 = vpop.f32.mrb[9].mxu0  ;;  %v8007_v59 = vcombine.low %v4304_v13, %v4314_v21  ;;  %v4331_v2 = vrot.slane %v4329_v17, 4  ;;  %v577_v32 = vadd.f32 %v6711_v10, %v247_v51  ;;  %v6313_v33 = vld [vmem:[%s7127_s25 + $0x4c] sm:$0xf]  ;;  %v267_v8 = vld [vmem:[#allocation2 + $0xf0] sm:$0xff] }
  0xf9   : > { %625 = vst.msk [vmem:[#allocation2 + $0xd0] sm:$0xff] %vm172_vm9, %v593_v40  ;;  %v594_v47 = vadd.f32 %v6728_v61, %v264_v20  ;;  %v539_v19 = vpop.f32.mrb[11].mxu1  ;;  %v6712_v1 = vpop.f32.mrb[10].mxu0  ;;  %v575_v31 = vadd.f32 %v472_v22, %v245_v12  ;;  %v4323_v41 = vrot.slane %v4322_v54, 4  ;;  %v6431_v13 = vrot.slane %v7994_v52, 9  ;;  %v7063_v14 = vld [vmem:[%s7127_s25 + $0xb4] sm:$0xff]  }
  0xfa   : > { %623 = vst.msk [vmem:[#allocation2 + $0xc0] sm:$0xff] %vm172_vm9, %v591_v58  ;;  %v592_v28 = vadd.f32 %v539_v19, %v262_v42  ;;  %v475_v18 = vpop.f32.mrb[11].mxu0  ;;  %v578_v26 = vadd.f32 %v6712_v1, %v248_v23  ;;  %v4332_v34 = vor.u32 %v4331_v2, %v7996_v6  ;;  %v4337_v43 = vrot.slane %v4335_v25, 5  ;;  %609 = vst.msk [vmem:[#allocation2 + $0x50] sm:$0xff] %vm172_vm9, %v577_v32  ;;  %v265_v44 = vld [vmem:[#allocation2 + $0xe0] sm:$0xff]  ;;  %v268_v45 = vld [vmem:[#allocation2 + $0xf8] sm:$0xff] }
  0xfb   : > { %626 = vst.msk [vmem:[#allocation2 + $0xd8] sm:$0xff] %vm172_vm9, %v594_v47  ;;  %v576_v20 = vadd.f32 %v475_v18, %v246_v24  ;;  %607 = vst.msk [vmem:[#allocation2 + $0x40] sm:$0xff] %vm172_vm9, %v575_v31  ;;  %v5097_v46 = vrot.slane %v6388_v15, 5  ;;  %v5100_v40 = vrot.slane %v6389_v29, 5  ;;  %v4328_v36 = vsel %vm7191_vm8, %v4323_v41, %v7996_v6  ;;  %v6314_v27 = vld [vmem:[%s7127_s25 + $0x50] sm:$0x1] }
  0xfc   : > { %624 = vst.msk [vmem:[#allocation2 + $0xc8] sm:$0xff] %vm172_vm9, %v592_v28  ;;  %610 = vst.msk [vmem:[#allocation2 + $0x58] sm:$0xff] %vm172_vm9, %v578_v26  ;;  %v4340_v35 = vshrl.u32 %v6312_v30, 16  ;;  %v4343_v42 = vshll.u32 %v6312_v30, 16  ;;  %v4349_v38 = vshll.u32 %v6313_v33, 16  ;;  %v4333_v5 = vrot.slane %v4332_v34, 4  ;;  %6930 = vmatmul.mubr.msk.bf16.gmra.mrb[104].mxu0 %vm350_vm2, %v7063_v14  ;;  %6900 = vmatmul.mubr.msk.bf16.gmra.mrb[108].mxu1 %vm350_vm2, %v6218_v39 }
  0xfd   : > { %608 = vst.msk [vmem:[#allocation2 + $0x48] sm:$0xff] %vm172_vm9, %v576_v20  ;;  %v6390_v50 = vld [vmem:[%s7127_s25 + $0x3c] sm:$0xe]  ;;  %v6391_v51 = vld [vmem:[%s7127_s25 + $0x40] sm:$0xf]  ;;  %v266_v52 = vld [vmem:[#allocation2 + $0xe8] sm:$0xff]  ;;  %v8041_v58 = vsel %vm7184_vm7, %v6431_v13, %v5097_v46  ;;  %6939 = vmatprep.mubr.msk.bf16.mxu1 %vm350_vm2, %v7913_v0 }
  0xfe   : > { %v6731_v53 = vpop.f32.mrb[12].mxu1  ;;  %v5099_v61 = vrot.slane %v5097_v46, 4  ;;  %v6392_v62 = vld [vmem:[%s7127_s25 + $0x44] sm:$0x1]  ;;  %v4342_v12 = vrot.slane %v4340_v35, 4  ;;  %v4345_v15 = vrot.slane %v4343_v42, 5  ;;  %v4338_v21 = vsel %vm7191_vm8, %v4333_v5, %v4337_v43 }
  0xff   : > { %v597_v60 = vadd.f32 %v6731_v53, %v267_v8  ;;  %v552_v37 = vpop.f32.mrb[13].mxu1  ;;  %v7064_v4 = vld [vmem:[%s7127_s25 + $0xc0] sm:$0xff]   ;;  %v8045_v47 = vrot.slane %v4349_v38, 5  ;;  %v6715_v19 = vpop.f32.mrb[12].mxu0  ;;  %v4353_v24 = vshrl.u32 %v6313_v33, 16  ;;  %v8055_v1 = vcombine.low %v4328_v36, %v4338_v21  ;;  %v7065_v36 = vld [vmem:[%s7127_s25 + $0xcc] sm:$0xff]  }
 0x100   : > { %v595_v6 = vadd.f32 %v552_v37, %v265_v44  ;;  %v6732_v10 = vpop.f32.mrb[14].mxu1  ;;  %v8052_v23 = vsel %vm7184_vm7, %v5099_v61, %v5100_v40  ;;  %v6315_v28 = vld [vmem:[%s7127_s25 + $0x54] sm:$0xf]  ;;  %v488_v54 = vpop.f32.mrb[13].mxu0  ;;  %v4346_v2 = vor.u32 %v4345_v15, %v4342_v12  ;;  %v6316_v25 = vld [vmem:[%s7127_s25 + $0x58] sm:$0xf]  ;;  %6933 = vmatprep.mubr.msk.bf16.mxu0 %vm350_vm2, %v7064_v4 }
 0x101   : > { %629 = vst.msk [vmem:[#allocation2 + $0xf0] sm:$0xff] %vm172_vm9, %v597_v60  ;;  %v598_v17 = vadd.f32 %v6732_v10, %v268_v45  ;;  %v555_v22 = vpop.f32.mrb[15].mxu1  ;;  %v6448_v30 = vcombine.low %v8041_v58, %v8052_v23  ;;  %v6716_v32 = vpop.f32.mrb[14].mxu0  ;;  %v4355_v31 = vrot.slane %v4353_v24, 4  ;;  %v4359_v18 = vshll.u32 %v6314_v27, 16  ;;  %v251_v40 = vld [vmem:[#allocation2 + $0x70] sm:$0xff] }
 0x102   : > { %627 = vst.msk [vmem:[#allocation2 + $0xe0] sm:$0xff] %vm172_vm9, %v595_v6  ;;  %v596_v29 = vadd.f32 %v555_v22, %v266_v52  ;;  %v6432_v33 = vrot.slane %v6390_v50, 9  ;;  %v5104_v41 = vrot.slane %v6391_v51, 5  ;;  %v491_v8 = vpop.f32.mrb[15].mxu0  ;;  %v4347_v26 = vrot.slane %v4346_v2, 4  ;;  %v249_v27 = vld [vmem:[#allocation2 + $0x60] sm:$0xff] }
 0x103   : > { %630 = vst.msk [vmem:[#allocation2 + $0xf8] sm:$0xff] %vm172_vm9, %v598_v17  ;;  %v5107_v20 = vrot.slane %v6392_v62, 5  ;;  %v6317_v13 = vld [vmem:[%s7127_s25 + $0x5c] sm:$0x1]  ;;  %v4364_v34 = vshrl.u32 %v6315_v28, 16  ;;  %v4367_v43 = vshll.u32 %v6315_v28, 16  ;;  %v4356_v14 = vor.u32 %v4355_v31, %v8045_v47 }
 0x104   : > { %628 = vst.msk [vmem:[#allocation2 + $0xe8] sm:$0xff] %vm172_vm9, %v596_v29  ;;  %v4361_v44 = vrot.slane %v4359_v18, 5  ;;  %v8073_v45 = vsel %vm7184_vm7, %v6432_v33, %v5104_v41  ;;  %v5106_v46 = vrot.slane %v5104_v41, 4  ;;  %v4352_v53 = vsel %vm7191_vm8, %v4347_v26, %v8045_v47  ;;  %v1068_v5 = vld [vmem:[#allocation2 + $0x10] sm:$0xff]  ;;  %v252_v60 = vld [vmem:[#allocation2 + $0x78] sm:$0xff]  ;;  %v250_v37 = vld [vmem:[#allocation2 + $0x68] sm:$0xff]  ;;  %6934 = vmatmul.mubr.msk.bf16.gmra.mrb[108].mxu0 %vm350_vm2, %v7065_v36  ;;  %6940 = vmatmul.mubr.msk.bf16.vlgmr.msra.gmra.mrb[112].mxu1 %vm350_vm2, %v7968_v7 }
 0x105   : > { %v4366_v3 = vrot.slane %v4364_v34, 4  ;;  %v4369_v9 = vrot.slane %v4367_v43, 5  ;;  %v4373_v39 = vshll.u32 %v6316_v25, 16  ;;  %v4357_v42 = vrot.slane %v4356_v14, 4  ;;  %v1066_v6 = vld [vmem:[#allocation2] sm:$0xff]  ;;  %v1069_v10 = vld [vmem:[#allocation2 + $0x18] sm:$0xff]  ;;  %6973 = vmatprep.mubr.msk.bf16.mxu0 %vm350_vm2, %v6446_v63  ;;  %6943 = vmatprep.mubr.msk.bf16.mxu1 %vm350_vm2, %v8007_v59 }
 0x106   : > { %v6737_v35 = vpop.f32.mrb[16].mxu1  ;;  %v8083_v38 = vsel %vm7184_vm7, %v5106_v46, %v5107_v20  ;;  %v4377_v50 = vshrl.u32 %v6316_v25, 16  ;;  %v4383_v51 = vshll.u32 %v6317_v13, 16  ;;  %v581_v4 = vadd.f32 %v6715_v19, %v251_v40  ;;  %v6393_v15 = vld [vmem:[%s7127_s25 + $0x48] sm:$0xe]  ;;  %v1072_v23 = vld [vmem:[#allocation2 + $0x30] sm:$0xff] }
 0x107   : > { %v1233_v0 = vpop.f32.mrb[17].mxu1  ;;  %v6449_v52 = vcombine.low %v8073_v45, %v8083_v38  ;;  %v4370_v61 = vor.u32 %v4369_v9, %v4366_v3  ;;  %v8087_v62 = vrot.slane %v4373_v39, 5  ;;  %v8090_v47 = vpop.f32.mrb[16].mxu0  ;;  %v4362_v21 = vsel %vm7191_vm8, %v4357_v42, %v4361_v44  ;;  %v6394_v29 = vld [vmem:[%s7127_s25 + $0x4c] sm:$0xf] }
 0x108   : > { %v6738_v12 = vpop.f32.mrb[18].mxu1  ;;  %v4379_v17 = vrot.slane %v4377_v50, 4  ;;  %v4385_v22 = vrot.slane %v4383_v51, 5  ;;  %v579_v24 = vadd.f32 %v488_v54, %v249_v27  ;;  %v8095_v2 = vpop.f32.mrb[17].mxu0  ;;  %v8097_v19 = vcombine.low %v4352_v53, %v4362_v21  ;;  %613 = vst.msk [vmem:[#allocation2 + $0x70] sm:$0xff] %vm172_vm9, %v581_v4  ;;  %v1067_v43 = vld [vmem:[#allocation2 + $0x8] sm:$0xff] }
 0x109   : > { %v1236_v28 = vpop.f32.mrb[19].mxu1  ;;  %v4371_v25 = vrot.slane %v4370_v61, 4  ;;  %v1362_v31 = vadd.f32 %v6737_v35, %v1068_v5  ;;  %v582_v18 = vadd.f32 %v6716_v32, %v252_v60  ;;  %v6395_v33 = vld [vmem:[%s7127_s25 + $0x50] sm:$0x1]  ;;  %v6318_v41 = vld [vmem:[%s7127_s25 + $0x60] sm:$0xf]  ;;  %v1360_v20 = vadd.f32 %v1233_v0, %v1066_v6 }
 0x10a   : > { %v8102_v26 = vpop.f32.mrb[18].mxu0  ;;  %v4380_v54 = vor.u32 %v4379_v17, %v8087_v62  ;;  %611 = vst.msk [vmem:[#allocation2 + $0x60] sm:$0xff] %vm172_vm9, %v579_v24  ;;  %v580_v13 = vadd.f32 %v491_v8, %v250_v37  ;;  %v1363_v34 = vadd.f32 %v6738_v12, %v1069_v10  ;;  %v6319_v14 = vld [vmem:[%s7127_s25 + $0x64] sm:$0xf]  ;;  %v1361_v8 = vadd.f32 %v1236_v28, %v1067_v43  ;;  %v6320_v36 = vld [vmem:[%s7127_s25 + $0x68] sm:$0x1] }
 0x10b   : > { %v8108_v44 = vpop.f32.mrb[19].mxu0  ;;  %v4376_v32 = vsel %vm7191_vm8, %v4371_v25, %v8087_v62  ;;  %1394 = vst.msk [vmem:[#allocation2 + $0x10] sm:$0xff] %vm172_vm9, %v1362_v31  ;;  %614 = vst.msk [vmem:[#allocation2 + $0x78] sm:$0xff] %vm172_vm9, %v582_v18  ;;  %v6433_v46 = vrot.slane %v6393_v15, 9  ;;  %v5111_v40 = vrot.slane %v6394_v29, 5  ;;  %v5114_v55 = vrot.slane %v6395_v33, 5 }
 0x10c   : > { %v6396_v53 = vld [vmem:[%s7127_s25 + $0x54] sm:$0xe]  ;;  %v4381_v16 = vrot.slane %v4380_v54, 4  ;;  %1392 = vst.msk [vmem:[#allocation2] sm:$0xff] %vm172_vm9, %v1360_v20  ;;  %612 = vst.msk [vmem:[#allocation2 + $0x68] sm:$0xff] %vm172_vm9, %v580_v13  ;;  %v4388_v63 = vshrl.u32 %v6318_v41, 16  ;;  %6974 = vmatmul.mubr.msk.bf16.vlgmr.msra.gmra.mrb[112].mxu0 %vm350_vm2, %v6447_v48  ;;  %6944 = vmatmul.mubr.msk.bf16.gmra.mrb[116].mxu1 %vm350_vm2, %v8055_v1 }
 0x10d   : > { %1395 = vst.msk [vmem:[#allocation2 + $0x18] sm:$0xff] %vm172_vm9, %v1363_v34  ;;  %v4391_v3 = vshll.u32 %v6318_v41, 16  ;;  %v6397_v9 = vld [vmem:[%s7127_s25 + $0x58] sm:$0xf]  ;;  %1393 = vst.msk [vmem:[#allocation2 + $0x8] sm:$0xff] %vm172_vm9, %v1361_v8  ;;  %v8132_v7 = vsel %vm7184_vm7, %v6433_v46, %v5111_v40  ;;  %v5113_v39 = vrot.slane %v5111_v40, 4  ;;  %6977 = vmatprep.mubr.msk.bf16.mxu0 %vm350_vm2, %v6448_v30  ;;  %6947 = vmatprep.mubr.msk.bf16.mxu1 %vm350_vm2, %v8097_v19 }
 0x10e   : > { %v4397_v27 = vshll.u32 %v6319_v14, 16  ;;  %v4401_v35 = vshrl.u32 %v6319_v14, 16  ;;  %v6398_v42 = vld [vmem:[%s7127_s25 + $0x5c] sm:$0x1]  ;;  %v4386_v50 = vsel %vm7191_vm8, %v4381_v16, %v4385_v22  ;;  %v4390_v51 = vrot.slane %v4388_v63, 4  ;;  %v6741_v59 = vpop.f32.mrb[20].mxu1 }
 0x10f   : > { %v4393_v5 = vrot.slane %v4391_v3, 5  ;;  %v4407_v60 = vshll.u32 %v6320_v36, 16  ;;  %v6321_v0 = vld [vmem:[%s7127_s25 + $0x6c] sm:$0xf]  ;;  %v8138_v37 = vcombine.low %v4376_v32, %v4386_v50  ;;  %v8142_v61 = vsel %vm7184_vm7, %v5113_v39, %v5114_v55  ;;  %v6322_v6 = vld [vmem:[%s7127_s25 + $0x70] sm:$0xf] }
 0x110   : > { %v4399_v62 = vrot.slane %v4397_v27, 5  ;;  %v4403_v4 = vrot.slane %v4401_v35, 4  ;;  %v1249_v10 = vpop.f32.mrb[21].mxu1  ;;  %v6450_v12 = vcombine.low %v8132_v7, %v8142_v61  ;;  %v6434_v17 = vrot.slane %v6396_v53, 9  ;;  %v6323_v25 = vld [vmem:[%s7127_s25 + $0x74] sm:$0x1] }
 0x111   : > { %v4394_v15 = vor.u32 %v4393_v5, %v4390_v51  ;;  %v4409_v21 = vrot.slane %v4407_v60, 5  ;;  %v6742_v22 = vpop.f32.mrb[22].mxu1  ;;  %v5118_v28 = vrot.slane %v6397_v9, 5  ;;  %v5121_v29 = vrot.slane %v6398_v42, 5  ;;  %v8160_v49 = vpop.f32.mrb[20].mxu0  ;;  %v1070_v16 = vld [vmem:[#allocation2 + $0x20] sm:$0xff] }
 0x112   : > { %v4404_v24 = vor.u32 %v4403_v4, %v4399_v62  ;;  %v4412_v31 = vshrl.u32 %v6321_v0, 16  ;;  %v1252_v18 = vpop.f32.mrb[23].mxu1  ;;  %v4415_v41 = vshll.u32 %v6321_v0, 16  ;;  %v4421_v54 = vshll.u32 %v6322_v6, 16  ;;  %v1637_v13 = vld [vmem:[#allocation2 + $0x10] sm:$0xff]  ;;  %v8166_v46 = vpop.f32.mrb[21].mxu0 }
 0x113   : > { %v4395_v33 = vrot.slane %v4394_v15, 4  ;;  %v4425_v20 = vshrl.u32 %v6322_v6, 16  ;;  %v8158_v43 = vsel %vm7184_vm7, %v6434_v17, %v5118_v28  ;;  %v5120_v14 = vrot.slane %v5118_v28, 4  ;;  %v1635_v30 = vld [vmem:[#allocation2] sm:$0xff]  ;;  %v1073_v63 = vld [vmem:[#allocation2 + $0x38] sm:$0xff]  ;;  %v8177_v3 = vpop.f32.mrb[22].mxu0 }
 0x114   : > { %v4405_v34 = vrot.slane %v4404_v24, 4  ;;  %v4414_v32 = vrot.slane %v4412_v31, 4  ;;  %v4417_v48 = vrot.slane %v4415_v41, 5  ;;  %v4423_v8 = vrot.slane %v4421_v54, 5  ;;  %v1638_v55 = vld [vmem:[#allocation2 + $0x18] sm:$0xff]  ;;  %v1636_v35 = vld [vmem:[#allocation2 + $0x8] sm:$0xff]  ;;  %6978 = vmatmul.mubr.msk.bf16.gmra.mrb[116].mxu0 %vm350_vm2, %v6449_v52  ;;  %6948 = vmatmul.mubr.msk.bf16.gmra.mrb[120].mxu1 %vm350_vm2, %v8138_v37 }
 0x115   : > { %v4400_v11 = vsel %vm7191_vm8, %v4395_v33, %v4399_v62  ;;  %v4427_v58 = vrot.slane %v4425_v20, 4  ;;  %v8174_v1 = vsel %vm7184_vm7, %v5120_v14, %v5121_v29  ;;  %v4431_v36 = vshll.u32 %v6323_v25, 16  ;;  %v6399_v42 = vld [vmem:[%s7127_s25 + $0x60] sm:$0xe]  ;;  %v6400_v50 = vld [vmem:[%s7127_s25 + $0x64] sm:$0xf]  ;;  %6981 = vmatprep.mubr.msk.bf16.mxu0 %vm350_vm2, %v6450_v12 }
 0x116   : > { %v4410_v40 = vsel %vm7191_vm8, %v4405_v34, %v4409_v21  ;;  %v1931_v53 = vadd.f32 %v8090_v47, %v1637_v13  ;;  %v6451_v19 = vcombine.low %v8158_v43, %v8174_v1  ;;  %v4418_v39 = vor.u32 %v4417_v48, %v4414_v32  ;;  %v8183_v51 = vpop.f32.mrb[23].mxu0  ;;  %v1071_v62 = vld [vmem:[#allocation2 + $0x28] sm:$0xff]  ;;  %v6324_v6 = vld [vmem:[%s7127_s25 + $0x78] sm:$0xf]  ;;  %v6325_v28 = vld [vmem:[%s7127_s25 + $0x7c] sm:$0xf] }
 0x117   : > { %v6355_v9 = vcombine.low %v4400_v11, %v4410_v40  ;;  %v4428_v27 = vor.u32 %v4427_v58, %v4423_v8  ;;  %v4433_v47 = vrot.slane %v4431_v36, 5  ;;  %v1366_v5 = vadd.f32 %v6741_v59, %v1072_v23  ;;  %v6401_v4 = vld [vmem:[%s7127_s25 + $0x68] sm:$0x1]  ;;  %v6326_v29 = vld [vmem:[%s7127_s25 + $0x80] sm:$0x1]  ;;  %v8209_v54 = vpop.f32.mrb[24].mxu1 }
 0x118   : > { %1963 = vst.msk [vmem:[#allocation2 + $0x10] sm:$0xff] %vm172_vm9, %v1931_v53  ;;  %v1929_v60 = vadd.f32 %v8095_v2, %v1635_v30  ;;  %v1364_v0 = vadd.f32 %v1249_v10, %v1070_v16  ;;  %v4419_v15 = vrot.slane %v4418_v39, 4  ;;  %v1932_v17 = vadd.f32 %v8102_v26, %v1638_v55  ;;  %v6402_v31 = vld [vmem:[%s7127_s25 + $0x6c] sm:$0xe]  ;;  %v6403_v33 = vld [vmem:[%s7127_s25 + $0x70] sm:$0xf] }
 0x119   : > { %v4429_v21 = vrot.slane %v4428_v27, 4  ;;  %v1367_v24 = vadd.f32 %v6742_v22, %v1073_v63  ;;  %1398 = vst.msk [vmem:[#allocation2 + $0x30] sm:$0xff] %vm172_vm9, %v1366_v5  ;;  %v1930_v2 = vadd.f32 %v8108_v44, %v1636_v35  ;;  %v1365_v59 = vadd.f32 %v1252_v18, %v1071_v62  ;;  %v6404_v41 = vld [vmem:[%s7127_s25 + $0x74] sm:$0x1]  ;;  %v6327_v13 = vld [vmem:[%s7127_s25 + $0x84] sm:$0xf]  ;;  %6951 = vmatprep.mubr.msk.bf16.mxu1 %vm350_vm2, %v6355_v9 }
 0x11a   : > { %1961 = vst.msk [vmem:[#allocation2] sm:$0xff] %vm172_vm9, %v1929_v60  ;;  %1396 = vst.msk [vmem:[#allocation2 + $0x20] sm:$0xff] %vm172_vm9, %v1364_v0  ;;  %v6435_v10 = vrot.slane %v6399_v42, 9  ;;  %v5125_v25 = vrot.slane %v6400_v50, 5  ;;  %v4424_v26 = vsel %vm7191_vm8, %v4419_v15, %v4423_v8  ;;  %v5128_v44 = vrot.slane %v6401_v4, 5  ;;  %v1265_v34 = vpop.f32.mrb[25].mxu1 }
 0x11b   : > { %v4434_v22 = vsel %vm7191_vm8, %v4429_v21, %v4433_v47  ;;  %1964 = vst.msk [vmem:[#allocation2 + $0x18] sm:$0xff] %vm172_vm9, %v1932_v17  ;;  %1399 = vst.msk [vmem:[#allocation2 + $0x38] sm:$0xff] %vm172_vm9, %v1367_v24  ;;  %v4436_v18 = vshrl.u32 %v6324_v6, 16  ;;  %v4439_v20 = vshll.u32 %v6324_v6, 16  ;;  %v4445_v7 = vshll.u32 %v6325_v28, 16  ;;  %v8222_v32 = vpop.f32.mrb[26].mxu1 }
 0x11c   : > { %v6356_v45 = vcombine.low %v4424_v26, %v4434_v22  ;;  %1962 = vst.msk [vmem:[#allocation2 + $0x8] sm:$0xff] %vm172_vm9, %v1930_v2  ;;  %1397 = vst.msk [vmem:[#allocation2 + $0x28] sm:$0xff] %vm172_vm9, %v1365_v59  ;;  %v5126_v38 = vsel %vm7184_vm7, %v6435_v10, %v5125_v25  ;;  %v5127_v52 = vrot.slane %v5125_v25, 4  ;;  %v4449_v61 = vshrl.u32 %v6325_v28, 16  ;;  %v6328_v23 = vld [vmem:[%s7127_s25 + $0x88] sm:$0xf]  ;;  %6982 = vmatmul.mubr.msk.bf16.gmra.mrb[120].mxu0 %vm350_vm2, %v6451_v19 }
 0x11d   : > { %v4438_v14 = vrot.slane %v4436_v18, 4  ;;  %v4455_v12 = vshll.u32 %v6326_v29, 16  ;;  %v4441_v48 = vrot.slane %v4439_v20, 5  ;;  %v6436_v8 = vrot.slane %v6402_v31, 9  ;;  %v8228_v30 = vpop.f32.mrb[27].mxu1  ;;  %v8235_v27 = vpop.f32.mrb[24].mxu0 }
 0x11e   : > { %v5129_v11 = vsel %vm7184_vm7, %v5127_v52, %v5128_v44  ;;  %v5132_v58 = vrot.slane %v6403_v33, 5  ;;  %v4447_v37 = vrot.slane %v4445_v7, 5  ;;  %v4451_v36 = vrot.slane %v4449_v61, 4  ;;  %v6329_v16 = vld [vmem:[%s7127_s25 + $0x8c] sm:$0x1]  ;;  %v8237_v5 = vpop.f32.mrb[25].mxu0  ;;  %6952 = vmatmul.mubr.msk.bf16.gmra.mrb[124].mxu1 %vm350_vm2, %v6356_v45 }
 0x11f   : > { %v6452_v40 = vcombine.low %v5126_v38, %v5129_v11  ;;  %v4457_v53 = vrot.slane %v4455_v12, 5  ;;  %v4442_v55 = vor.u32 %v4441_v48, %v4438_v14  ;;  %v5135_v39 = vrot.slane %v6404_v41, 5  ;;  %v8243_v15 = vpop.f32.mrb[26].mxu0  ;;  %v1076_v29 = vld [vmem:[#allocation2 + $0x50] sm:$0xff]  ;;  %v1074_v25 = vld [vmem:[#allocation2 + $0x40] sm:$0xff]  ;;  %v1077_v41 = vld [vmem:[#allocation2 + $0x58] sm:$0xff] }
 0x120   : > { %v8233_v63 = vsel %vm7184_vm7, %v6436_v8, %v5132_v58  ;;  %v5134_v9 = vrot.slane %v5132_v58, 4  ;;  %v4452_v35 = vor.u32 %v4451_v36, %v4447_v37  ;;  %v4460_v42 = vshrl.u32 %v6327_v13, 16  ;;  %v1641_v6 = vld [vmem:[#allocation2 + $0x30] sm:$0xff]  ;;  %v8251_v59 = vpop.f32.mrb[27].mxu0  ;;  %v6405_v38 = vld [vmem:[%s7127_s25 + $0x78] sm:$0xe] }
 0x121   : > { %v4463_v50 = vshll.u32 %v6327_v13, 16  ;;  %v4469_v47 = vshll.u32 %v6328_v23, 16  ;;  %v4443_v60 = vrot.slane %v4442_v55, 4  ;;  %v4473_v62 = vshrl.u32 %v6328_v23, 16  ;;  %v1639_v2 = vld [vmem:[#allocation2 + $0x20] sm:$0xff]  ;;  %6985 = vmatprep.mubr.msk.bf16.mxu0 %vm350_vm2, %v6452_v40  ;;  %v1075_v61 = vld [vmem:[#allocation2 + $0x48] sm:$0xff] }
 0x122   : > { %v8241_v0 = vsel %vm7184_vm7, %v5134_v9, %v5135_v39  ;;  %v4479_v4 = vshll.u32 %v6329_v16, 16  ;;  %v4453_v21 = vrot.slane %v4452_v35, 4  ;;  %v4462_v24 = vrot.slane %v4460_v42, 4  ;;  %v1642_v31 = vld [vmem:[#allocation2 + $0x38] sm:$0xff]  ;;  %v6407_v45 = vld [vmem:[%s7127_s25 + $0x80] sm:$0x1] }
 0x123   : > { %v6453_v17 = vcombine.low %v8233_v63, %v8241_v0  ;;  %v4465_v28 = vrot.slane %v4463_v50, 5  ;;  %v4448_v10 = vsel %vm7191_vm8, %v4443_v60, %v4447_v37  ;;  %v4471_v43 = vrot.slane %v4469_v47, 5  ;;  %v1640_v33 = vld [vmem:[#allocation2 + $0x28] sm:$0xff]  ;;  %v6406_v52 = vld [vmem:[%s7127_s25 + $0x7c] sm:$0xf]  ;;  %v8273_v23 = vpop.f32.mrb[28].mxu1 }
 0x124   : > { %v4475_v1 = vrot.slane %v4473_v62, 4  ;;  %v4481_v19 = vrot.slane %v4479_v4, 5  ;;  %v4458_v26 = vsel %vm7191_vm8, %v4453_v21, %v4457_v53  ;;  %v1935_v44 = vadd.f32 %v8160_v49, %v1641_v6  ;;  %v6330_v12 = vld [vmem:[%s7127_s25 + $0x90] sm:$0xf]  ;;  %v6331_v8 = vld [vmem:[%s7127_s25 + $0x94] sm:$0xf] }
 0x125   : > { %v4466_v22 = vor.u32 %v4465_v28, %v4462_v24  ;;  %v1370_v18 = vadd.f32 %v8209_v54, %v1076_v29  ;;  %v6357_v20 = vcombine.low %v4448_v10, %v4458_v26  ;;  %v1933_v14 = vadd.f32 %v8166_v46, %v1639_v2  ;;  %v6332_v58 = vld [vmem:[%s7127_s25 + $0x98] sm:$0x1]  ;;  %v6408_v37 = vld [vmem:[%s7127_s25 + $0x84] sm:$0xe]  ;;  %v6410_v50 = vld [vmem:[%s7127_s25 + $0x8c] sm:$0x1]  ;;  %6986 = vmatmul.mubr.msk.bf16.gmra.mrb[124].mxu0 %vm350_vm2, %v6453_v17 }
 0x126   : > { %v4476_v13 = vor.u32 %v4475_v1, %v4471_v43  ;;  %v1368_v7 = vadd.f32 %v1265_v34, %v1074_v25  ;;  %1967 = vst.msk [vmem:[#allocation2 + $0x30] sm:$0xff] %vm172_vm9, %v1935_v44  ;;  %v1936_v49 = vadd.f32 %v8177_v3, %v1642_v31  ;;  %v1371_v54 = vadd.f32 %v8222_v32, %v1077_v41  ;;  %v8280_v32 = vpop.f32.mrb[29].mxu1  ;;  %v6333_v21 = vld [vmem:[%s7127_s25 + $0x9c] sm:$0xf]  ;;  %v6334_v10 = vld [vmem:[%s7127_s25 + $0xa0] sm:$0xf] }
 0x127   : > { %v4467_v11 = vrot.slane %v4466_v22, 4  ;;  %1402 = vst.msk [vmem:[#allocation2 + $0x50] sm:$0xff] %vm172_vm9, %v1370_v18  ;;  %v1934_v48 = vadd.f32 %v8183_v51, %v1640_v33  ;;  %6955 = vmatprep.mubr.msk.bf16.mxu1 %vm350_vm2, %v6357_v20  ;;  %1965 = vst.msk [vmem:[#allocation2 + $0x20] sm:$0xff] %vm172_vm9, %v1933_v14  ;;  %v1369_v34 = vadd.f32 %v8228_v30, %v1075_v61  ;;  %v6437_v40 = vrot.slane %v6405_v38, 9  ;;  %v6409_v30 = vld [vmem:[%s7127_s25 + $0x88] sm:$0xf] }
 0x128   : > { %v4477_v46 = vrot.slane %v4476_v13, 4  ;;  %1400 = vst.msk [vmem:[#allocation2 + $0x40] sm:$0xff] %vm172_vm9, %v1368_v7  ;;  %v5139_v3 = vrot.slane %v6406_v52, 5  ;;  %1968 = vst.msk [vmem:[#allocation2 + $0x38] sm:$0xff] %vm172_vm9, %v1936_v49  ;;  %v5142_v36 = vrot.slane %v6407_v45, 5  ;;  %v4484_v53 = vshrl.u32 %v6330_v12, 16 }
 0x129   : > { %v4472_v51 = vsel %vm7191_vm8, %v4467_v11, %v4471_v43  ;;  %1403 = vst.msk [vmem:[#allocation2 + $0x58] sm:$0xff] %vm172_vm9, %v1371_v54  ;;  %1966 = vst.msk [vmem:[#allocation2 + $0x28] sm:$0xff] %vm172_vm9, %v1934_v48  ;;  %v4487_v16 = vshll.u32 %v6330_v12, 16  ;;  %v8288_v55 = vpop.f32.mrb[30].mxu1  ;;  %v4493_v42 = vshll.u32 %v6331_v8, 16  ;;  %v4497_v6 = vshrl.u32 %v6331_v8, 16 }
 0x12a   : > { %v4482_v9 = vsel %vm7191_vm8, %v4477_v46, %v4481_v19  ;;  %1401 = vst.msk [vmem:[#allocation2 + $0x48] sm:$0xff] %vm172_vm9, %v1369_v34  ;;  %v5140_v39 = vsel %vm7184_vm7, %v6437_v40, %v5139_v3  ;;  %v5141_v35 = vrot.slane %v5139_v3, 4  ;;  %v8296_v47 = vpop.f32.mrb[31].mxu1  ;;  %v4486_v62 = vrot.slane %v4484_v53, 4  ;;  %v8306_v43 = vpop.f32.mrb[28].mxu0  ;;  %v1080_v48 = vld [vmem:[#allocation2 + $0x70] sm:$0xff] }
 0x12b   : > { %v6358_v60 = vcombine.low %v4472_v51, %v4482_v9  ;;  %v4489_v4 = vrot.slane %v4487_v16, 5  ;;  %v4495_v28 = vrot.slane %v4493_v42, 5  ;;  %v4503_v29 = vshll.u32 %v6332_v58, 16  ;;  %v6335_v19 = vld [vmem:[%s7127_s25 + $0xa4] sm:$0x1]  ;;  %v8310_v25 = vpop.f32.mrb[29].mxu0 }
 0x12c   : > { %v5143_v24 = vsel %vm7184_vm7, %v5141_v35, %v5142_v36  ;;  %v6438_v2 = vrot.slane %v6408_v37, 9  ;;  %v4499_v17 = vrot.slane %v4497_v6, 4  ;;  %v5146_v1 = vrot.slane %v6409_v30, 5  ;;  %v8312_v44 = vpop.f32.mrb[30].mxu0  ;;  %v1078_v3 = vld [vmem:[#allocation2 + $0x60] sm:$0xff]  ;;  %v1081_v51 = vld [vmem:[#allocation2 + $0x78] sm:$0xff] }
 0x12d   : > { %6956 = vmatmul.mubr.msk.bf16.gmra.mrb[128].mxu1 %vm350_vm2, %v6358_v60  ;;  %v6454_v63 = vcombine.low %v5140_v39, %v5143_v24  ;;  %v4490_v0 = vor.u32 %v4489_v4, %v4486_v62  ;;  %v4505_v31 = vrot.slane %v4503_v29, 5  ;;  %v5149_v33 = vrot.slane %v6410_v50, 5  ;;  %v8317_v20 = vpop.f32.mrb[31].mxu0  ;;  %v6411_v39 = vld [vmem:[%s7127_s25 + $0x90] sm:$0xe]  ;;  %v8329_v42 = vpop.f32.mrb[32].mxu1 }
 0x12e   : > { %v4508_v26 = vshrl.u32 %v6333_v21, 16  ;;  %v4511_v22 = vshll.u32 %v6333_v21, 16  ;;  %v4500_v41 = vor.u32 %v4499_v17, %v4495_v28  ;;  %v5147_v38 = vsel %vm7184_vm7, %v6438_v2, %v5146_v1  ;;  %v1645_v45 = vld [vmem:[#allocation2 + $0x50] sm:$0xff]  ;;  %v6413_v6 = vld [vmem:[%s7127_s25 + $0x98] sm:$0x1]  ;;  %v8335_v24 = vpop.f32.mrb[33].mxu1 }
 0x12f   : > { %6989 = vmatprep.mubr.msk.bf16.mxu0 %vm350_vm2, %v6454_v63  ;;  %v4491_v18 = vrot.slane %v4490_v0, 4  ;;  %v5148_v52 = vrot.slane %v5146_v1, 4  ;;  %v4517_v7 = vshll.u32 %v6334_v10, 16  ;;  %v4521_v61 = vshrl.u32 %v6334_v10, 16  ;;  %v1643_v8 = vld [vmem:[#allocation2 + $0x40] sm:$0xff]  ;;  %v1079_v2 = vld [vmem:[#allocation2 + $0x68] sm:$0xff] }
 0x130   : > { %v4510_v13 = vrot.slane %v4508_v26, 4  ;;  %v4513_v14 = vrot.slane %v4511_v22, 5  ;;  %v4501_v11 = vrot.slane %v4500_v41, 4  ;;  %v4527_v54 = vshll.u32 %v6335_v19, 16  ;;  %v1646_v37 = vld [vmem:[#allocation2 + $0x58] sm:$0xff]  ;;  %v8345_v63 = vpop.f32.mrb[34].mxu1 }
 0x131   : > { %v4496_v12 = vsel %vm7191_vm8, %v4491_v18, %v4495_v28  ;;  %v5150_v49 = vsel %vm7184_vm7, %v5148_v52, %v5149_v33  ;;  %v4519_v34 = vrot.slane %v4517_v7, 5  ;;  %v4523_v40 = vrot.slane %v4521_v61, 4  ;;  %v1644_v36 = vld [vmem:[#allocation2 + $0x48] sm:$0xff]  ;;  %v6412_v35 = vld [vmem:[%s7127_s25 + $0x94] sm:$0xf] }
 0x132   : > { %v6455_v58 = vcombine.low %v5147_v38, %v5150_v49  ;;  %v4514_v46 = vor.u32 %v4513_v14, %v4510_v13  ;;  %v4506_v53 = vsel %vm7191_vm8, %v4501_v11, %v4505_v31  ;;  %v4529_v16 = vrot.slane %v4527_v54, 5  ;;  %v6336_v21 = vld [vmem:[%s7127_s25 + $0xa8] sm:$0xf]  ;;  %v6338_v10 = vld [vmem:[%s7127_s25 + $0xb0] sm:$0x1]  ;;  %v8365_v13 = vpop.f32.mrb[32].mxu0 }
 0x133   : > { %v1939_v30 = vadd.f32 %v8235_v27, %v1645_v45  ;;  %v1374_v9 = vadd.f32 %v8273_v23, %v1080_v48  ;;  %v6359_v50 = vcombine.low %v4496_v12, %v4506_v53  ;;  %v4524_v62 = vor.u32 %v4523_v40, %v4519_v34  ;;  %v6415_v1 = vld [vmem:[%s7127_s25 + $0xa0] sm:$0xf]  ;;  %v6339_v52 = vld [vmem:[%s7127_s25 + $0xb4] sm:$0xf]  ;;  %v6340_v12 = vld [vmem:[%s7127_s25 + $0xb8] sm:$0xf] }
 0x134   : > { %6990 = vmatmul.mubr.msk.bf16.gmra.mrb[128].mxu0 %vm350_vm2, %v6455_v58  ;;  %v4515_v60 = vrot.slane %v4514_v46, 4  ;;  %v1937_v4 = vadd.f32 %v8237_v5, %v1643_v8  ;;  %v1372_v27 = vadd.f32 %v8280_v32, %v1078_v3  ;;  %v1940_v23 = vadd.f32 %v8243_v15, %v1646_v37  ;;  %v6337_v5 = vld [vmem:[%s7127_s25 + $0xac] sm:$0xf]  ;;  %v8370_v11 = vpop.f32.mrb[33].mxu0 }
 0x135   : > { %1971 = vst.msk [vmem:[#allocation2 + $0x50] sm:$0xff] %vm172_vm9, %v1939_v30  ;;  %1406 = vst.msk [vmem:[#allocation2 + $0x70] sm:$0xff] %vm172_vm9, %v1374_v9  ;;  %v1375_v28 = vadd.f32 %v8288_v55, %v1081_v51  ;;  %v1938_v29 = vadd.f32 %v8251_v59, %v1644_v36  ;;  %6959 = vmatprep.mubr.msk.bf16.mxu1 %vm350_vm2, %v6359_v50  ;;  %v4525_v17 = vrot.slane %v4524_v62, 4  ;;  %v6439_v32 = vrot.slane %v6411_v39, 9  ;;  %v6414_v55 = vld [vmem:[%s7127_s25 + $0x9c] sm:$0xe] }
 0x136   : > { %v4520_v0 = vsel %vm7191_vm8, %v4515_v60, %v4519_v34  ;;  %1969 = vst.msk [vmem:[#allocation2 + $0x40] sm:$0xff] %vm172_vm9, %v1937_v4  ;;  %v1373_v15 = vadd.f32 %v8296_v47, %v1079_v2  ;;  %v8354_v59 = vpop.f32.mrb[35].mxu1  ;;  %1404 = vst.msk [vmem:[#allocation2 + $0x60] sm:$0xff] %vm172_vm9, %v1372_v27  ;;  %v5153_v19 = vrot.slane %v6412_v35, 5  ;;  %v5156_v31 = vrot.slane %v6413_v6, 5  ;;  %v8372_v58 = vpop.f32.mrb[34].mxu0 }
 0x137   : > { %1972 = vst.msk [vmem:[#allocation2 + $0x58] sm:$0xff] %vm172_vm9, %v1940_v23  ;;  %1407 = vst.msk [vmem:[#allocation2 + $0x78] sm:$0xff] %vm172_vm9, %v1375_v28  ;;  %v4532_v33 = vshrl.u32 %v6336_v21, 16  ;;  %v4535_v26 = vshll.u32 %v6336_v21, 16  ;;  %v6416_v47 = vld [vmem:[%s7127_s25 + $0xa4] sm:$0x1]  ;;  %v4530_v22 = vsel %vm7191_vm8, %v4525_v17, %v4529_v16 }
 0x138   : > { %1970 = vst.msk [vmem:[#allocation2 + $0x48] sm:$0xff] %vm172_vm9, %v1938_v29  ;;  %1405 = vst.msk [vmem:[#allocation2 + $0x68] sm:$0xff] %vm172_vm9, %v1373_v15  ;;  %v4541_v18 = vshll.u32 %v6337_v5, 16  ;;  %v4545_v41 = vshrl.u32 %v6337_v5, 16  ;;  %v4551_v38 = vshll.u32 %v6338_v10, 16  ;;  %v6360_v14 = vcombine.low %v4520_v0, %v4530_v22  ;;  %v8377_v37 = vpop.f32.mrb[35].mxu0 }
 0x139   : > { %v5154_v7 = vsel %vm7184_vm7, %v6439_v32, %v5153_v19  ;;  %v5155_v61 = vrot.slane %v5153_v19, 4  ;;  %v4534_v45 = vrot.slane %v4532_v33, 4  ;;  %v4537_v49 = vrot.slane %v4535_v26, 5  ;;  %v6341_v16 = vld [vmem:[%s7127_s25 + $0xbc] sm:$0x1]  ;;  %v1084_v2 = vld [vmem:[#allocation2 + $0x90] sm:$0xff] }
 0x13a   : > { %v4543_v54 = vrot.slane %v4541_v18, 5  ;;  %v4547_v48 = vrot.slane %v4545_v41, 4  ;;  %v4553_v8 = vrot.slane %v4551_v38, 5  ;;  %6960 = vmatmul.mubr.msk.bf16.gmra.mrb[132].mxu1 %vm350_vm2, %v6360_v14  ;;  %v6440_v34 = vrot.slane %v6414_v55, 9  ;;  %v8387_v10 = vpop.f32.mrb[36].mxu1  ;;  %v1082_v55 = vld [vmem:[#allocation2 + $0x80] sm:$0xff] }
 0x13b   : > { %v5157_v46 = vsel %vm7184_vm7, %v5155_v61, %v5156_v31  ;;  %v5160_v40 = vrot.slane %v6415_v1, 5  ;;  %v5163_v3 = vrot.slane %v6416_v47, 5  ;;  %v4538_v36 = vor.u32 %v4537_v49, %v4534_v45  ;;  %v8393_v31 = vpop.f32.mrb[37].mxu1  ;;  %v6417_v18 = vld [vmem:[%s7127_s25 + $0xa8] sm:$0xe]  ;;  %v1085_v45 = vld [vmem:[#allocation2 + $0x98] sm:$0xff] }
 0x13c   : > { %v6456_v51 = vcombine.low %v5154_v7, %v5157_v46  ;;  %v4548_v53 = vor.u32 %v4547_v48, %v4543_v54  ;;  %v4556_v30 = vshrl.u32 %v6339_v52, 16  ;;  %v4559_v35 = vshll.u32 %v6339_v52, 16  ;;  %v1649_v21 = vld [vmem:[#allocation2 + $0x70] sm:$0xff]  ;;  %v6418_v41 = vld [vmem:[%s7127_s25 + $0xac] sm:$0xf]  ;;  %v8398_v38 = vpop.f32.mrb[38].mxu1 }
 0x13d   : > { %v5161_v9 = vsel %vm7184_vm7, %v6440_v34, %v5160_v40  ;;  %v5162_v39 = vrot.slane %v5160_v40, 4  ;;  %v4565_v50 = vshll.u32 %v6340_v12, 16  ;;  %v4539_v60 = vrot.slane %v4538_v36, 4  ;;  %v1647_v5 = vld [vmem:[#allocation2 + $0x60] sm:$0xff] }
 0x13e   : > { %6993 = vmatprep.mubr.msk.bf16.mxu0 %vm350_vm2, %v6456_v51  ;;  %v4549_v62 = vrot.slane %v4548_v53, 4  ;;  %v4558_v4 = vrot.slane %v4556_v30, 4  ;;  %v4569_v6 = vshrl.u32 %v6340_v12, 16  ;;  %v4561_v23 = vrot.slane %v4559_v35, 5  ;;  %v1650_v1 = vld [vmem:[#allocation2 + $0x78] sm:$0xff] }
 0x13f   : > { %v5164_v27 = vsel %vm7184_vm7, %v5162_v39, %v5163_v3  ;;  %v8385_v28 = vrot.slane %v4565_v50, 5  ;;  %v4575_v29 = vshll.u32 %v6341_v16, 16  ;;  %v4544_v0 = vsel %vm7191_vm8, %v4539_v60, %v4543_v54  ;;  %v1648_v19 = vld [vmem:[#allocation2 + $0x68] sm:$0xff]  ;;  %v6419_v12 = vld [vmem:[%s7127_s25 + $0xb0] sm:$0x1] }
 0x140   : > { %v4554_v17 = vsel %vm7191_vm8, %v4549_v62, %v4553_v8  ;;  %v6457_v15 = vcombine.low %v5161_v9, %v5164_v27  ;;  %v4571_v32 = vrot.slane %v4569_v6, 4  ;;  %v4562_v26 = vor.u32 %v4561_v23, %v4558_v4  ;;  %v6342_v49 = vld [vmem:[%s7127_s25 + $0xc0] sm:$0xf]  ;;  %v6343_v46 = vld [vmem:[%s7127_s25 + $0xc4] sm:$0xf] }
 0x141   : > { %v6361_v33 = vcombine.low %v4544_v0, %v4554_v17  ;;  %v4577_v47 = vrot.slane %v4575_v29, 5  ;;  %v1943_v22 = vadd.f32 %v8306_v43, %v1649_v21  ;;  %v1378_v14 = vadd.f32 %v8329_v42, %v1084_v2  ;;  %v8407_v43 = vpop.f32.mrb[39].mxu1  ;;  %v6421_v16 = vld [vmem:[%s7127_s25 + $0xb8] sm:$0xf]  ;;  %v6422_v60 = vld [vmem:[%s7127_s25 + $0xbc] sm:$0x1] }
 0x142   : > { %6994 = vmatmul.mubr.msk.bf16.gmra.mrb[132].mxu0 %vm350_vm2, %v6457_v15  ;;  %v4572_v52 = vor.u32 %v4571_v32, %v8385_v28  ;;  %v1941_v7 = vadd.f32 %v8310_v25, %v1647_v5  ;;  %v1376_v61 = vadd.f32 %v8335_v24, %v1082_v55  ;;  %v4563_v54 = vrot.slane %v4562_v26, 4  ;;  %v1083_v25 = vld [vmem:[#allocation2 + $0x88] sm:$0xff]  ;;  %v6347_v26 = vld [vmem:[%s7127_s25 + $0xd4] sm:$0x1] }
 0x143   : > { %6963 = vmatprep.mubr.msk.bf16.mxu1 %vm350_vm2, %v6361_v33  ;;  %1975 = vst.msk [vmem:[#allocation2 + $0x70] sm:$0xff] %vm172_vm9, %v1943_v22  ;;  %v1944_v48 = vadd.f32 %v8312_v44, %v1650_v1  ;;  %v1379_v8 = vadd.f32 %v8345_v63, %v1085_v45  ;;  %v1942_v42 = vadd.f32 %v8317_v20, %v1648_v19  ;;  %v6344_v24 = vld [vmem:[%s7127_s25 + $0xc8] sm:$0x1]  ;;  %1410 = vst.msk [vmem:[#allocation2 + $0x90] sm:$0xff] %vm172_vm9, %v1378_v14  ;;  %v6420_v44 = vld [vmem:[%s7127_s25 + $0xb4] sm:$0xe] }
 0x144   : > { %v4573_v34 = vrot.slane %v4572_v52, 4  ;;  %1973 = vst.msk [vmem:[#allocation2 + $0x60] sm:$0xff] %vm172_vm9, %v1941_v7  ;;  %1408 = vst.msk [vmem:[#allocation2 + $0x80] sm:$0xff] %vm172_vm9, %v1376_v61  ;;  %v1377_v40 = vadd.f32 %v8354_v59, %v1083_v25  ;;  %v6441_v3 = vrot.slane %v6417_v18, 9  ;;  %v5167_v51 = vrot.slane %v6418_v41, 5  ;;  %v8421_v63 = vpop.f32.mrb[36].mxu0 }
 0x145   : > { %v4568_v20 = vsel %vm7191_vm8, %v4563_v54, %v8385_v28  ;;  %1976 = vst.msk [vmem:[#allocation2 + $0x78] sm:$0xff] %vm172_vm9, %v1944_v48  ;;  %1411 = vst.msk [vmem:[#allocation2 + $0x98] sm:$0xff] %vm172_vm9, %v1379_v8  ;;  %v5170_v36 = vrot.slane %v6419_v12, 5  ;;  %v4580_v53 = vshrl.u32 %v6342_v49, 16  ;;  %v4583_v59 = vshll.u32 %v6342_v49, 16  ;;  %v8430_v30 = vpop.f32.mrb[37].mxu0 }
 0x146   : > { %1974 = vst.msk [vmem:[#allocation2 + $0x68] sm:$0xff] %vm172_vm9, %v1942_v42  ;;  %v4578_v9 = vsel %vm7191_vm8, %v4573_v34, %v4577_v47  ;;  %1409 = vst.msk [vmem:[#allocation2 + $0x88] sm:$0xff] %vm172_vm9, %v1377_v40  ;;  %v5168_v39 = vsel %vm7184_vm7, %v6441_v3, %v5167_v51  ;;  %v5169_v35 = vrot.slane %v5167_v51, 4  ;;  %v4589_v50 = vshll.u32 %v6343_v46, 16  ;;  %v8438_v62 = vpop.f32.mrb[38].mxu0  ;;  %v8451_v7 = vpop.f32.mrb[40].mxu1 }
 0x147   : > { %v6362_v4 = vcombine.low %v4568_v20, %v4578_v9  ;;  %v4582_v6 = vrot.slane %v4580_v53, 4  ;;  %v4585_v21 = vrot.slane %v4583_v59, 5  ;;  %v4593_v27 = vshrl.u32 %v6343_v46, 16  ;;  %v6345_v23 = vld [vmem:[%s7127_s25 + $0xcc] sm:$0xf]  ;;  %v8441_v28 = vpop.f32.mrb[39].mxu0 }
 0x148   : > { %v5171_v29 = vsel %vm7184_vm7, %v5169_v35, %v5170_v36  ;;  %v4591_v2 = vrot.slane %v4589_v50, 5  ;;  %v4599_v5 = vshll.u32 %v6344_v24, 16  ;;  %v6442_v0 = vrot.slane %v6420_v44, 9  ;;  %v6346_v1 = vld [vmem:[%s7127_s25 + $0xd0] sm:$0xf]  ;;  %v1329_v8 = vpop.f32.mrb[41].mxu1 }
 0x149   : > { %6964 = vmatmul.mubr.msk.bf16.gmra.mrb[136].mxu1 %vm350_vm2, %v6362_v4  ;;  %v6458_v17 = vcombine.low %v5168_v39, %v5171_v29  ;;  %v4586_v15 = vor.u32 %v4585_v21, %v4582_v6  ;;  %v4595_v32 = vrot.slane %v4593_v27, 4  ;;  %v5174_v55 = vrot.slane %v6421_v16, 5  ;;  %v1088_v48 = vld [vmem:[#allocation2 + $0xb0] sm:$0xff]  ;;  %v6423_v40 = vld [vmem:[%s7127_s25 + $0xc0] sm:$0xe]  ;;  %v8458_v3 = vpop.f32.mrb[42].mxu1 }
 0x14a   : > { %v4601_v19 = vrot.slane %v4599_v5, 5  ;;  %v5177_v33 = vrot.slane %v6422_v60, 5  ;;  %v4604_v47 = vshrl.u32 %v6345_v23, 16  ;;  %v4607_v22 = vshll.u32 %v6345_v23, 16  ;;  %v1653_v54 = vld [vmem:[#allocation2 + $0x90] sm:$0xff]  ;;  %v1086_v53 = vld [vmem:[#allocation2 + $0xa0] sm:$0xff] }
 0x14b   : > { %6997 = vmatprep.mubr.msk.bf16.mxu0 %vm350_vm2, %v6458_v17  ;;  %v4587_v18 = vrot.slane %v4586_v15, 4  ;;  %v4596_v41 = vor.u32 %v4595_v32, %v4591_v2  ;;  %v5175_v52 = vsel %vm7184_vm7, %v6442_v0, %v5174_v55  ;;  %v5176_v14 = vrot.slane %v5174_v55, 4  ;;  %v1651_v34 = vld [vmem:[#allocation2 + $0x80] sm:$0xff]  ;;  %v1332_v9 = vpop.f32.mrb[43].mxu1  ;;  %v1089_v4 = vld [vmem:[#allocation2 + $0xb8] sm:$0xff]  ;;  %v8470_v17 = vpop.f32.mrb[40].mxu0 }
 0x14c   : > { %v4606_v61 = vrot.slane %v4604_v47, 4  ;;  %v4609_v45 = vrot.slane %v4607_v22, 5  ;;  %v4613_v12 = vshll.u32 %v6346_v1, 16  ;;  %v4617_v49 = vshrl.u32 %v6346_v1, 16  ;;  %v1654_v59 = vld [vmem:[#allocation2 + $0x98] sm:$0xff]  ;;  %v1087_v55 = vld [vmem:[#allocation2 + $0xa8] sm:$0xff] }
 0x14d   : > { %v4592_v42 = vsel %vm7191_vm8, %v4587_v18, %v4591_v2  ;;  %v4597_v25 = vrot.slane %v4596_v41, 4  ;;  %v5178_v46 = vsel %vm7184_vm7, %v5176_v14, %v5177_v33  ;;  %v4623_v24 = vshll.u32 %v6347_v26, 16  ;;  %v1652_v16 = vld [vmem:[#allocation2 + $0x88] sm:$0xff]  ;;  %v6424_v6 = vld [vmem:[%s7127_s25 + $0xc4] sm:$0xf] }
 0x14e   : > { %v6459_v51 = vcombine.low %v5175_v52, %v5178_v46  ;;  %v4610_v44 = vor.u32 %v4609_v45, %v4606_v61  ;;  %v4615_v20 = vrot.slane %v4613_v12, 5  ;;  %v4619_v36 = vrot.slane %v4617_v49, 4  ;;  %v6425_v21 = vld [vmem:[%s7127_s25 + $0xc8] sm:$0x1]  ;;  %v6426_v5 = vld [vmem:[%s7127_s25 + $0xcc] sm:$0xe] }
 0x14f   : > { %v4602_v39 = vsel %vm7191_vm8, %v4597_v25, %v4601_v19  ;;  %v4625_v35 = vrot.slane %v4623_v24, 5  ;;  %v1947_v50 = vadd.f32 %v8365_v13, %v1653_v54  ;;  %v1382_v60 = vadd.f32 %v8387_v10, %v1088_v48  ;;  %v6427_v0 = vld [vmem:[%s7127_s25 + $0xd0] sm:$0xf]  ;;  %v6428_v1 = vld [vmem:[%s7127_s25 + $0xd4] sm:$0x1]  ;;  %v8479_v19 = vpop.f32.mrb[41].mxu0 }
 0x150   : > { %v6363_v27 = vcombine.low %v4592_v42, %v4602_v39  ;;  %6998 = vmatmul.mubr.msk.bf16.gmra.mrb[136].mxu0 %vm350_vm2, %v6459_v51  ;;  %v4611_v23 = vrot.slane %v4610_v44, 4  ;;  %v4620_v29 = vor.u32 %v4619_v36, %v4615_v20  ;;  %v1945_v2 = vadd.f32 %v8370_v11, %v1651_v34  ;;  %v8486_v47 = vpop.f32.mrb[42].mxu0  ;;  %v1090_v41 = vld [vmem:[#allocation2 + $0xc0] sm:$0xff]  ;;  %v1093_v48 = vld [vmem:[#allocation2 + $0xd8] sm:$0xff]  ;;  %v1091_v42 = vld [vmem:[#allocation2 + $0xc8] sm:$0xff]  ;;  %v6765_v34 = vpop.f32.mrb[44].mxu1 }
 0x151   : > { %1979 = vst.msk [vmem:[#allocation2 + $0x90] sm:$0xff] %vm172_vm9, %v1947_v50  ;;  %1414 = vst.msk [vmem:[#allocation2 + $0xb0] sm:$0xff] %vm172_vm9, %v1382_v60  ;;  %v1380_v13 = vadd.f32 %v8393_v31, %v1086_v53  ;;  %v1948_v10 = vadd.f32 %v8372_v58, %v1654_v59  ;;  %v1383_v15 = vadd.f32 %v8398_v38, %v1089_v4  ;;  %v6443_v26 = vrot.slane %v6423_v40, 9  ;;  %v1092_v58 = vld [vmem:[#allocation2 + $0xd0] sm:$0xff]  ;;  %v8492_v52 = vpop.f32.mrb[43].mxu0  ;;  %v1094_v36 = vld [vmem:[#allocation2 + $0xe0] sm:$0xff] }
 0x152   : > { %v1946_v32 = vadd.f32 %v8377_v37, %v1652_v16  ;;  %6967 = vmatprep.mubr.msk.bf16.mxu1 %vm350_vm2, %v6363_v27  ;;  %v4616_v11 = vsel %vm7191_vm8, %v4611_v23, %v4615_v20  ;;  %v4621_v33 = vrot.slane %v4620_v29, 4  ;;  %1977 = vst.msk [vmem:[#allocation2 + $0x80] sm:$0xff] %vm172_vm9, %v1945_v2  ;;  %v1381_v31 = vadd.f32 %v8407_v43, %v1087_v55  ;;  %v6799_v53 = vpop.f32.mrb[44].mxu0  ;;  %v1097_v39 = vld [vmem:[#allocation2 + $0xf8] sm:$0xff]  ;;  %v2028_v55 = vld [vmem:[#allocation2 + $0x10] sm:$0xff] }
 0x153   : > { %1412 = vst.msk [vmem:[#allocation2 + $0xa0] sm:$0xff] %vm172_vm9, %v1380_v13  ;;  %1980 = vst.msk [vmem:[#allocation2 + $0x98] sm:$0xff] %vm172_vm9, %v1948_v10  ;;  %v5181_v37 = vrot.slane %v6424_v6, 5  ;;  %v5184_v38 = vrot.slane %v6425_v21, 5  ;;  %v6444_v22 = vrot.slane %v6426_v5, 9  ;;  %v5188_v18 = vrot.slane %v6427_v0, 5 }
 0x154   : > { %1415 = vst.msk [vmem:[#allocation2 + $0xb8] sm:$0xff] %vm172_vm9, %v1383_v15  ;;  %1978 = vst.msk [vmem:[#allocation2 + $0x88] sm:$0xff] %vm172_vm9, %v1946_v32  ;;  %v4626_v43 = vsel %vm7191_vm8, %v4621_v33, %v4625_v35  ;;  %v5191_v14 = vrot.slane %v6428_v1, 5  ;;  %v1386_v61 = vadd.f32 %v8451_v7, %v1092_v58  ;;  %v1384_v45 = vadd.f32 %v1329_v8, %v1090_v41  ;;  %v1096_v8 = vld [vmem:[#allocation2 + $0xf0] sm:$0xff]  ;;  %v1914_v50 = vpop.f32.mrb[45].mxu0  ;;  %v1095_v6 = vld [vmem:[#allocation2 + $0xe8] sm:$0xff] }
 0x155   : > { %1413 = vst.msk [vmem:[#allocation2 + $0xa8] sm:$0xff] %vm172_vm9, %v1381_v31  ;;  %v6364_v12 = vcombine.low %v4616_v11, %v4626_v43  ;;  %v5182_v49 = vsel %vm7184_vm7, %v6443_v26, %v5181_v37  ;;  %v5183_v54 = vrot.slane %v5181_v37, 4  ;;  %v5189_v25 = vsel %vm7184_vm7, %v6444_v22, %v5188_v18  ;;  %v6800_v27 = vpop.f32.mrb[46].mxu0  ;;  %v2026_v31 = vld [vmem:[#allocation2] sm:$0xff]  ;;  %v2027_v41 = vld [vmem:[#allocation2 + $0x8] sm:$0xff] }
 0x156   : > { %v5190_v46 = vrot.slane %v5188_v18, 4  ;;  %1418 = vst.msk [vmem:[#allocation2 + $0xd0] sm:$0xff] %vm172_vm9, %v1386_v61  ;;  %1416 = vst.msk [vmem:[#allocation2 + $0xc0] sm:$0xff] %vm172_vm9, %v1384_v45  ;;  %v1387_v57 = vadd.f32 %v8458_v3, %v1093_v48  ;;  %v1385_v24 = vadd.f32 %v1332_v9, %v1091_v42  ;;  %v1390_v20 = vadd.f32 %v6765_v34, %v1096_v8  ;;  %v1345_v3 = vpop.f32.mrb[45].mxu1  ;;  %v1917_v5 = vpop.f32.mrb[47].mxu0 }
 0x157   : > { %6968 = vmatmul.mubr.msk.bf16.gmra.mrb[140].mxu1 %vm350_vm2, %v6364_v12  ;;  %v5185_v7 = vsel %vm7184_vm7, %v5183_v54, %v5184_v38  ;;  %v1388_v9 = vadd.f32 %v1345_v3, %v1094_v36  ;;  %v6766_v35 = vpop.f32.mrb[46].mxu1  ;;  %v2031_v3 = vld [vmem:[#allocation2 + $0x28] sm:$0xff] }
 0x158   : > { %v6460_v40 = vcombine.low %v5182_v49, %v5185_v7  ;;  %v5192_v51 = vsel %vm7184_vm7, %v5190_v46, %v5191_v14  ;;  %v1657_v44 = vld [vmem:[#allocation2 + $0xb0] sm:$0xff]  ;;  %1419 = vst.msk [vmem:[#allocation2 + $0xd8] sm:$0xff] %vm172_vm9, %v1387_v57  ;;  %1417 = vst.msk [vmem:[#allocation2 + $0xc8] sm:$0xff] %vm172_vm9, %v1385_v24  ;;  %v1391_v4 = vadd.f32 %v6766_v35, %v1097_v39  ;;  %v1348_v21 = vpop.f32.mrb[47].mxu1  ;;  %v6839_v43 = vpop.f32.mrb[48].mxu0  ;;  %v2030_v24 = vld [vmem:[#allocation2 + $0x20] sm:$0xff] }
 0x159   : > { %v6461_v59 = vcombine.low %v5189_v25, %v5192_v51  ;;  %v1951_v16 = vadd.f32 %v8421_v63, %v1657_v44  ;;  %1422 = vst.msk [vmem:[#allocation2 + $0xf0] sm:$0xff] %vm172_vm9, %v1390_v20  ;;  %1420 = vst.msk [vmem:[#allocation2 + $0xe0] sm:$0xff] %vm172_vm9, %v1388_v9  ;;  %v1389_v2 = vadd.f32 %v1348_v21, %v1095_v6  ;;  %v3015_v45 = vpop.f32.mrb[49].mxu0  ;;  %v2032_v25 = vld [vmem:[#allocation2 + $0x30] sm:$0xff] }
 0x15a   : > { %7001 = vmatprep.mubr.msk.bf16.mxu0 %vm350_vm2, %v6460_v40  ;;  %v1655_v56 = vld [vmem:[#allocation2 + $0xa0] sm:$0xff]  ;;  %1423 = vst.msk [vmem:[#allocation2 + $0xf8] sm:$0xff] %vm172_vm9, %v1391_v4  ;;  %v6840_v54 = vpop.f32.mrb[50].mxu0  ;;  %v2033_v40 = vld [vmem:[#allocation2 + $0x38] sm:$0xff]  ;;  %v2036_v6 = vld [vmem:[#allocation2 + $0x50] sm:$0xff] }
 0x15b   : > { %v1658_v60 = vld [vmem:[#allocation2 + $0xb8] sm:$0xff]  ;;  %7002 = vmatmul.mubr.msk.bf16.gmra.mrb[140].mxu0 %vm350_vm2, %v6461_v59  ;;  %1983 = vst.msk [vmem:[#allocation2 + $0xb0] sm:$0xff] %vm172_vm9, %v1951_v16  ;;  %v1949_v63 = vadd.f32 %v8430_v30, %v1655_v56  ;;  %1421 = vst.msk [vmem:[#allocation2 + $0xe8] sm:$0xff] %vm172_vm9, %v1389_v2  ;;  %v3018_v42 = vpop.f32.mrb[51].mxu0 }
 0x15c   : > { %v1952_v23 = vadd.f32 %v8438_v62, %v1658_v60  ;;  %v1656_v29 = vld [vmem:[#allocation2 + $0xa8] sm:$0xff] }
 0x15d   : > { %v1950_v0 = vadd.f32 %v8441_v28, %v1656_v29  ;;  %1981 = vst.msk [vmem:[#allocation2 + $0xa0] sm:$0xff] %vm172_vm9, %v1949_v63  ;;  %v1661_v13 = vld [vmem:[#allocation2 + $0xd0] sm:$0xff]  ;;  %v1659_v10 = vld [vmem:[#allocation2 + $0xc0] sm:$0xff]  ;;  %v6805_v28 = vpop.f32.mrb[48].mxu1 }
 0x15e   : > { %1984 = vst.msk [vmem:[#allocation2 + $0xb8] sm:$0xff] %vm172_vm9, %v1952_v23  ;;  %v1955_v30 = vadd.f32 %v8470_v17, %v1661_v13  ;;  %v1953_v62 = vadd.f32 %v8479_v19, %v1659_v10  ;;  %v2354_v33 = vadd.f32 %v6805_v28, %v2028_v55  ;;  %v2225_v26 = vpop.f32.mrb[49].mxu1  ;;  %v2029_v17 = vld [vmem:[#allocation2 + $0x18] sm:$0xff]  ;;  %v2034_v23 = vld [vmem:[#allocation2 + $0x40] sm:$0xff] }
 0x15f   : > { %1982 = vst.msk [vmem:[#allocation2 + $0xa8] sm:$0xff] %vm172_vm9, %v1950_v0  ;;  %v1662_v15 = vld [vmem:[#allocation2 + $0xd8] sm:$0xff]  ;;  %v1660_v32 = vld [vmem:[#allocation2 + $0xc8] sm:$0xff]  ;;  %v2352_v37 = vadd.f32 %v2225_v26, %v2026_v31  ;;  %v6806_v38 = vpop.f32.mrb[50].mxu1 }
 0x160   : > { %1987 = vst.msk [vmem:[#allocation2 + $0xd0] sm:$0xff] %vm172_vm9, %v1955_v30  ;;  %1985 = vst.msk [vmem:[#allocation2 + $0xc0] sm:$0xff] %vm172_vm9, %v1953_v62  ;;  %v1956_v1 = vadd.f32 %v8486_v47, %v1662_v15  ;;  %v1954_v11 = vadd.f32 %v8492_v52, %v1660_v32  ;;  %v1665_v58 = vld [vmem:[#allocation2 + $0xf0] sm:$0xff]  ;;  %v1663_v22 = vld [vmem:[#allocation2 + $0xe0] sm:$0xff]  ;;  %v2355_v18 = vadd.f32 %v6806_v38, %v2029_v17  ;;  %v2228_v47 = vpop.f32.mrb[51].mxu1 }
 0x161   : > { %v1959_v19 = vadd.f32 %v6799_v53, %v1665_v58  ;;  %2386 = vst.msk [vmem:[#allocation2 + $0x10] sm:$0xff] %vm172_vm9, %v2354_v33  ;;  %v1957_v52 = vadd.f32 %v1914_v50, %v1663_v22  ;;  %v1666_v14 = vld [vmem:[#allocation2 + $0xf8] sm:$0xff]  ;;  %2384 = vst.msk [vmem:[#allocation2] sm:$0xff] %vm172_vm9, %v2352_v37  ;;  %v2353_v61 = vadd.f32 %v2228_v47, %v2027_v41  ;;  %v6809_v46 = vpop.f32.mrb[52].mxu1  ;;  %v2035_v15 = vld [vmem:[#allocation2 + $0x48] sm:$0xff] }
 0x162   : > { %1988 = vst.msk [vmem:[#allocation2 + $0xd8] sm:$0xff] %vm172_vm9, %v1956_v1  ;;  %1986 = vst.msk [vmem:[#allocation2 + $0xc8] sm:$0xff] %vm172_vm9, %v1954_v11  ;;  %v1960_v12 = vadd.f32 %v6800_v27, %v1666_v14  ;;  %v1664_v49 = vld [vmem:[#allocation2 + $0xe8] sm:$0xff]  ;;  %v2358_v57 = vadd.f32 %v6809_v46, %v2032_v25  ;;  %v2241_v7 = vpop.f32.mrb[53].mxu1  ;;  %v6843_v50 = vpop.f32.mrb[52].mxu0  ;;  %v2037_v0 = vld [vmem:[#allocation2 + $0x58] sm:$0xff] }
 0x163   : > { %1991 = vst.msk [vmem:[#allocation2 + $0xf0] sm:$0xff] %vm172_vm9, %v1959_v19  ;;  %2387 = vst.msk [vmem:[#allocation2 + $0x18] sm:$0xff] %vm172_vm9, %v2355_v18  ;;  %v1958_v48 = vadd.f32 %v1917_v5, %v1664_v49  ;;  %v2356_v34 = vadd.f32 %v2241_v7, %v2030_v24  ;;  %v6810_v51 = vpop.f32.mrb[54].mxu1  ;;  %v3031_v60 = vpop.f32.mrb[53].mxu0  ;;  %v2040_v37 = vld [vmem:[#allocation2 + $0x70] sm:$0xff]  ;;  %v2038_v22 = vld [vmem:[#allocation2 + $0x60] sm:$0xff] }
 0x164   : > { %1989 = vst.msk [vmem:[#allocation2 + $0xe0] sm:$0xff] %vm172_vm9, %v1957_v52  ;;  %2385 = vst.msk [vmem:[#allocation2 + $0x8] sm:$0xff] %vm172_vm9, %v2353_v61  ;;  %v2359_v36 = vadd.f32 %v6810_v51, %v2033_v40  ;;  %v2244_v53 = vpop.f32.mrb[55].mxu1  ;;  %v6844_v4 = vpop.f32.mrb[54].mxu0  ;;  %v2041_v52 = vld [vmem:[#allocation2 + $0x78] sm:$0xff]  ;;  %v2039_v49 = vld [vmem:[#allocation2 + $0x68] sm:$0xff] }
 0x165   : > { %1992 = vst.msk [vmem:[#allocation2 + $0xf8] sm:$0xff] %vm172_vm9, %v1960_v12  ;;  %1990 = vst.msk [vmem:[#allocation2 + $0xe8] sm:$0xff] %vm172_vm9, %v1958_v48  ;;  %v2357_v9 = vadd.f32 %v2244_v53, %v2031_v3  ;;  %v6813_v21 = vpop.f32.mrb[56].mxu1  ;;  %v3034_v27 = vpop.f32.mrb[55].mxu0 }
 0x166   : > { %2390 = vst.msk [vmem:[#allocation2 + $0x30] sm:$0xff] %vm172_vm9, %v2358_v57  ;;  %2388 = vst.msk [vmem:[#allocation2 + $0x20] sm:$0xff] %vm172_vm9, %v2356_v34  ;;  %v2362_v63 = vadd.f32 %v6813_v21, %v2036_v6  ;;  %v2257_v29 = vpop.f32.mrb[57].mxu1  ;;  %v2044_v34 = vld [vmem:[#allocation2 + $0x90] sm:$0xff] }
 0x167   : > { %2391 = vst.msk [vmem:[#allocation2 + $0x38] sm:$0xff] %vm172_vm9, %v2359_v36  ;;  %2389 = vst.msk [vmem:[#allocation2 + $0x28] sm:$0xff] %vm172_vm9, %v2357_v9  ;;  %v2360_v5 = vadd.f32 %v2257_v29, %v2034_v23  ;;  %v6814_v13 = vpop.f32.mrb[58].mxu1 }
 0x168   : > { %v2850_v8 = vld [vmem:[#allocation2 + $0x10] sm:$0xff]  ;;  %v2848_v20 = vld [vmem:[#allocation2] sm:$0xff]  ;;  %2394 = vst.msk [vmem:[#allocation2 + $0x50] sm:$0xff] %vm172_vm9, %v2362_v63  ;;  %v2363_v62 = vadd.f32 %v6814_v13, %v2037_v0  ;;  %v2260_v32 = vpop.f32.mrb[59].mxu1 }
 0x169   : > { %v3144_v44 = vadd.f32 %v6839_v43, %v2850_v8  ;;  %v3142_v59 = vadd.f32 %v3015_v45, %v2848_v20  ;;  %2392 = vst.msk [vmem:[#allocation2 + $0x40] sm:$0xff] %vm172_vm9, %v2360_v5  ;;  %v2361_v1 = vadd.f32 %v2260_v32, %v2035_v15  ;;  %v2042_v20 = vld [vmem:[#allocation2 + $0x80] sm:$0xff] }
 0x16a   : > { %v2851_v16 = vld [vmem:[#allocation2 + $0x18] sm:$0xff]  ;;  %2395 = vst.msk [vmem:[#allocation2 + $0x58] sm:$0xff] %vm172_vm9, %v2363_v62  ;;  %v6847_v26 = vpop.f32.mrb[56].mxu0 }
 0x16b   : > { %3176 = vst.msk [vmem:[#allocation2 + $0x10] sm:$0xff] %vm172_vm9, %v3144_v44  ;;  %v3145_v39 = vadd.f32 %v6840_v54, %v2851_v16  ;;  %v2849_v35 = vld [vmem:[#allocation2 + $0x8] sm:$0xff]  ;;  %3174 = vst.msk [vmem:[#allocation2] sm:$0xff] %vm172_vm9, %v3142_v59  ;;  %v3047_v58 = vpop.f32.mrb[57].mxu0  ;;  %v2045_v16 = vld [vmem:[#allocation2 + $0x98] sm:$0xff] }
 0x16c   : > { %v3143_v56 = vadd.f32 %v3018_v42, %v2849_v35  ;;  %2393 = vst.msk [vmem:[#allocation2 + $0x48] sm:$0xff] %vm172_vm9, %v2361_v1  ;;  %v6817_v17 = vpop.f32.mrb[60].mxu1  ;;  %v6848_v38 = vpop.f32.mrb[58].mxu0 }
 0x16d   : > { %3177 = vst.msk [vmem:[#allocation2 + $0x18] sm:$0xff] %vm172_vm9, %v3145_v39  ;;  %v2854_v2 = vld [vmem:[#allocation2 + $0x30] sm:$0xff]  ;;  %v2852_v30 = vld [vmem:[#allocation2 + $0x20] sm:$0xff]  ;;  %v2366_v19 = vadd.f32 %v6817_v17, %v2040_v37  ;;  %v2273_v18 = vpop.f32.mrb[61].mxu1  ;;  %v3050_v41 = vpop.f32.mrb[59].mxu0 }
 0x16e   : > { %3175 = vst.msk [vmem:[#allocation2 + $0x8] sm:$0xff] %vm172_vm9, %v3143_v56  ;;  %v3148_v10 = vadd.f32 %v6843_v50, %v2854_v2  ;;  %v3146_v55 = vadd.f32 %v3031_v60, %v2852_v30  ;;  %v2855_v28 = vld [vmem:[#allocation2 + $0x38] sm:$0xff]  ;;  %v2853_v33 = vld [vmem:[#allocation2 + $0x28] sm:$0xff]  ;;  %v2364_v43 = vadd.f32 %v2273_v18, %v2038_v22  ;;  %v6818_v14 = vpop.f32.mrb[62].mxu1  ;;  %v2048_v2 = vld [vmem:[#allocation2 + $0xb0] sm:$0xff] }
 0x16f   : > { %v3149_v11 = vadd.f32 %v6844_v4, %v2855_v28  ;;  %v3147_v31 = vadd.f32 %v3034_v27, %v2853_v33  ;;  %v2858_v47 = vld [vmem:[#allocation2 + $0x50] sm:$0xff]  ;;  %2398 = vst.msk [vmem:[#allocation2 + $0x70] sm:$0xff] %vm172_vm9, %v2366_v19  ;;  %v2367_v12 = vadd.f32 %v6818_v14, %v2041_v52  ;;  %v2276_v54 = vpop.f32.mrb[63].mxu1  ;;  %v2043_v56 = vld [vmem:[#allocation2 + $0x88] sm:$0xff] }
 0x170   : > { %3180 = vst.msk [vmem:[#allocation2 + $0x30] sm:$0xff] %vm172_vm9, %v3148_v10  ;;  %3178 = vst.msk [vmem:[#allocation2 + $0x20] sm:$0xff] %vm172_vm9, %v3146_v55  ;;  %v3152_v61 = vadd.f32 %v6847_v26, %v2858_v47  ;;  %v2856_v45 = vld [vmem:[#allocation2 + $0x40] sm:$0xff]  ;;  %v2365_v25 = vadd.f32 %v2276_v54, %v2039_v49  ;;  %v2049_v55 = vld [vmem:[#allocation2 + $0xb8] sm:$0xff] }
 0x171   : > { %3181 = vst.msk [vmem:[#allocation2 + $0x38] sm:$0xff] %vm172_vm9, %v3149_v11  ;;  %3179 = vst.msk [vmem:[#allocation2 + $0x28] sm:$0xff] %vm172_vm9, %v3147_v31  ;;  %v3150_v48 = vadd.f32 %v3047_v58, %v2856_v45  ;;  %v2859_v42 = vld [vmem:[#allocation2 + $0x58] sm:$0xff]  ;;  %v2046_v10 = vld [vmem:[#allocation2 + $0xa0] sm:$0xff] }
 0x172   : > { %2396 = vst.msk [vmem:[#allocation2 + $0x60] sm:$0xff] %vm172_vm9, %v2364_v43  ;;  %3184 = vst.msk [vmem:[#allocation2 + $0x50] sm:$0xff] %vm172_vm9, %v3152_v61  ;;  %v3153_v46 = vadd.f32 %v6848_v38, %v2859_v42  ;;  %v6851_v7 = vpop.f32.mrb[60].mxu0  ;;  %v2047_v26 = vld [vmem:[#allocation2 + $0xa8] sm:$0xff]  ;;  %v2052_v47 = vld [vmem:[#allocation2 + $0xd0] sm:$0xff] }
 0x173   : > { %2399 = vst.msk [vmem:[#allocation2 + $0x78] sm:$0xff] %vm172_vm9, %v2367_v12  ;;  %v2857_v57 = vld [vmem:[#allocation2 + $0x48] sm:$0xff]  ;;  %3182 = vst.msk [vmem:[#allocation2 + $0x40] sm:$0xff] %vm172_vm9, %v3150_v48  ;;  %v3063_v8 = vpop.f32.mrb[61].mxu0  ;;  %v2050_v61 = vld [vmem:[#allocation2 + $0xc0] sm:$0xff] }
 0x174   : > { %v3151_v24 = vadd.f32 %v3050_v41, %v2857_v57  ;;  %2397 = vst.msk [vmem:[#allocation2 + $0x68] sm:$0xff] %vm172_vm9, %v2365_v25  ;;  %3185 = vst.msk [vmem:[#allocation2 + $0x58] sm:$0xff] %vm172_vm9, %v3153_v46  ;;  %v6821_v40 = vpop.f32.mrb[64].mxu1  ;;  %v6852_v51 = vpop.f32.mrb[62].mxu0  ;;  %v2053_v48 = vld [vmem:[#allocation2 + $0xd8] sm:$0xff] }
 0x175   : > { %v2370_v44 = vadd.f32 %v6821_v40, %v2044_v34  ;;  %v2289_v36 = vpop.f32.mrb[65].mxu1  ;;  %v3066_v3 = vpop.f32.mrb[63].mxu0 }
 0x176   : > { %3183 = vst.msk [vmem:[#allocation2 + $0x48] sm:$0xff] %vm172_vm9, %v3151_v24  ;;  %v2862_v53 = vld [vmem:[#allocation2 + $0x70] sm:$0xff]  ;;  %v2368_v59 = vadd.f32 %v2289_v36, %v2042_v20  ;;  %v6822_v9 = vpop.f32.mrb[66].mxu1 }
 0x177   : > { %v3156_v39 = vadd.f32 %v6851_v7, %v2862_v53  ;;  %2402 = vst.msk [vmem:[#allocation2 + $0x90] sm:$0xff] %vm172_vm9, %v2370_v44  ;;  %v2371_v50 = vadd.f32 %v6822_v9, %v2045_v16  ;;  %v2292_v60 = vpop.f32.mrb[67].mxu1  ;;  %v2051_v7 = vld [vmem:[#allocation2 + $0xc8] sm:$0xff]  ;;  %v2056_v53 = vld [vmem:[#allocation2 + $0xf0] sm:$0xff] }
 0x178   : > { %2400 = vst.msk [vmem:[#allocation2 + $0x80] sm:$0xff] %vm172_vm9, %v2368_v59  ;;  %v2369_v21 = vadd.f32 %v2292_v60, %v2043_v56 }
 0x179   : > { %v2860_v35 = vld [vmem:[#allocation2 + $0x60] sm:$0xff]  ;;  %3188 = vst.msk [vmem:[#allocation2 + $0x70] sm:$0xff] %vm172_vm9, %v3156_v39  ;;  %2403 = vst.msk [vmem:[#allocation2 + $0x98] sm:$0xff] %vm172_vm9, %v2371_v50 }
 0x17a   : > { %v3154_v4 = vadd.f32 %v3063_v8, %v2860_v35  ;;  %v2863_v6 = vld [vmem:[#allocation2 + $0x78] sm:$0xff]  ;;  %2401 = vst.msk [vmem:[#allocation2 + $0x88] sm:$0xff] %vm172_vm9, %v2369_v21  ;;  %v2054_v39 = vld [vmem:[#allocation2 + $0xe0] sm:$0xff] }
 0x17b   : > { %v3157_v27 = vadd.f32 %v6852_v51, %v2863_v6  ;;  %v2861_v63 = vld [vmem:[#allocation2 + $0x68] sm:$0xff]  ;;  %v6855_v29 = vpop.f32.mrb[64].mxu0 }
 0x17c   : > { %3186 = vst.msk [vmem:[#allocation2 + $0x60] sm:$0xff] %vm172_vm9, %v3154_v4  ;;  %v3155_v23 = vadd.f32 %v3066_v3, %v2861_v63  ;;  %v6825_v5 = vpop.f32.mrb[68].mxu1  ;;  %v3079_v0 = vpop.f32.mrb[65].mxu0  ;;  %v2057_v4 = vld [vmem:[#allocation2 + $0xf8] sm:$0xff] }
 0x17d   : > { %3189 = vst.msk [vmem:[#allocation2 + $0x78] sm:$0xff] %vm172_vm9, %v3157_v27  ;;  %v2374_v13 = vadd.f32 %v6825_v5, %v2048_v2  ;;  %v2305_v30 = vpop.f32.mrb[69].mxu1  ;;  %v6856_v62 = vpop.f32.mrb[66].mxu0 }
 0x17e   : > { %3187 = vst.msk [vmem:[#allocation2 + $0x68] sm:$0xff] %vm172_vm9, %v3155_v23  ;;  %v2866_v15 = vld [vmem:[#allocation2 + $0x90] sm:$0xff]  ;;  %v2372_v32 = vadd.f32 %v2305_v30, %v2046_v10  ;;  %v6826_v28 = vpop.f32.mrb[70].mxu1  ;;  %v3082_v1 = vpop.f32.mrb[67].mxu0 }
 0x17f   : > { %v3160_v11 = vadd.f32 %v6855_v29, %v2866_v15  ;;  %2406 = vst.msk [vmem:[#allocation2 + $0xb0] sm:$0xff] %vm172_vm9, %v2374_v13  ;;  %v2864_v33 = vld [vmem:[#allocation2 + $0x80] sm:$0xff]  ;;  %v2375_v31 = vadd.f32 %v6826_v28, %v2049_v55  ;;  %v2308_v58 = vpop.f32.mrb[71].mxu1  ;;  %v2055_v29 = vld [vmem:[#allocation2 + $0xe8] sm:$0xff]  ;;  %v3416_v55 = vld [vmem:[#allocation2 + $0x10] sm:$0xff] }
 0x180   : > { %v3158_v37 = vadd.f32 %v3079_v0, %v2864_v33  ;;  %2404 = vst.msk [vmem:[#allocation2 + $0xa0] sm:$0xff] %vm172_vm9, %v2372_v32  ;;  %v2867_v17 = vld [vmem:[#allocation2 + $0x98] sm:$0xff]  ;;  %v2373_v38 = vadd.f32 %v2308_v58, %v2047_v26 }
 0x181   : > { %3192 = vst.msk [vmem:[#allocation2 + $0x90] sm:$0xff] %vm172_vm9, %v3160_v11  ;;  %v3161_v19 = vadd.f32 %v6856_v62, %v2867_v17  ;;  %2407 = vst.msk [vmem:[#allocation2 + $0xb8] sm:$0xff] %vm172_vm9, %v2375_v31  ;;  %v2865_v22 = vld [vmem:[#allocation2 + $0x88] sm:$0xff]  ;;  %v3414_v31 = vld [vmem:[#allocation2] sm:$0xff] }
 0x182   : > { %3190 = vst.msk [vmem:[#allocation2 + $0x80] sm:$0xff] %vm172_vm9, %v3158_v37  ;;  %v3159_v18 = vadd.f32 %v3082_v1, %v2865_v22  ;;  %2405 = vst.msk [vmem:[#allocation2 + $0xa8] sm:$0xff] %vm172_vm9, %v2373_v38 }
 0x183   : > { %3193 = vst.msk [vmem:[#allocation2 + $0x98] sm:$0xff] %vm172_vm9, %v3161_v19  ;;  %v6859_v41 = vpop.f32.mrb[68].mxu0  ;;  %v3417_v19 = vld [vmem:[#allocation2 + $0x18] sm:$0xff] }
 0x184   : > { %3191 = vst.msk [vmem:[#allocation2 + $0x88] sm:$0xff] %vm172_vm9, %v3159_v18  ;;  %v6829_v43 = vpop.f32.mrb[72].mxu1  ;;  %v3095_v52 = vpop.f32.mrb[69].mxu0 }
 0x185   : > { %v2378_v14 = vadd.f32 %v6829_v43, %v2052_v47  ;;  %v2321_v45 = vpop.f32.mrb[73].mxu1  ;;  %v6860_v12 = vpop.f32.mrb[70].mxu0  ;;  %v3415_v43 = vld [vmem:[#allocation2 + $0x8] sm:$0xff] }
 0x186   : > { %v2870_v49 = vld [vmem:[#allocation2 + $0xb0] sm:$0xff]  ;;  %v2376_v54 = vadd.f32 %v2321_v45, %v2050_v61  ;;  %v6830_v42 = vpop.f32.mrb[74].mxu1  ;;  %v3098_v25 = vpop.f32.mrb[71].mxu0 }
 0x187   : > { %v3164_v46 = vadd.f32 %v6859_v41, %v2870_v49  ;;  %2410 = vst.msk [vmem:[#allocation2 + $0xd0] sm:$0xff] %vm172_vm9, %v2378_v14  ;;  %v2868_v57 = vld [vmem:[#allocation2 + $0xa0] sm:$0xff]  ;;  %v2379_v24 = vadd.f32 %v6830_v42, %v2053_v48  ;;  %v2324_v8 = vpop.f32.mrb[75].mxu1  ;;  %v3420_v48 = vld [vmem:[#allocation2 + $0x30] sm:$0xff] }
 0x188   : > { %v3162_v34 = vadd.f32 %v3095_v52, %v2868_v57  ;;  %2408 = vst.msk [vmem:[#allocation2 + $0xc0] sm:$0xff] %vm172_vm9, %v2376_v54  ;;  %v2871_v40 = vld [vmem:[#allocation2 + $0xb8] sm:$0xff]  ;;  %v2377_v51 = vadd.f32 %v2324_v8, %v2051_v7  ;;  %v3418_v57 = vld [vmem:[#allocation2 + $0x20] sm:$0xff] }
 0x189   : > { %3196 = vst.msk [vmem:[#allocation2 + $0xb0] sm:$0xff] %vm172_vm9, %v3164_v46  ;;  %v3165_v44 = vadd.f32 %v6860_v12, %v2871_v40  ;;  %2411 = vst.msk [vmem:[#allocation2 + $0xd8] sm:$0xff] %vm172_vm9, %v2379_v24  ;;  %v2869_v20 = vld [vmem:[#allocation2 + $0xa8] sm:$0xff]  ;;  %v3421_v40 = vld [vmem:[#allocation2 + $0x38] sm:$0xff] }
 0x18a   : > { %3194 = vst.msk [vmem:[#allocation2 + $0xa0] sm:$0xff] %vm172_vm9, %v3162_v34  ;;  %v3163_v36 = vadd.f32 %v3098_v25, %v2869_v20  ;;  %2409 = vst.msk [vmem:[#allocation2 + $0xc8] sm:$0xff] %vm172_vm9, %v2377_v51 }
 0x18b   : > { %3197 = vst.msk [vmem:[#allocation2 + $0xb8] sm:$0xff] %vm172_vm9, %v3165_v44 }
 0x18c   : > { %v6863_v3 = vpop.f32.mrb[72].mxu0  ;;  %3195 = vst.msk [vmem:[#allocation2 + $0xa8] sm:$0xff] %vm172_vm9, %v3163_v36  ;;  %v6833_v59 = vpop.f32.mrb[76].mxu1 }
 0x18d   : > { %v3111_v16 = vpop.f32.mrb[73].mxu0  ;;  %v2382_v9 = vadd.f32 %v6833_v59, %v2056_v53  ;;  %v2337_v35 = vpop.f32.mrb[77].mxu1 }
 0x18e   : > { %v6864_v50 = vpop.f32.mrb[74].mxu0  ;;  %v2874_v56 = vld [vmem:[#allocation2 + $0xd0] sm:$0xff]  ;;  %v2380_v60 = vadd.f32 %v2337_v35, %v2054_v39  ;;  %v6834_v6 = vpop.f32.mrb[78].mxu1 }
 0x18f   : > { %v3114_v21 = vpop.f32.mrb[75].mxu0  ;;  %v3168_v27 = vadd.f32 %v6863_v3, %v2874_v56  ;;  %2414 = vst.msk [vmem:[#allocation2 + $0xf0] sm:$0xff] %vm172_vm9, %v2382_v9  ;;  %v2872_v63 = vld [vmem:[#allocation2 + $0xc0] sm:$0xff]  ;;  %v2383_v23 = vadd.f32 %v6834_v6, %v2057_v4  ;;  %v2340_v2 = vpop.f32.mrb[79].mxu1  ;;  %v3419_v3 = vld [vmem:[#allocation2 + $0x28] sm:$0xff]  ;;  %v3424_v4 = vld [vmem:[#allocation2 + $0x50] sm:$0xff] }
 0x190   : > { %v3166_v5 = vadd.f32 %v3111_v16, %v2872_v63  ;;  %2412 = vst.msk [vmem:[#allocation2 + $0xe0] sm:$0xff] %vm172_vm9, %v2380_v60  ;;  %v2875_v0 = vld [vmem:[#allocation2 + $0xd8] sm:$0xff]  ;;  %v2381_v13 = vadd.f32 %v2340_v2, %v2055_v29  ;;  %v3422_v63 = vld [vmem:[#allocation2 + $0x40] sm:$0xff] }
 0x191   : > { %3200 = vst.msk [vmem:[#allocation2 + $0xd0] sm:$0xff] %vm172_vm9, %v3168_v27  ;;  %v3169_v10 = vadd.f32 %v6864_v50, %v2875_v0  ;;  %2415 = vst.msk [vmem:[#allocation2 + $0xf8] sm:$0xff] %vm172_vm9, %v2383_v23  ;;  %v2873_v30 = vld [vmem:[#allocation2 + $0xc8] sm:$0xff]  ;;  %v3425_v0 = vld [vmem:[#allocation2 + $0x58] sm:$0xff] }
 0x192   : > { %3198 = vst.msk [vmem:[#allocation2 + $0xc0] sm:$0xff] %vm172_vm9, %v3166_v5  ;;  %v3167_v62 = vadd.f32 %v3114_v21, %v2873_v30  ;;  %2413 = vst.msk [vmem:[#allocation2 + $0xe8] sm:$0xff] %vm172_vm9, %v2381_v13 }
 0x193   : > { %3201 = vst.msk [vmem:[#allocation2 + $0xd8] sm:$0xff] %vm172_vm9, %v3169_v10 }
 0x194   : > { %v6867_v15 = vpop.f32.mrb[76].mxu0  ;;  %3199 = vst.msk [vmem:[#allocation2 + $0xc8] sm:$0xff] %vm172_vm9, %v3167_v62 }
 0x195   : > { %v3127_v32 = vpop.f32.mrb[77].mxu0 }
 0x196   : > { %v6873_v28 = vpop.f32.mrb[80].mxu1  ;;  %v6868_v1 = vpop.f32.mrb[78].mxu0  ;;  %v2878_v11 = vld [vmem:[#allocation2 + $0xf0] sm:$0xff] }
 0x197   : > { %v3710_v33 = vadd.f32 %v6873_v28, %v3416_v55  ;;  %v3581_v26 = vpop.f32.mrb[81].mxu1  ;;  %v3130_v58 = vpop.f32.mrb[79].mxu0  ;;  %v3172_v37 = vadd.f32 %v6867_v15, %v2878_v11  ;;  %v2876_v17 = vld [vmem:[#allocation2 + $0xe0] sm:$0xff]  ;;  %v3423_v15 = vld [vmem:[#allocation2 + $0x48] sm:$0xff] }
 0x198   : > { %v3708_v38 = vadd.f32 %v3581_v26, %v3414_v31  ;;  %v6874_v22 = vpop.f32.mrb[82].mxu1  ;;  %v3170_v18 = vadd.f32 %v3127_v32, %v2876_v17  ;;  %v2879_v41 = vld [vmem:[#allocation2 + $0xf8] sm:$0xff] }
 0x199   : > { %3742 = vst.msk [vmem:[#allocation2 + $0x10] sm:$0xff] %vm172_vm9, %v3710_v33  ;;  %v3711_v47 = vadd.f32 %v6874_v22, %v3417_v19  ;;  %v3584_v52 = vpop.f32.mrb[83].mxu1  ;;  %3204 = vst.msk [vmem:[#allocation2 + $0xf0] sm:$0xff] %vm172_vm9, %v3172_v37  ;;  %v3173_v14 = vadd.f32 %v6868_v1, %v2879_v41  ;;  %v2877_v61 = vld [vmem:[#allocation2 + $0xe8] sm:$0xff]  ;;  %v3428_v37 = vld [vmem:[#allocation2 + $0x70] sm:$0xff] }
 0x19a   : > { %3740 = vst.msk [vmem:[#allocation2] sm:$0xff] %vm172_vm9, %v3708_v38  ;;  %v3709_v45 = vadd.f32 %v3584_v52, %v3415_v43  ;;  %3202 = vst.msk [vmem:[#allocation2 + $0xe0] sm:$0xff] %vm172_vm9, %v3170_v18  ;;  %v3171_v12 = vadd.f32 %v3130_v58, %v2877_v61  ;;  %v3426_v22 = vld [vmem:[#allocation2 + $0x60] sm:$0xff]  ;;  %v3429_v52 = vld [vmem:[#allocation2 + $0x78] sm:$0xff] }
 0x19b   : > { %3743 = vst.msk [vmem:[#allocation2 + $0x18] sm:$0xff] %vm172_vm9, %v3711_v47  ;;  %3205 = vst.msk [vmem:[#allocation2 + $0xf8] sm:$0xff] %vm172_vm9, %v3173_v14 }
 0x19c   : > { %3741 = vst.msk [vmem:[#allocation2 + $0x8] sm:$0xff] %vm172_vm9, %v3709_v45  ;;  %v6907_v49 = vpop.f32.mrb[80].mxu0  ;;  %3203 = vst.msk [vmem:[#allocation2 + $0xe8] sm:$0xff] %vm172_vm9, %v3171_v12 }
 0x19d   : > { %v4004_v54 = vpop.f32.mrb[81].mxu0 }
 0x19e   : > { %v6877_v42 = vpop.f32.mrb[84].mxu1  ;;  %v6908_v25 = vpop.f32.mrb[82].mxu0 }
 0x19f   : > { %v3714_v46 = vadd.f32 %v6877_v42, %v3420_v48  ;;  %v3597_v24 = vpop.f32.mrb[85].mxu1  ;;  %v4007_v7 = vpop.f32.mrb[83].mxu0 }
 0x1a0   : > { %v3807_v8 = vld [vmem:[#allocation2 + $0x10] sm:$0xff]  ;;  %v3712_v34 = vadd.f32 %v3597_v24, %v3418_v57  ;;  %v6878_v51 = vpop.f32.mrb[86].mxu1 }
 0x1a1   : > { %v4133_v44 = vadd.f32 %v6907_v49, %v3807_v8  ;;  %3746 = vst.msk [vmem:[#allocation2 + $0x30] sm:$0xff] %vm172_vm9, %v3714_v46  ;;  %v3805_v20 = vld [vmem:[#allocation2] sm:$0xff]  ;;  %v3715_v36 = vadd.f32 %v6878_v51, %v3421_v40  ;;  %v3600_v53 = vpop.f32.mrb[87].mxu1  ;;  %v3427_v49 = vld [vmem:[#allocation2 + $0x68] sm:$0xff] }
 0x1a2   : > { %v4131_v59 = vadd.f32 %v4004_v54, %v3805_v20  ;;  %3744 = vst.msk [vmem:[#allocation2 + $0x20] sm:$0xff] %vm172_vm9, %v3712_v34  ;;  %v3808_v16 = vld [vmem:[#allocation2 + $0x18] sm:$0xff]  ;;  %v3713_v9 = vadd.f32 %v3600_v53, %v3419_v3  ;;  %v3432_v34 = vld [vmem:[#allocation2 + $0x90] sm:$0xff]  ;;  %v3430_v20 = vld [vmem:[#allocation2 + $0x80] sm:$0xff] }
 0x1a3   : > { %4165 = vst.msk [vmem:[#allocation2 + $0x10] sm:$0xff] %vm172_vm9, %v4133_v44  ;;  %v4134_v39 = vadd.f32 %v6908_v25, %v3808_v16  ;;  %3747 = vst.msk [vmem:[#allocation2 + $0x38] sm:$0xff] %vm172_vm9, %v3715_v36  ;;  %v3806_v35 = vld [vmem:[#allocation2 + $0x8] sm:$0xff]  ;;  %v3433_v16 = vld [vmem:[#allocation2 + $0x98] sm:$0xff] }
 0x1a4   : > { %4163 = vst.msk [vmem:[#allocation2] sm:$0xff] %vm172_vm9, %v4131_v59  ;;  %v4132_v50 = vadd.f32 %v4007_v7, %v3806_v35  ;;  %3745 = vst.msk [vmem:[#allocation2 + $0x28] sm:$0xff] %vm172_vm9, %v3713_v9  ;;  %v6911_v56 = vpop.f32.mrb[84].mxu0 }
 0x1a5   : > { %4166 = vst.msk [vmem:[#allocation2 + $0x18] sm:$0xff] %vm172_vm9, %v4134_v39  ;;  %v4020_v60 = vpop.f32.mrb[85].mxu0 }
 0x1a6   : > { %4164 = vst.msk [vmem:[#allocation2 + $0x8] sm:$0xff] %vm172_vm9, %v4132_v50  ;;  %v6881_v6 = vpop.f32.mrb[88].mxu1  ;;  %v6912_v21 = vpop.f32.mrb[86].mxu0 }
 0x1a7   : > { %v3718_v27 = vadd.f32 %v6881_v6, %v3424_v4  ;;  %v3613_v23 = vpop.f32.mrb[89].mxu1  ;;  %v4023_v29 = vpop.f32.mrb[87].mxu0 }
 0x1a8   : > { %v3811_v2 = vld [vmem:[#allocation2 + $0x30] sm:$0xff]  ;;  %v3716_v5 = vadd.f32 %v3613_v23, %v3422_v63  ;;  %v6882_v13 = vpop.f32.mrb[90].mxu1 }
 0x1a9   : > { %v4137_v10 = vadd.f32 %v6911_v56, %v3811_v2  ;;  %3750 = vst.msk [vmem:[#allocation2 + $0x50] sm:$0xff] %vm172_vm9, %v3718_v27  ;;  %v3809_v30 = vld [vmem:[#allocation2 + $0x20] sm:$0xff]  ;;  %v3719_v62 = vadd.f32 %v6882_v13, %v3425_v0  ;;  %v3616_v32 = vpop.f32.mrb[91].mxu1  ;;  %v3431_v56 = vld [vmem:[#allocation2 + $0x88] sm:$0xff] }
 0x1aa   : > { %v4135_v55 = vadd.f32 %v4020_v60, %v3809_v30  ;;  %3748 = vst.msk [vmem:[#allocation2 + $0x40] sm:$0xff] %vm172_vm9, %v3716_v5  ;;  %v3812_v28 = vld [vmem:[#allocation2 + $0x38] sm:$0xff]  ;;  %v3717_v1 = vadd.f32 %v3616_v32, %v3423_v15  ;;  %v3436_v5 = vld [vmem:[#allocation2 + $0xb0] sm:$0xff]  ;;  %v3434_v30 = vld [vmem:[#allocation2 + $0xa0] sm:$0xff] }
 0x1ab   : > { %4169 = vst.msk [vmem:[#allocation2 + $0x30] sm:$0xff] %vm172_vm9, %v4137_v10  ;;  %v4138_v11 = vadd.f32 %v6912_v21, %v3812_v28  ;;  %3751 = vst.msk [vmem:[#allocation2 + $0x58] sm:$0xff] %vm172_vm9, %v3719_v62  ;;  %v3810_v33 = vld [vmem:[#allocation2 + $0x28] sm:$0xff]  ;;  %v3437_v28 = vld [vmem:[#allocation2 + $0xb8] sm:$0xff] }
 0x1ac   : > { %4167 = vst.msk [vmem:[#allocation2 + $0x20] sm:$0xff] %vm172_vm9, %v4135_v55  ;;  %v4136_v31 = vadd.f32 %v4023_v29, %v3810_v33  ;;  %3749 = vst.msk [vmem:[#allocation2 + $0x48] sm:$0xff] %vm172_vm9, %v3717_v1  ;;  %v6915_v26 = vpop.f32.mrb[88].mxu0 }
 0x1ad   : > { %4170 = vst.msk [vmem:[#allocation2 + $0x38] sm:$0xff] %vm172_vm9, %v4138_v11  ;;  %v4036_v58 = vpop.f32.mrb[89].mxu0 }
 0x1ae   : > { %4168 = vst.msk [vmem:[#allocation2 + $0x28] sm:$0xff] %vm172_vm9, %v4136_v31  ;;  %v6885_v17 = vpop.f32.mrb[92].mxu1  ;;  %v6916_v38 = vpop.f32.mrb[90].mxu0 }
 0x1af   : > { %v3722_v19 = vadd.f32 %v6885_v17, %v3428_v37  ;;  %v3629_v18 = vpop.f32.mrb[93].mxu1  ;;  %v4039_v41 = vpop.f32.mrb[91].mxu0 }
 0x1b0   : > { %v3815_v47 = vld [vmem:[#allocation2 + $0x50] sm:$0xff]  ;;  %v3720_v43 = vadd.f32 %v3629_v18, %v3426_v22  ;;  %v6886_v14 = vpop.f32.mrb[94].mxu1 }
 0x1b1   : > { %v4141_v61 = vadd.f32 %v6915_v26, %v3815_v47  ;;  %3754 = vst.msk [vmem:[#allocation2 + $0x70] sm:$0xff] %vm172_vm9, %v3722_v19  ;;  %v3813_v45 = vld [vmem:[#allocation2 + $0x40] sm:$0xff]  ;;  %v3723_v12 = vadd.f32 %v6886_v14, %v3429_v52  ;;  %v3632_v54 = vpop.f32.mrb[95].mxu1  ;;  %v3435_v26 = vld [vmem:[#allocation2 + $0xa8] sm:$0xff] }
 0x1b2   : > { %v4139_v48 = vadd.f32 %v4036_v58, %v3813_v45  ;;  %3752 = vst.msk [vmem:[#allocation2 + $0x60] sm:$0xff] %vm172_vm9, %v3720_v43  ;;  %v3816_v42 = vld [vmem:[#allocation2 + $0x58] sm:$0xff]  ;;  %v3721_v25 = vadd.f32 %v3632_v54, %v3427_v49  ;;  %v3440_v43 = vld [vmem:[#allocation2 + $0xd0] sm:$0xff]  ;;  %v3438_v45 = vld [vmem:[#allocation2 + $0xc0] sm:$0xff] }
 0x1b3   : > { %4173 = vst.msk [vmem:[#allocation2 + $0x50] sm:$0xff] %vm172_vm9, %v4141_v61  ;;  %v4142_v46 = vadd.f32 %v6916_v38, %v3816_v42  ;;  %3755 = vst.msk [vmem:[#allocation2 + $0x78] sm:$0xff] %vm172_vm9, %v3723_v12  ;;  %v3814_v57 = vld [vmem:[#allocation2 + $0x48] sm:$0xff]  ;;  %v3441_v42 = vld [vmem:[#allocation2 + $0xd8] sm:$0xff] }
 0x1b4   : > { %4171 = vst.msk [vmem:[#allocation2 + $0x40] sm:$0xff] %vm172_vm9, %v4139_v48  ;;  %v4140_v24 = vadd.f32 %v4039_v41, %v3814_v57  ;;  %3753 = vst.msk [vmem:[#allocation2 + $0x68] sm:$0xff] %vm172_vm9, %v3721_v25  ;;  %v6919_v7 = vpop.f32.mrb[92].mxu0 }
 0x1b5   : > { %4174 = vst.msk [vmem:[#allocation2 + $0x58] sm:$0xff] %vm172_vm9, %v4142_v46  ;;  %v4052_v8 = vpop.f32.mrb[93].mxu0 }
 0x1b6   : > { %4172 = vst.msk [vmem:[#allocation2 + $0x48] sm:$0xff] %vm172_vm9, %v4140_v24  ;;  %v6889_v40 = vpop.f32.mrb[96].mxu1  ;;  %v6920_v51 = vpop.f32.mrb[94].mxu0 }
 0x1b7   : > { %v3726_v44 = vadd.f32 %v6889_v40, %v3432_v34  ;;  %v3645_v36 = vpop.f32.mrb[97].mxu1  ;;  %v4055_v3 = vpop.f32.mrb[95].mxu0 }
 0x1b8   : > { %v3819_v53 = vld [vmem:[#allocation2 + $0x70] sm:$0xff]  ;;  %v3724_v59 = vadd.f32 %v3645_v36, %v3430_v20  ;;  %v6890_v9 = vpop.f32.mrb[98].mxu1 }
 0x1b9   : > { %v4145_v39 = vadd.f32 %v6919_v7, %v3819_v53  ;;  %3758 = vst.msk [vmem:[#allocation2 + $0x90] sm:$0xff] %vm172_vm9, %v3726_v44  ;;  %v3817_v35 = vld [vmem:[#allocation2 + $0x60] sm:$0xff]  ;;  %v3727_v50 = vadd.f32 %v6890_v9, %v3433_v16  ;;  %v3648_v60 = vpop.f32.mrb[99].mxu1  ;;  %v3439_v7 = vld [vmem:[#allocation2 + $0xc8] sm:$0xff] }
 0x1ba   : > { %v4143_v4 = vadd.f32 %v4052_v8, %v3817_v35  ;;  %3756 = vst.msk [vmem:[#allocation2 + $0x80] sm:$0xff] %vm172_vm9, %v3724_v59  ;;  %v3820_v6 = vld [vmem:[#allocation2 + $0x78] sm:$0xff]  ;;  %v3725_v21 = vadd.f32 %v3648_v60, %v3431_v56  ;;  %v3444_v59 = vld [vmem:[#allocation2 + $0xf0] sm:$0xff]  ;;  %v3442_v35 = vld [vmem:[#allocation2 + $0xe0] sm:$0xff] }
 0x1bb   : > { %4177 = vst.msk [vmem:[#allocation2 + $0x70] sm:$0xff] %vm172_vm9, %v4145_v39  ;;  %v4146_v27 = vadd.f32 %v6920_v51, %v3820_v6  ;;  %3759 = vst.msk [vmem:[#allocation2 + $0x98] sm:$0xff] %vm172_vm9, %v3727_v50  ;;  %v3818_v63 = vld [vmem:[#allocation2 + $0x68] sm:$0xff]  ;;  %v3445_v6 = vld [vmem:[#allocation2 + $0xf8] sm:$0xff] }
 0x1bc   : > { %4175 = vst.msk [vmem:[#allocation2 + $0x60] sm:$0xff] %vm172_vm9, %v4143_v4  ;;  %v4144_v23 = vadd.f32 %v4055_v3, %v3818_v63  ;;  %3757 = vst.msk [vmem:[#allocation2 + $0x88] sm:$0xff] %vm172_vm9, %v3725_v21 }
 0x1bd   : > { %4178 = vst.msk [vmem:[#allocation2 + $0x78] sm:$0xff] %vm172_vm9, %v4146_v27 }
 0x1be   : > { %4176 = vst.msk [vmem:[#allocation2 + $0x68] sm:$0xff] %vm172_vm9, %v4144_v23  ;;  %v6893_v0 = vpop.f32.mrb[100].mxu1 }
 0x1bf   : > { %v6923_v29 = vpop.f32.mrb[96].mxu0  ;;  %v3730_v10 = vadd.f32 %v6893_v0, %v3436_v5  ;;  %v3661_v62 = vpop.f32.mrb[101].mxu1 }
 0x1c0   : > { %v4068_v2 = vpop.f32.mrb[97].mxu0  ;;  %v3823_v32 = vld [vmem:[#allocation2 + $0x90] sm:$0xff]  ;;  %v3728_v55 = vadd.f32 %v3661_v62, %v3434_v30  ;;  %v6894_v1 = vpop.f32.mrb[102].mxu1 }
 0x1c1   : > { %v6924_v13 = vpop.f32.mrb[98].mxu0  ;;  %v4149_v11 = vadd.f32 %v6923_v29, %v3823_v32  ;;  %3762 = vst.msk [vmem:[#allocation2 + $0xb0] sm:$0xff] %vm172_vm9, %v3730_v10  ;;  %v3821_v33 = vld [vmem:[#allocation2 + $0x80] sm:$0xff]  ;;  %v3731_v31 = vadd.f32 %v6894_v1, %v3437_v28  ;;  %v3664_v58 = vpop.f32.mrb[103].mxu1  ;;  %v3443_v29 = vld [vmem:[#allocation2 + $0xe8] sm:$0xff] }
 0x1c2   : > { %v4071_v15 = vpop.f32.mrb[99].mxu0  ;;  %v4147_v37 = vadd.f32 %v4068_v2, %v3821_v33  ;;  %3760 = vst.msk [vmem:[#allocation2 + $0xa0] sm:$0xff] %vm172_vm9, %v3728_v55  ;;  %v3824_v17 = vld [vmem:[#allocation2 + $0x98] sm:$0xff]  ;;  %v3729_v38 = vadd.f32 %v3664_v58, %v3435_v26  ;;  %v4629_v55 = vld [vmem:[#allocation2 + $0x10] sm:$0xff]  ;;  %v4627_v33 = vld [vmem:[#allocation2] sm:$0xff] }
 0x1c3   : > { %4181 = vst.msk [vmem:[#allocation2 + $0x90] sm:$0xff] %vm172_vm9, %v4149_v11  ;;  %v4150_v19 = vadd.f32 %v6924_v13, %v3824_v17  ;;  %3763 = vst.msk [vmem:[#allocation2 + $0xb8] sm:$0xff] %vm172_vm9, %v3731_v31  ;;  %v3822_v22 = vld [vmem:[#allocation2 + $0x88] sm:$0xff]  ;;  %v4630_v17 = vld [vmem:[#allocation2 + $0x18] sm:$0xff] }
 0x1c4   : > { %4179 = vst.msk [vmem:[#allocation2 + $0x80] sm:$0xff] %vm172_vm9, %v4147_v37  ;;  %v4148_v18 = vadd.f32 %v4071_v15, %v3822_v22  ;;  %3761 = vst.msk [vmem:[#allocation2 + $0xa8] sm:$0xff] %vm172_vm9, %v3729_v38 }
 0x1c5   : > { %4182 = vst.msk [vmem:[#allocation2 + $0x98] sm:$0xff] %vm172_vm9, %v4150_v19 }
 0x1c6   : > { %4180 = vst.msk [vmem:[#allocation2 + $0x88] sm:$0xff] %vm172_vm9, %v4148_v18 }
 0x1c7   : > { %v6927_v41 = vpop.f32.mrb[100].mxu0  ;;  %v6897_v52 = vpop.f32.mrb[104].mxu1 }
 0x1c8   : > { %v4084_v47 = vpop.f32.mrb[101].mxu0  ;;  %v3734_v61 = vadd.f32 %v6897_v52, %v3440_v43  ;;  %v3677_v12 = vpop.f32.mrb[105].mxu1  ;;  %v3827_v54 = vld [vmem:[#allocation2 + $0xb0] sm:$0xff] }
 0x1c9   : > { %v6928_v14 = vpop.f32.mrb[102].mxu0  ;;  %v3732_v48 = vadd.f32 %v3677_v12, %v3438_v45  ;;  %v6898_v25 = vpop.f32.mrb[106].mxu1  ;;  %v4153_v46 = vadd.f32 %v6927_v41, %v3827_v54  ;;  %v3825_v57 = vld [vmem:[#allocation2 + $0xa0] sm:$0xff]  ;;  %v4628_v41 = vld [vmem:[#allocation2 + $0x8] sm:$0xff] }
 0x1ca   : > { %v4087_v49 = vpop.f32.mrb[103].mxu0  ;;  %3766 = vst.msk [vmem:[#allocation2 + $0xd0] sm:$0xff] %vm172_vm9, %v3734_v61  ;;  %v3735_v24 = vadd.f32 %v6898_v25, %v3441_v42  ;;  %v3680_v8 = vpop.f32.mrb[107].mxu1  ;;  %v4151_v34 = vadd.f32 %v4084_v47, %v3825_v57  ;;  %v3828_v40 = vld [vmem:[#allocation2 + $0xb8] sm:$0xff]  ;;  %v4631_v57 = vld [vmem:[#allocation2 + $0x20] sm:$0xff] }
 0x1cb   : > { %3764 = vst.msk [vmem:[#allocation2 + $0xc0] sm:$0xff] %vm172_vm9, %v3732_v48  ;;  %v3733_v51 = vadd.f32 %v3680_v8, %v3439_v7  ;;  %4185 = vst.msk [vmem:[#allocation2 + $0xb0] sm:$0xff] %vm172_vm9, %v4153_v46  ;;  %v4154_v44 = vadd.f32 %v6928_v14, %v3828_v40  ;;  %v3826_v20 = vld [vmem:[#allocation2 + $0xa8] sm:$0xff]  ;;  %v4633_v48 = vld [vmem:[#allocation2 + $0x30] sm:$0xff] }
 0x1cc   : > { %3767 = vst.msk [vmem:[#allocation2 + $0xd8] sm:$0xff] %vm172_vm9, %v3735_v24  ;;  %4183 = vst.msk [vmem:[#allocation2 + $0xa0] sm:$0xff] %vm172_vm9, %v4151_v34  ;;  %v4152_v36 = vadd.f32 %v4087_v49, %v3826_v20  ;;  %v4634_v40 = vld [vmem:[#allocation2 + $0x38] sm:$0xff] }
 0x1cd   : > { %3765 = vst.msk [vmem:[#allocation2 + $0xc8] sm:$0xff] %vm172_vm9, %v3733_v51  ;;  %4186 = vst.msk [vmem:[#allocation2 + $0xb8] sm:$0xff] %vm172_vm9, %v4154_v44 }
 0x1ce   : > { %4184 = vst.msk [vmem:[#allocation2 + $0xa8] sm:$0xff] %vm172_vm9, %v4152_v36 }
 0x1cf   : > { %v6931_v3 = vpop.f32.mrb[104].mxu0  ;;  %v6901_v16 = vpop.f32.mrb[108].mxu1 }
 0x1d0   : > { %v4100_v53 = vpop.f32.mrb[105].mxu0  ;;  %v3738_v39 = vadd.f32 %v6901_v16, %v3444_v59  ;;  %v3693_v50 = vpop.f32.mrb[109].mxu1 }
 0x1d1   : > { %v6932_v9 = vpop.f32.mrb[106].mxu0  ;;  %v3831_v60 = vld [vmem:[#allocation2 + $0xd0] sm:$0xff]  ;;  %v3736_v4 = vadd.f32 %v3693_v50, %v3442_v35  ;;  %v6902_v21 = vpop.f32.mrb[110].mxu1 }
 0x1d2   : > { %v4103_v56 = vpop.f32.mrb[107].mxu0  ;;  %v4157_v27 = vadd.f32 %v6931_v3, %v3831_v60  ;;  %3770 = vst.msk [vmem:[#allocation2 + $0xf0] sm:$0xff] %vm172_vm9, %v3738_v39  ;;  %v3829_v63 = vld [vmem:[#allocation2 + $0xc0] sm:$0xff]  ;;  %v3739_v23 = vadd.f32 %v6902_v21, %v3445_v6  ;;  %v3696_v2 = vpop.f32.mrb[111].mxu1  ;;  %v4632_v3 = vld [vmem:[#allocation2 + $0x28] sm:$0xff] }
 0x1d3   : > { %v4155_v5 = vadd.f32 %v4100_v53, %v3829_v63  ;;  %3768 = vst.msk [vmem:[#allocation2 + $0xe0] sm:$0xff] %vm172_vm9, %v3736_v4  ;;  %v3832_v0 = vld [vmem:[#allocation2 + $0xd8] sm:$0xff]  ;;  %v3737_v13 = vadd.f32 %v3696_v2, %v3443_v29  ;;  %v4637_v4 = vld [vmem:[#allocation2 + $0x50] sm:$0xff]  ;;  %v4635_v63 = vld [vmem:[#allocation2 + $0x40] sm:$0xff] }
 0x1d4   : > { %4189 = vst.msk [vmem:[#allocation2 + $0xd0] sm:$0xff] %vm172_vm9, %v4157_v27  ;;  %v4158_v10 = vadd.f32 %v6932_v9, %v3832_v0  ;;  %3771 = vst.msk [vmem:[#allocation2 + $0xf8] sm:$0xff] %vm172_vm9, %v3739_v23  ;;  %v3830_v30 = vld [vmem:[#allocation2 + $0xc8] sm:$0xff]  ;;  %v8681_v2 = vld [vmem:[%s8842_s2] ss:$0 sm:$0xff] }
 0x1d5   : > { %4187 = vst.msk [vmem:[#allocation2 + $0xc0] sm:$0xff] %vm172_vm9, %v4155_v5  ;;  %v4156_v62 = vadd.f32 %v4103_v56, %v3830_v30  ;;  %3769 = vst.msk [vmem:[#allocation2 + $0xe8] sm:$0xff] %vm172_vm9, %v3737_v13  ;;  %v4638_v13 = vld [vmem:[#allocation2 + $0x58] sm:$0xff] }
 0x1d6   : > { %4190 = vst.msk [vmem:[#allocation2 + $0xd8] sm:$0xff] %vm172_vm9, %v4158_v10 }
 0x1d7   : > { %v6935_v15 = vpop.f32.mrb[108].mxu0  ;;  %4188 = vst.msk [vmem:[#allocation2 + $0xc8] sm:$0xff] %vm172_vm9, %v4156_v62  ;;  %v6941_v28 = vpop.f32.mrb[112].mxu1 }
 0x1d8   : > { %v4116_v32 = vpop.f32.mrb[109].mxu0  ;;  %v4923_v11 = vadd.f32 %v6941_v28, %v4629_v55  ;;  %v4794_v31 = vpop.f32.mrb[113].mxu1 }
 0x1d9   : > { %v6936_v1 = vpop.f32.mrb[110].mxu0  ;;  %v3835_v58 = vld [vmem:[#allocation2 + $0xf0] sm:$0xff]  ;;  %v4921_v37 = vadd.f32 %v4794_v31, %v4627_v33  ;;  %v6942_v38 = vpop.f32.mrb[114].mxu1 }
 0x1da   : > { %v4119_v26 = vpop.f32.mrb[111].mxu0  ;;  %v4161_v19 = vadd.f32 %v6935_v15, %v3835_v58  ;;  %v3833_v22 = vld [vmem:[#allocation2 + $0xe0] sm:$0xff]  ;;  %4955 = vst.msk [vmem:[#allocation2 + $0x10] sm:$0xff] %vm172_vm9, %v4923_v11  ;;  %v4924_v18 = vadd.f32 %v6942_v38, %v4630_v17  ;;  %v4797_v47 = vpop.f32.mrb[115].mxu1 }
 0x1db   : > { %v4159_v43 = vadd.f32 %v4116_v32, %v3833_v22  ;;  %v3836_v52 = vld [vmem:[#allocation2 + $0xf8] sm:$0xff]  ;;  %4953 = vst.msk [vmem:[#allocation2] sm:$0xff] %vm172_vm9, %v4921_v37  ;;  %v4922_v14 = vadd.f32 %v4797_v47, %v4628_v41  ;;  %v4636_v32 = vld [vmem:[#allocation2 + $0x48] sm:$0xff] }
 0x1dc   : > { %4193 = vst.msk [vmem:[#allocation2 + $0xf0] sm:$0xff] %vm172_vm9, %v4161_v19  ;;  %v4162_v61 = vadd.f32 %v6936_v1, %v3836_v52  ;;  %v3834_v45 = vld [vmem:[#allocation2 + $0xe8] sm:$0xff]  ;;  %4956 = vst.msk [vmem:[#allocation2 + $0x18] sm:$0xff] %vm172_vm9, %v4924_v18 }
 0x1dd   : > { %4191 = vst.msk [vmem:[#allocation2 + $0xe0] sm:$0xff] %vm172_vm9, %v4159_v43  ;;  %v4160_v12 = vadd.f32 %v4119_v26, %v3834_v45  ;;  %4954 = vst.msk [vmem:[#allocation2 + $0x8] sm:$0xff] %vm172_vm9, %v4922_v14 }
 0x1de   : > { %4194 = vst.msk [vmem:[#allocation2 + $0xf8] sm:$0xff] %vm172_vm9, %v4162_v61  ;;  %v4641_v61 = vld [vmem:[#allocation2 + $0x70] sm:$0xff] }
 0x1df   : > { %v6975_v49 = vpop.f32.mrb[112].mxu0  ;;  %4192 = vst.msk [vmem:[#allocation2 + $0xe8] sm:$0xff] %vm172_vm9, %v4160_v12  ;;  %v6945_v42 = vpop.f32.mrb[116].mxu1 }
 0x1e0   : > { %v5360_v54 = vpop.f32.mrb[113].mxu0  ;;  %v4927_v46 = vadd.f32 %v6945_v42, %v4633_v48  ;;  %v4810_v24 = vpop.f32.mrb[117].mxu1  ;;  %v4639_v42 = vld [vmem:[#allocation2 + $0x60] sm:$0xff] }
 0x1e1   : > { %v6976_v25 = vpop.f32.mrb[114].mxu0  ;;  %v5195_v8 = vld [vmem:[#allocation2 + $0x10] sm:$0xff]  ;;  %v4925_v34 = vadd.f32 %v4810_v24, %v4631_v57  ;;  %v6946_v51 = vpop.f32.mrb[118].mxu1 }
 0x1e2   : > { %v5363_v7 = vpop.f32.mrb[115].mxu0  ;;  %v5489_v44 = vadd.f32 %v6975_v49, %v5195_v8  ;;  %4959 = vst.msk [vmem:[#allocation2 + $0x30] sm:$0xff] %vm172_vm9, %v4927_v46  ;;  %v5193_v20 = vld [vmem:[#allocation2] sm:$0xff]  ;;  %v4928_v36 = vadd.f32 %v6946_v51, %v4634_v40  ;;  %v4813_v53 = vpop.f32.mrb[119].mxu1 }
 0x1e3   : > { %v5487_v59 = vadd.f32 %v5360_v54, %v5193_v20  ;;  %4957 = vst.msk [vmem:[#allocation2 + $0x20] sm:$0xff] %vm172_vm9, %v4925_v34  ;;  %v5196_v16 = vld [vmem:[#allocation2 + $0x18] sm:$0xff]  ;;  %v4926_v9 = vadd.f32 %v4813_v53, %v4632_v3  ;;  %v4640_v3 = vld [vmem:[#allocation2 + $0x68] sm:$0xff] }
 0x1e4   : > { %5521 = vst.msk [vmem:[#allocation2 + $0x10] sm:$0xff] %vm172_vm9, %v5489_v44  ;;  %v5490_v39 = vadd.f32 %v6976_v25, %v5196_v16  ;;  %4960 = vst.msk [vmem:[#allocation2 + $0x38] sm:$0xff] %vm172_vm9, %v4928_v36  ;;  %v5194_v35 = vld [vmem:[#allocation2 + $0x8] sm:$0xff]  ;;  %v4642_v34 = vld [vmem:[#allocation2 + $0x78] sm:$0xff] }
 0x1e5   : > { %5519 = vst.msk [vmem:[#allocation2] sm:$0xff] %vm172_vm9, %v5487_v59  ;;  %v5488_v50 = vadd.f32 %v5363_v7, %v5194_v35  ;;  %4958 = vst.msk [vmem:[#allocation2 + $0x28] sm:$0xff] %vm172_vm9, %v4926_v9 }
 0x1e6   : > { %5522 = vst.msk [vmem:[#allocation2 + $0x18] sm:$0xff] %vm172_vm9, %v5490_v39 }
 0x1e7   : > { %v6979_v56 = vpop.f32.mrb[116].mxu0  ;;  %5520 = vst.msk [vmem:[#allocation2 + $0x8] sm:$0xff] %vm172_vm9, %v5488_v50  ;;  %v6949_v6 = vpop.f32.mrb[120].mxu1 }
 0x1e8   : > { %v5376_v60 = vpop.f32.mrb[117].mxu0  ;;  %v4931_v27 = vadd.f32 %v6949_v6, %v4637_v4  ;;  %v4826_v23 = vpop.f32.mrb[121].mxu1 }
 0x1e9   : > { %v6980_v21 = vpop.f32.mrb[118].mxu0  ;;  %v5199_v5 = vld [vmem:[#allocation2 + $0x30] sm:$0xff]  ;;  %v4929_v0 = vadd.f32 %v4826_v23, %v4635_v63  ;;  %v6950_v10 = vpop.f32.mrb[122].mxu1 }
 0x1ea   : > { %v5379_v29 = vpop.f32.mrb[119].mxu0  ;;  %v5493_v30 = vadd.f32 %v6979_v56, %v5199_v5  ;;  %4963 = vst.msk [vmem:[#allocation2 + $0x50] sm:$0xff] %vm172_vm9, %v4931_v27  ;;  %v5197_v62 = vld [vmem:[#allocation2 + $0x20] sm:$0xff]  ;;  %v4932_v15 = vadd.f32 %v6950_v10, %v4638_v13  ;;  %v4829_v55 = vpop.f32.mrb[123].mxu1 }
 0x1eb   : > { %v5553_v28 = vld [vmem:[#allocation2 + $0x10] sm:$0xff]  ;;  %v5491_v1 = vadd.f32 %v5376_v60, %v5197_v62  ;;  %4961 = vst.msk [vmem:[#allocation2 + $0x40] sm:$0xff] %vm172_vm9, %v4929_v0  ;;  %v5200_v11 = vld [vmem:[#allocation2 + $0x38] sm:$0xff]  ;;  %v4930_v33 = vadd.f32 %v4829_v55, %v4636_v32 }
 0x1ec   : > { %v5592_v31 = vadd.f32 %v8681_v2, %v5553_v28  ;;  %v5551_v26 = vld [vmem:[#allocation2] sm:$0xff]  ;;  %5525 = vst.msk [vmem:[#allocation2 + $0x30] sm:$0xff] %vm172_vm9, %v5493_v30  ;;  %v5494_v58 = vadd.f32 %v6980_v21, %v5200_v11  ;;  %4964 = vst.msk [vmem:[#allocation2 + $0x58] sm:$0xff] %vm172_vm9, %v4932_v15  ;;  %v5198_v37 = vld [vmem:[#allocation2 + $0x28] sm:$0xff] }
 0x1ed   : > { %v5590_v17 = vadd.f32 %v8681_v2, %v5551_v26  ;;  %v5554_v38 = vld [vmem:[#allocation2 + $0x18] sm:$0xff]  ;;  %5523 = vst.msk [vmem:[#allocation2 + $0x20] sm:$0xff] %vm172_vm9, %v5491_v1  ;;  %v5492_v19 = vadd.f32 %v5379_v29, %v5198_v37  ;;  %4962 = vst.msk [vmem:[#allocation2 + $0x48] sm:$0xff] %vm172_vm9, %v4930_v33  ;;  %v4645_v30 = vld [vmem:[#allocation2 + $0x90] sm:$0xff] }
 0x1ee   : > { %v5624_v18 = vmax.f32 %v5592_v31, 0.0  ;;  %v5593_v41 = vadd.f32 %v8681_v2, %v5554_v38  ;;  %v5552_v47 = vld [vmem:[#allocation2 + $0x8] sm:$0xff]  ;;  %5526 = vst.msk [vmem:[#allocation2 + $0x38] sm:$0xff] %vm172_vm9, %v5494_v58  ;;  %v4643_v1 = vld [vmem:[#allocation2 + $0x80] sm:$0xff] }
 0x1ef   : > { %v6983_v22 = vpop.f32.mrb[120].mxu0  ;;  %v5622_v52 = vmax.f32 %v5590_v17, 0.0  ;;  %v5591_v14 = vadd.f32 %v8681_v2, %v5552_v47  ;;  %5524 = vst.msk [vmem:[#allocation2 + $0x28] sm:$0xff] %vm172_vm9, %v5492_v19  ;;  %v4646_v17 = vld [vmem:[#allocation2 + $0x98] sm:$0xff]  ;;  %v4644_v47 = vld [vmem:[#allocation2 + $0x88] sm:$0xff] }
 0x1f0   : > { %v5392_v43 = vpop.f32.mrb[121].mxu0  ;;  %v6516_v49 = vpack.c.bf16 %v5624_v18, %v5624_v18  ;;  %v5625_v54 = vmax.f32 %v5593_v41, 0.0 }
 0x1f1   : > { %v6953_v45 = vpop.f32.mrb[124].mxu1  ;;  %v6984_v12 = vpop.f32.mrb[122].mxu0  ;;  %v6514_v57 = vpack.c.bf16 %v5622_v52, %v5622_v52  ;;  %v5623_v24 = vmax.f32 %v5591_v14, 0.0  ;;  %v5203_v7 = vld [vmem:[#allocation2 + $0x50] sm:$0xff] }
 0x1f2   : > { %v4935_v48 = vadd.f32 %v6953_v45, %v4641_v61  ;;  %v4842_v25 = vpop.f32.mrb[125].mxu1  ;;  %v5395_v46 = vpop.f32.mrb[123].mxu0  ;;  %5785 = vst.msk [vmem:[%s8697_s15 + $0x8] sm:$0xf] %vm5782_vm10, %v6516_v49  ;;  %v6517_v51 = vpack.c.bf16 %v5625_v54, %v5625_v54  ;;  %v5497_v44 = vadd.f32 %v6983_v22, %v5203_v7  ;;  %v5201_v20 = vld [vmem:[#allocation2 + $0x40] sm:$0xff] }
 0x1f3   : > { %v4933_v8 = vadd.f32 %v4842_v25, %v4639_v42  ;;  %v6954_v40 = vpop.f32.mrb[126].mxu1  ;;  %5783 = vst.msk [vmem:[%s8697_s15] sm:$0xf] %vm5782_vm10, %v6514_v57  ;;  %v6515_v59 = vpack.c.bf16 %v5623_v24, %v5623_v24  ;;  %v5557_v16 = vld [vmem:[#allocation2 + $0x30] sm:$0xff]  ;;  %v5495_v9 = vadd.f32 %v5392_v43, %v5201_v20  ;;  %v5204_v39 = vld [vmem:[#allocation2 + $0x58] sm:$0xff] }
 0x1f4   : > { %4967 = vst.msk [vmem:[#allocation2 + $0x70] sm:$0xff] %vm172_vm9, %v4935_v48  ;;  %v4936_v36 = vadd.f32 %v6954_v40, %v4642_v34  ;;  %v4845_v53 = vpop.f32.mrb[127].mxu1  ;;  %v5596_v50 = vadd.f32 %v8681_v2, %v5557_v16  ;;  %v5555_v56 = vld [vmem:[#allocation2 + $0x20] sm:$0xff]  ;;  %5529 = vst.msk [vmem:[#allocation2 + $0x50] sm:$0xff] %vm172_vm9, %v5497_v44  ;;  %v5498_v60 = vadd.f32 %v6984_v12, %v5204_v39  ;;  %v5202_v4 = vld [vmem:[#allocation2 + $0x48] sm:$0xff] }
 0x1f5   : > { %4965 = vst.msk [vmem:[#allocation2 + $0x60] sm:$0xff] %vm172_vm9, %v4933_v8  ;;  %v4934_v35 = vadd.f32 %v4845_v53, %v4640_v3  ;;  %v5594_v6 = vadd.f32 %v8681_v2, %v5555_v56  ;;  %v5558_v21 = vld [vmem:[#allocation2 + $0x38] sm:$0xff]  ;;  %5527 = vst.msk [vmem:[#allocation2 + $0x40] sm:$0xff] %vm172_vm9, %v5495_v9  ;;  %v5496_v27 = vadd.f32 %v5395_v46, %v5202_v4 }
 0x1f6   : > { %5786 = vst.msk [vmem:[%s8697_s15 + $0xc] sm:$0xf] %vm5782_vm10, %v6517_v51  ;;  %5784 = vst.msk [vmem:[%s8697_s15 + $0x4] sm:$0xf] %vm5782_vm10, %v6515_v59  ;;  %v5628_v23 = vmax.f32 %v5596_v50, 0.0  ;;  %v5597_v29 = vadd.f32 %v8681_v2, %v5558_v21  ;;  %v5556_v5 = vld [vmem:[#allocation2 + $0x28] sm:$0xff] }
 0x1f7   : > { %4968 = vst.msk [vmem:[#allocation2 + $0x78] sm:$0xff] %vm172_vm9, %v4936_v36  ;;  %4966 = vst.msk [vmem:[#allocation2 + $0x68] sm:$0xff] %vm172_vm9, %v4934_v35  ;;  %v5626_v13 = vmax.f32 %v5594_v6, 0.0  ;;  %v5595_v10 = vadd.f32 %v8681_v2, %v5556_v5 }
 0x1f8   : > { %v6987_v63 = vpop.f32.mrb[124].mxu0  ;;  %5530 = vst.msk [vmem:[#allocation2 + $0x58] sm:$0xff] %vm172_vm9, %v5498_v60  ;;  %5528 = vst.msk [vmem:[#allocation2 + $0x48] sm:$0xff] %vm172_vm9, %v5496_v27  ;;  %v6520_v32 = vpack.c.bf16 %v5628_v23, %v5628_v23  ;;  %v5629_v55 = vmax.f32 %v5597_v29, 0.0 }
 0x1f9   : > { %v5408_v0 = vpop.f32.mrb[125].mxu0  ;;  %v6518_v31 = vpack.c.bf16 %v5626_v13, %v5626_v13  ;;  %v5627_v26 = vmax.f32 %v5595_v10, 0.0 }
 0x1fa   : > { %v6988_v15 = vpop.f32.mrb[126].mxu0  ;;  %5789 = vst.msk [vmem:[%s8697_s15 + $0x18] sm:$0xf] %vm5782_vm10, %v6520_v32  ;;  %v6521_v19 = vpack.c.bf16 %v5629_v55, %v5629_v55  ;;  %v4647_v55 = vld [vmem:[#allocation2 + $0xa0] sm:$0xff] }
 0x1fb   : > { %v5411_v33 = vpop.f32.mrb[127].mxu0  ;;  %v5207_v58 = vld [vmem:[#allocation2 + $0x70] sm:$0xff]  ;;  %5787 = vst.msk [vmem:[%s8697_s15 + $0x10] sm:$0xf] %vm5782_vm10, %v6518_v31  ;;  %v6519_v52 = vpack.c.bf16 %v5627_v26, %v5627_v26  ;;  %v4650_v31 = vld [vmem:[#allocation2 + $0xb8] sm:$0xff] }
 0x1fc   : > { %v5501_v22 = vadd.f32 %v6987_v63, %v5207_v58  ;;  %v5205_v18 = vld [vmem:[#allocation2 + $0x60] sm:$0xff]  ;;  %v5561_v14 = vld [vmem:[#allocation2 + $0x50] sm:$0xff]  ;;  %5790 = vst.msk [vmem:[%s8697_s15 + $0x1c] sm:$0xf] %vm5782_vm10, %v6521_v19 }
 0x1fd   : > { %v5499_v61 = vadd.f32 %v5408_v0, %v5205_v18  ;;  %v5600_v49 = vadd.f32 %v8681_v2, %v5561_v14  ;;  %v5559_v54 = vld [vmem:[#allocation2 + $0x40] sm:$0xff]  ;;  %5788 = vst.msk [vmem:[%s8697_s15 + $0x14] sm:$0xf] %vm5782_vm10, %v6519_v52  ;;  %v4649_v0 = vld [vmem:[#allocation2 + $0xb0] sm:$0xff] }
 0x1fe   : > { %v5208_v45 = vld [vmem:[#allocation2 + $0x78] sm:$0xff]  ;;  %5533 = vst.msk [vmem:[#allocation2 + $0x70] sm:$0xff] %vm172_vm9, %v5501_v22  ;;  %v5206_v42 = vld [vmem:[#allocation2 + $0x68] sm:$0xff]  ;;  %v5598_v25 = vadd.f32 %v8681_v2, %v5559_v54 }
 0x1ff   : > { %v5502_v48 = vadd.f32 %v6988_v15, %v5208_v45  ;;  %v5562_v46 = vld [vmem:[#allocation2 + $0x58] sm:$0xff]  ;;  %5531 = vst.msk [vmem:[#allocation2 + $0x60] sm:$0xff] %vm172_vm9, %v5499_v61  ;;  %v5500_v57 = vadd.f32 %v5411_v33, %v5206_v42  ;;  %v5632_v24 = vmax.f32 %v5600_v49, 0.0  ;;  %v5560_v8 = vld [vmem:[#allocation2 + $0x48] sm:$0xff] }
 0x200   : > { %v6957_v62 = vpop.f32.mrb[128].mxu1  ;;  %v5601_v7 = vadd.f32 %v8681_v2, %v5562_v46  ;;  %v5630_v40 = vmax.f32 %v5598_v25, 0.0  ;;  %v5599_v51 = vadd.f32 %v8681_v2, %v5560_v8 }
 0x201   : > { %v4939_v28 = vadd.f32 %v6957_v62, %v4645_v30  ;;  %v4858_v11 = vpop.f32.mrb[129].mxu1  ;;  %5534 = vst.msk [vmem:[#allocation2 + $0x78] sm:$0xff] %vm172_vm9, %v5502_v48  ;;  %5532 = vst.msk [vmem:[#allocation2 + $0x68] sm:$0xff] %vm172_vm9, %v5500_v57  ;;  %v6524_v20 = vpack.c.bf16 %v5632_v24, %v5632_v24 }
 0x202   : > { %v4937_v37 = vadd.f32 %v4858_v11, %v4643_v1  ;;  %v6958_v38 = vpop.f32.mrb[130].mxu1  ;;  %v5633_v36 = vmax.f32 %v5601_v7, 0.0  ;;  %v6522_v53 = vpack.c.bf16 %v5630_v40, %v5630_v40  ;;  %v5631_v59 = vmax.f32 %v5599_v51, 0.0 }
 0x203   : > { %4971 = vst.msk [vmem:[#allocation2 + $0x90] sm:$0xff] %vm172_vm9, %v4939_v28  ;;  %v4940_v41 = vadd.f32 %v6958_v38, %v4646_v17  ;;  %v4861_v43 = vpop.f32.mrb[131].mxu1  ;;  %v4648_v38 = vld [vmem:[#allocation2 + $0xa8] sm:$0xff] }
 0x204   : > { %4969 = vst.msk [vmem:[#allocation2 + $0x80] sm:$0xff] %vm172_vm9, %v4937_v37  ;;  %v4938_v12 = vadd.f32 %v4861_v43, %v4644_v47  ;;  %v6525_v39 = vpack.c.bf16 %v5633_v36, %v5633_v36  ;;  %v6523_v56 = vpack.c.bf16 %v5631_v59, %v5631_v59 }
 0x205   : > { %4972 = vst.msk [vmem:[#allocation2 + $0x98] sm:$0xff] %vm172_vm9, %v4940_v41  ;;  %v5565_v60 = vld [vmem:[#allocation2 + $0x70] sm:$0xff] }
 0x206   : > { %4970 = vst.msk [vmem:[#allocation2 + $0x88] sm:$0xff] %vm172_vm9, %v4938_v12  ;;  %v5604_v21 = vadd.f32 %v8681_v2, %v5565_v60  ;;  %v5563_v27 = vld [vmem:[#allocation2 + $0x60] sm:$0xff] }
 0x207   : > { %v6991_v34 = vpop.f32.mrb[128].mxu0  ;;  %5793 = vst.msk [vmem:[%s8697_s15 + $0x28] sm:$0xf] %vm5782_vm10, %v6524_v20  ;;  %5791 = vst.msk [vmem:[%s8697_s15 + $0x20] sm:$0xf] %vm5782_vm10, %v6522_v53  ;;  %v5602_v29 = vadd.f32 %v8681_v2, %v5563_v27  ;;  %v4654_v27 = vld [vmem:[#allocation2 + $0xd8] sm:$0xff] }
 0x208   : > { %v5424_v44 = vpop.f32.mrb[129].mxu0  ;;  %5794 = vst.msk [vmem:[%s8697_s15 + $0x2c] sm:$0xf] %vm5782_vm10, %v6525_v39  ;;  %5792 = vst.msk [vmem:[%s8697_s15 + $0x24] sm:$0xf] %vm5782_vm10, %v6523_v56  ;;  %v5566_v5 = vld [vmem:[#allocation2 + $0x78] sm:$0xff] }
 0x209   : > { %v6992_v3 = vpop.f32.mrb[130].mxu0  ;;  %v5636_v30 = vmax.f32 %v5604_v21, 0.0  ;;  %v5605_v62 = vadd.f32 %v8681_v2, %v5566_v5  ;;  %v5564_v15 = vld [vmem:[#allocation2 + $0x68] sm:$0xff]  ;;  %v5634_v1 = vmax.f32 %v5602_v29, 0.0 }
 0x20a   : > { %v5211_v16 = vld [vmem:[#allocation2 + $0x90] sm:$0xff]  ;;  %v5427_v9 = vpop.f32.mrb[131].mxu0  ;;  %v5603_v11 = vadd.f32 %v8681_v2, %v5564_v15  ;;  %v4652_v29 = vld [vmem:[#allocation2 + $0xc8] sm:$0xff] }
 0x20b   : > { %v5505_v35 = vadd.f32 %v6991_v34, %v5211_v16  ;;  %v5209_v50 = vld [vmem:[#allocation2 + $0x80] sm:$0xff]  ;;  %v6528_v58 = vpack.c.bf16 %v5636_v30, %v5636_v30  ;;  %v5637_v37 = vmax.f32 %v5605_v62, 0.0  ;;  %v6526_v22 = vpack.c.bf16 %v5634_v1, %v5634_v1 }
 0x20c   : > { %v5503_v4 = vadd.f32 %v5424_v44, %v5209_v50  ;;  %v5212_v6 = vld [vmem:[#allocation2 + $0x98] sm:$0xff]  ;;  %v5635_v18 = vmax.f32 %v5603_v11, 0.0 }
 0x20d   : > { %5537 = vst.msk [vmem:[#allocation2 + $0x90] sm:$0xff] %vm172_vm9, %v5505_v35  ;;  %v5506_v63 = vadd.f32 %v6992_v3, %v5212_v6  ;;  %v5210_v23 = vld [vmem:[#allocation2 + $0x88] sm:$0xff]  ;;  %v6961_v13 = vpop.f32.mrb[132].mxu1  ;;  %v6529_v47 = vpack.c.bf16 %v5637_v37, %v5637_v37  ;;  %v4653_v35 = vld [vmem:[#allocation2 + $0xd0] sm:$0xff] }
 0x20e   : > { %5535 = vst.msk [vmem:[#allocation2 + $0x80] sm:$0xff] %vm172_vm9, %v5503_v4  ;;  %v5504_v10 = vadd.f32 %v5427_v9, %v5210_v23  ;;  %v4943_v32 = vadd.f32 %v6961_v13, %v4649_v0  ;;  %v4874_v28 = vpop.f32.mrb[133].mxu1  ;;  %v6527_v43 = vpack.c.bf16 %v5635_v18, %v5635_v18  ;;  %v4651_v4 = vld [vmem:[#allocation2 + $0xc0] sm:$0xff] }
 0x20f   : > { %5538 = vst.msk [vmem:[#allocation2 + $0x98] sm:$0xff] %vm172_vm9, %v5506_v63  ;;  %v4941_v33 = vadd.f32 %v4874_v28, %v4647_v55  ;;  %v6962_v26 = vpop.f32.mrb[134].mxu1 }
 0x210   : > { %5536 = vst.msk [vmem:[#allocation2 + $0x88] sm:$0xff] %vm172_vm9, %v5504_v10  ;;  %4975 = vst.msk [vmem:[#allocation2 + $0xb0] sm:$0xff] %vm172_vm9, %v4943_v32  ;;  %v4944_v17 = vadd.f32 %v6962_v26, %v4650_v31  ;;  %v4877_v19 = vpop.f32.mrb[135].mxu1 }
 0x211   : > { %4973 = vst.msk [vmem:[#allocation2 + $0xa0] sm:$0xff] %vm172_vm9, %v4941_v33  ;;  %v4942_v41 = vadd.f32 %v4877_v19, %v4648_v38 }
 0x212   : > { %5797 = vst.msk [vmem:[%s8697_s15 + $0x38] sm:$0xf] %vm5782_vm10, %v6528_v58  ;;  %5795 = vst.msk [vmem:[%s8697_s15 + $0x30] sm:$0xf] %vm5782_vm10, %v6526_v22 }
 0x213   : > { %4976 = vst.msk [vmem:[#allocation2 + $0xb8] sm:$0xff] %vm172_vm9, %v4944_v17  ;;  %4974 = vst.msk [vmem:[#allocation2 + $0xa8] sm:$0xff] %vm172_vm9, %v4942_v41 }
 0x214   : > { %v5569_v52 = vld [vmem:[#allocation2 + $0x90] sm:$0xff]  ;;  %5798 = vst.msk [vmem:[%s8697_s15 + $0x3c] sm:$0xf] %vm5782_vm10, %v6529_v47  ;;  %5796 = vst.msk [vmem:[%s8697_s15 + $0x34] sm:$0xf] %vm5782_vm10, %v6527_v43 }
 0x215   : > { %v5608_v14 = vadd.f32 %v8681_v2, %v5569_v52  ;;  %v5567_v61 = vld [vmem:[#allocation2 + $0x80] sm:$0xff]  ;;  %v6995_v45 = vpop.f32.mrb[132].mxu0 }
 0x216   : > { %v5606_v12 = vadd.f32 %v8681_v2, %v5567_v61  ;;  %v5570_v49 = vld [vmem:[#allocation2 + $0x98] sm:$0xff]  ;;  %v5440_v54 = vpop.f32.mrb[133].mxu0 }
 0x217   : > { %v5640_v48 = vmax.f32 %v5608_v14, 0.0  ;;  %v5609_v42 = vadd.f32 %v8681_v2, %v5570_v49  ;;  %v5568_v25 = vld [vmem:[#allocation2 + $0x88] sm:$0xff]  ;;  %v6996_v46 = vpop.f32.mrb[134].mxu0  ;;  %v5215_v7 = vld [vmem:[#allocation2 + $0xb0] sm:$0xff] }
 0x218   : > { %v5638_v57 = vmax.f32 %v5606_v12, 0.0  ;;  %v5607_v24 = vadd.f32 %v8681_v2, %v5568_v25  ;;  %v5443_v8 = vpop.f32.mrb[135].mxu0  ;;  %v5509_v51 = vadd.f32 %v6995_v45, %v5215_v7  ;;  %v5213_v44 = vld [vmem:[#allocation2 + $0xa0] sm:$0xff]  ;;  %v4657_v12 = vld [vmem:[#allocation2 + $0xf0] sm:$0xff] }
 0x219   : > { %v6532_v34 = vpack.c.bf16 %v5640_v48, %v5640_v48  ;;  %v5641_v40 = vmax.f32 %v5609_v42, 0.0  ;;  %v5507_v3 = vadd.f32 %v5440_v54, %v5213_v44  ;;  %v4655_v42 = vld [vmem:[#allocation2 + $0xe0] sm:$0xff] }
 0x21a   : > { %v6530_v20 = vpack.c.bf16 %v5638_v57, %v5638_v57  ;;  %v5639_v36 = vmax.f32 %v5607_v24, 0.0  ;;  %v5216_v53 = vld [vmem:[#allocation2 + $0xb8] sm:$0xff]  ;;  %5541 = vst.msk [vmem:[#allocation2 + $0xb0] sm:$0xff] %vm172_vm9, %v5509_v51  ;;  %v5214_v9 = vld [vmem:[#allocation2 + $0xa8] sm:$0xff] }
 0x21b   : > { %5801 = vst.msk [vmem:[%s8697_s15 + $0x48] sm:$0xf] %vm5782_vm10, %v6532_v34  ;;  %v6533_v59 = vpack.c.bf16 %v5641_v40, %v5641_v40  ;;  %v5510_v16 = vadd.f32 %v6996_v46, %v5216_v53  ;;  %v5508_v56 = vadd.f32 %v5443_v8, %v5214_v9  ;;  %v4658_v57 = vld [vmem:[#allocation2 + $0xf8] sm:$0xff]  ;;  %v4656_v8 = vld [vmem:[#allocation2 + $0xe8] sm:$0xff] }
 0x21c   : > { %5799 = vst.msk [vmem:[%s8697_s15 + $0x40] sm:$0xf] %vm5782_vm10, %v6530_v20  ;;  %v6531_v39 = vpack.c.bf16 %v5639_v36, %v5639_v36  ;;  %v6965_v50 = vpop.f32.mrb[136].mxu1 }
 0x21d   : > { %5539 = vst.msk [vmem:[#allocation2 + $0xa0] sm:$0xff] %vm172_vm9, %v5507_v3  ;;  %v4947_v60 = vadd.f32 %v6965_v50, %v4653_v35  ;;  %v4890_v6 = vpop.f32.mrb[137].mxu1  ;;  %5542 = vst.msk [vmem:[#allocation2 + $0xb8] sm:$0xff] %vm172_vm9, %v5510_v16 }
 0x21e   : > { %5802 = vst.msk [vmem:[%s8697_s15 + $0x4c] sm:$0xf] %vm5782_vm10, %v6533_v59  ;;  %5800 = vst.msk [vmem:[%s8697_s15 + $0x44] sm:$0xf] %vm5782_vm10, %v6531_v39  ;;  %v4945_v21 = vadd.f32 %v4890_v6, %v4651_v4  ;;  %v6966_v63 = vpop.f32.mrb[138].mxu1 }
 0x21f   : > { %5540 = vst.msk [vmem:[#allocation2 + $0xa8] sm:$0xff] %vm172_vm9, %v5508_v56  ;;  %4979 = vst.msk [vmem:[#allocation2 + $0xd0] sm:$0xff] %vm172_vm9, %v4947_v60  ;;  %v4948_v23 = vadd.f32 %v6966_v63, %v4654_v27  ;;  %v4893_v5 = vpop.f32.mrb[139].mxu1 }
 0x220   : > { %4977 = vst.msk [vmem:[#allocation2 + $0xc0] sm:$0xff] %vm172_vm9, %v4945_v21  ;;  %v4946_v0 = vadd.f32 %v4893_v5, %v4652_v29 }
 0x221   : > { %4980 = vst.msk [vmem:[#allocation2 + $0xd8] sm:$0xff] %vm172_vm9, %v4948_v23  ;;  %v5573_v13 = vld [vmem:[#allocation2 + $0xb0] sm:$0xff] }
 0x222   : > { %4978 = vst.msk [vmem:[#allocation2 + $0xc8] sm:$0xff] %vm172_vm9, %v4946_v0  ;;  %v5612_v10 = vadd.f32 %v8681_v2, %v5573_v13 }
 0x223   : > { %v6999_v62 = vpop.f32.mrb[136].mxu0 }
 0x224   : > { %v5571_v30 = vld [vmem:[#allocation2 + $0xa0] sm:$0xff]  ;;  %v5574_v32 = vld [vmem:[#allocation2 + $0xb8] sm:$0xff]  ;;  %v5456_v55 = vpop.f32.mrb[137].mxu0  ;;  %v5644_v28 = vmax.f32 %v5612_v10, 0.0 }
 0x225   : > { %v5610_v15 = vadd.f32 %v8681_v2, %v5571_v30  ;;  %v5613_v1 = vadd.f32 %v8681_v2, %v5574_v32  ;;  %v7000_v33 = vpop.f32.mrb[138].mxu0 }
 0x226   : > { %v5572_v11 = vld [vmem:[#allocation2 + $0xa8] sm:$0xff]  ;;  %v5219_v58 = vld [vmem:[#allocation2 + $0xd0] sm:$0xff]  ;;  %v5459_v37 = vpop.f32.mrb[139].mxu0  ;;  %v6536_v17 = vpack.c.bf16 %v5644_v28, %v5644_v28 }
 0x227   : > { %v5642_v31 = vmax.f32 %v5610_v15, 0.0  ;;  %v5611_v26 = vadd.f32 %v8681_v2, %v5572_v11  ;;  %v5645_v38 = vmax.f32 %v5613_v1, 0.0  ;;  %v5513_v19 = vadd.f32 %v6999_v62, %v5219_v58  ;;  %v5217_v22 = vld [vmem:[#allocation2 + $0xc0] sm:$0xff] }
 0x228   : > { %v5511_v47 = vadd.f32 %v5456_v55, %v5217_v22  ;;  %v5220_v43 = vld [vmem:[#allocation2 + $0xd8] sm:$0xff]  ;;  %5805 = vst.msk [vmem:[%s8697_s15 + $0x58] sm:$0xf] %vm5782_vm10, %v6536_v17 }
 0x229   : > { %v6534_v18 = vpack.c.bf16 %v5642_v31, %v5642_v31  ;;  %v5643_v41 = vmax.f32 %v5611_v26, 0.0  ;;  %v6537_v52 = vpack.c.bf16 %v5645_v38, %v5645_v38  ;;  %5545 = vst.msk [vmem:[#allocation2 + $0xd0] sm:$0xff] %vm172_vm9, %v5513_v19  ;;  %v5514_v14 = vadd.f32 %v7000_v33, %v5220_v43  ;;  %v5218_v61 = vld [vmem:[#allocation2 + $0xc8] sm:$0xff] }
 0x22a   : > { %v6969_v49 = vpop.f32.mrb[140].mxu1  ;;  %5543 = vst.msk [vmem:[#allocation2 + $0xc0] sm:$0xff] %vm172_vm9, %v5511_v47  ;;  %v5512_v54 = vadd.f32 %v5459_v37, %v5218_v61 }
 0x22b   : > { %5803 = vst.msk [vmem:[%s8697_s15 + $0x50] sm:$0xf] %vm5782_vm10, %v6534_v18  ;;  %v6535_v45 = vpack.c.bf16 %v5643_v41, %v5643_v41  ;;  %5806 = vst.msk [vmem:[%s8697_s15 + $0x5c] sm:$0xf] %vm5782_vm10, %v6537_v52  ;;  %v4951_v48 = vadd.f32 %v6969_v49, %v4657_v12  ;;  %v4906_v25 = vpop.f32.mrb[141].mxu1 }
 0x22c   : > { %5546 = vst.msk [vmem:[#allocation2 + $0xd8] sm:$0xff] %vm172_vm9, %v5514_v14  ;;  %v4949_v46 = vadd.f32 %v4906_v25, %v4655_v42  ;;  %v6970_v24 = vpop.f32.mrb[142].mxu1  ;;  %5544 = vst.msk [vmem:[#allocation2 + $0xc8] sm:$0xff] %vm172_vm9, %v5512_v54 }
 0x22d   : > { %5804 = vst.msk [vmem:[%s8697_s15 + $0x54] sm:$0xf] %vm5782_vm10, %v6535_v45  ;;  %v4952_v7 = vadd.f32 %v6970_v24, %v4658_v57  ;;  %v4909_v34 = vpop.f32.mrb[143].mxu1 }
 0x22e   : > { %4983 = vst.msk [vmem:[#allocation2 + $0xf0] sm:$0xff] %vm172_vm9, %v4951_v48  ;;  %4981 = vst.msk [vmem:[#allocation2 + $0xe0] sm:$0xff] %vm172_vm9, %v4949_v46  ;;  %v4950_v40 = vadd.f32 %v4909_v34, %v4656_v8  ;;  %v7003_v51 = vpop.f32.mrb[140].mxu0 }
 0x22f   : > { %4984 = vst.msk [vmem:[#allocation2 + $0xf8] sm:$0xff] %vm172_vm9, %v4952_v7  ;;  %v5472_v44 = vpop.f32.mrb[141].mxu0 }
 0x230   : > { %v5577_v20 = vld [vmem:[#allocation2 + $0xd0] sm:$0xff]  ;;  %4982 = vst.msk [vmem:[#allocation2 + $0xe8] sm:$0xff] %vm172_vm9, %v4950_v40  ;;  %v7004_v36 = vpop.f32.mrb[142].mxu0 }
 0x231   : > { %v5616_v3 = vadd.f32 %v8681_v2, %v5577_v20  ;;  %v5575_v53 = vld [vmem:[#allocation2 + $0xc0] sm:$0xff]  ;;  %v5475_v59 = vpop.f32.mrb[143].mxu0 }
 0x232   : > { %v5614_v16 = vadd.f32 %v8681_v2, %v5575_v53 }
 0x233   : > { %v5578_v9 = vld [vmem:[#allocation2 + $0xd8] sm:$0xff]  ;;  %v5648_v39 = vmax.f32 %v5616_v3, 0.0  ;;  %v5576_v50 = vld [vmem:[#allocation2 + $0xc8] sm:$0xff] }
 0x234   : > { %v5617_v35 = vadd.f32 %v8681_v2, %v5578_v9  ;;  %v5646_v56 = vmax.f32 %v5614_v16, 0.0  ;;  %v5615_v60 = vadd.f32 %v8681_v2, %v5576_v50 }
 0x235   : > { %v5223_v4 = vld [vmem:[#allocation2 + $0xf0] sm:$0xff]  ;;  %v6540_v6 = vpack.c.bf16 %v5648_v39, %v5648_v39  ;;  %v5221_v63 = vld [vmem:[#allocation2 + $0xe0] sm:$0xff] }
 0x236   : > { %v5649_v21 = vmax.f32 %v5617_v35, 0.0  ;;  %v5517_v27 = vadd.f32 %v7003_v51, %v5223_v4  ;;  %v6538_v23 = vpack.c.bf16 %v5646_v56, %v5646_v56  ;;  %v5647_v29 = vmax.f32 %v5615_v60, 0.0  ;;  %v5224_v0 = vld [vmem:[#allocation2 + $0xf8] sm:$0xff] }
 0x237   : > { %v5515_v5 = vadd.f32 %v5472_v44, %v5221_v63  ;;  %5809 = vst.msk [vmem:[%s8697_s15 + $0x68] sm:$0xf] %vm5782_vm10, %v6540_v6  ;;  %v5518_v10 = vadd.f32 %v7004_v36, %v5224_v0  ;;  %v5222_v30 = vld [vmem:[#allocation2 + $0xe8] sm:$0xff] }
 0x238   : > { %v6541_v13 = vpack.c.bf16 %v5649_v21, %v5649_v21  ;;  %5549 = vst.msk [vmem:[#allocation2 + $0xf0] sm:$0xff] %vm172_vm9, %v5517_v27  ;;  %v6539_v62 = vpack.c.bf16 %v5647_v29, %v5647_v29  ;;  %v5516_v15 = vadd.f32 %v5475_v59, %v5222_v30 }
 0x239   : > { %5807 = vst.msk [vmem:[%s8697_s15 + $0x60] sm:$0xf] %vm5782_vm10, %v6538_v23 }
 0x23a   : > { %5547 = vst.msk [vmem:[#allocation2 + $0xe0] sm:$0xff] %vm172_vm9, %v5515_v5  ;;  %5550 = vst.msk [vmem:[#allocation2 + $0xf8] sm:$0xff] %vm172_vm9, %v5518_v10 }
 0x23b   : > { %5810 = vst.msk [vmem:[%s8697_s15 + $0x6c] sm:$0xf] %vm5782_vm10, %v6541_v13  ;;  %5808 = vst.msk [vmem:[%s8697_s15 + $0x64] sm:$0xf] %vm5782_vm10, %v6539_v62 }
 0x23c   : > { %5548 = vst.msk [vmem:[#allocation2 + $0xe8] sm:$0xff] %vm172_vm9, %v5516_v15 }
 0x23f   : > { %v5581_v32 = vld [vmem:[#allocation2 + $0xf0] sm:$0xff] }
 0x240   : > { %v5620_v55 = vadd.f32 %v8681_v2, %v5581_v32 }
 0x241   : > { %v5579_v28 = vld [vmem:[#allocation2 + $0xe0] sm:$0xff]  ;;  %v5582_v11 = vld [vmem:[#allocation2 + $0xf8] sm:$0xff] }
 0x242   : > { %v5618_v1 = vadd.f32 %v8681_v2, %v5579_v28  ;;  %v5652_v33 = vmax.f32 %v5620_v55, 0.0  ;;  %v5621_v31 = vadd.f32 %v8681_v2, %v5582_v11 }
 0x243   : > { %v5580_v26 = vld [vmem:[#allocation2 + $0xe8] sm:$0xff] }
 0x244   : > { %v5650_v58 = vmax.f32 %v5618_v1, 0.0  ;;  %v5619_v37 = vadd.f32 %v8681_v2, %v5580_v26  ;;  %v6544_v17 = vpack.c.bf16 %v5652_v33, %v5652_v33  ;;  %v5653_v38 = vmax.f32 %v5621_v31, 0.0 }
 0x246   : > { %v6542_v19 = vpack.c.bf16 %v5650_v58, %v5650_v58  ;;  %v5651_v22 = vmax.f32 %v5619_v37, 0.0  ;;  %5813 = vst.msk [vmem:[%s8697_s15 + $0x78] sm:$0xf] %vm5782_vm10, %v6544_v17  ;;  %v6545_v18 = vpack.c.bf16 %v5653_v38, %v5653_v38 }
 0x248   : > { %5811 = vst.msk [vmem:[%s8697_s15 + $0x70] sm:$0xf] %vm5782_vm10, %v6542_v19  ;;  %v6543_v41 = vpack.c.bf16 %v5651_v22, %v5651_v22  ;;  %5814 = vst.msk [vmem:[%s8697_s15 + $0x7c] sm:$0xf] %vm5782_vm10, %v6545_v18 }
 0x24a   : > { %5812 = vst.msk [vmem:[%s8697_s15 + $0x74] sm:$0xf] %vm5782_vm10, %v6543_v41 }
 0x24b PF: > { %s13_s12 = sadd.s32 1, %s7072_s12  }
 0x24c   : > { %p10_p4 = scmp.ge.s32.totalorder %s13_s12, 6  }
 0x24e   :  { %12 = sbr.rel (!%p10_p4) target bundleno = 1 (0x1), region = 72 }

</bundles_post_ra>
